<compile_context>
chip_gen: v7x
topology: tpu7x:2x2x1
jax: 0.10.0
libtpu: 0.0.40
codegen_flags: <defaults>
</compile_context>

<pallas_src>
import jax
import jax.numpy as jnp
from jax import lax
from jax.experimental import pallas as pl
from jax.experimental.pallas import tpu as pltpu


# ----------------------------------------------------------------------------
# helpers
# ----------------------------------------------------------------------------
def _largest_divisor_leq(n, cap):
    d = min(n, cap)
    while n % d:
        d -= 1
    return d


def _pick_td_tile(td, cap=256):
    if td <= cap:
        return td
    d = (cap // 8) * 8
    while d >= 8:
        if td % d == 0:
            return d
        d -= 8
    return td  # fallback: whole axis in one block


# ----------------------------------------------------------------------------
# LSTM layer kernel
#   grid = (B-tiles ["parallel"], T-chunks ["arbitrary"])
#   h/c carried in VMEM scratch across T-chunks; per-chunk x-projection is
#   precomputed into VMEM scratch so the serial loop only does h @ W_hh + gates.
# ----------------------------------------------------------------------------
def _lstm_kernel(x_ref, wih_ref, whh_ref, b_ref, h0_ref, c0_ref,
                 y_ref, hT_ref, cT_ref,
                 gxi_sc, gxf_sc, gxg_sc, gxo_sc, h_sc, c_sc):
    # x_ref:   (Tc, Bt, I)  bf16   time-major input chunk
    # wih_ref: (I, 4H)      bf16   pre-transposed W_ih (gate order i,f,g,o)
    # whh_ref: (4, H, H)    bf16   per-gate pre-transposed W_hh
    # b_ref:   (1, 4H)      f32    b_ih + b_hh
    # h0/c0:   (Bt, H)      f32
    # y_ref:   (Tc, Bt, H)  bf16
    # hT/cT:   (Bt, H)      f32
    t_idx = pl.program_id(1)
    nt = pl.num_programs(1)
    Tc = x_ref.shape[0]
    H = h0_ref.shape[-1]

    @pl.when(t_idx == 0)
    def _():
        h_sc[...] = h0_ref[...]
        c_sc[...] = c0_ref[...]

    # ---- hoisted input projection (independent of the h recurrence) ---------
    wih = wih_ref[...]
    b = b_ref[...]
    for s in range(Tc):  # static unroll; all MXU work here is off the critical path
        xg = jnp.dot(x_ref[s], wih, preferred_element_type=jnp.float32) + b   # (Bt, 4H)
        gxi_sc[s] = xg[:, 0:H]
        gxf_sc[s] = xg[:, H:2 * H]
        gxg_sc[s] = xg[:, 2 * H:3 * H]
        gxo_sc[s] = xg[:, 3 * H:4 * H]

    # per-gate recurrent weights: no lane-axis gate slicing inside the loop
    whh_i = whh_ref[0]
    whh_f = whh_ref[1]
    whh_g = whh_ref[2]
    whh_o = whh_ref[3]

    def step(s, carry):
        h, c = carry
        hb = h.astype(jnp.bfloat16)
        i_g = jax.nn.sigmoid(gxi_sc[s] + jnp.dot(hb, whh_i, preferred_element_type=jnp.float32))
        f_g = jax.nn.sigmoid(gxf_sc[s] + jnp.dot(hb, whh_f, preferred_element_type=jnp.float32))
        g_g = jnp.tanh(gxg_sc[s] + jnp.dot(hb, whh_g, preferred_element_type=jnp.float32))
        o_g = jax.nn.sigmoid(gxo_sc[s] + jnp.dot(hb, whh_o, preferred_element_type=jnp.float32))
        c_new = f_g * c + i_g * g_g
        h_new = o_g * jnp.tanh(c_new)
        y_ref[s] = h_new.astype(jnp.bfloat16)
        return (h_new, c_new)

    h, c = lax.fori_loop(0, Tc, step, (h_sc[...], c_sc[...]), unroll=True)
    h_sc[...] = h
    c_sc[...] = c

    @pl.when(t_idx == nt - 1)
    def _():
        hT_ref[...] = h
        cT_ref[...] = c


def lstm_layer_tm(x_tm, wih_t, whh_s, bias, h0, c0, *, max_t_chunk=16):
    """Time-major LSTM layer.

    x_tm: (T, B, I) bf16.  Returns (y (T,B,H) bf16, hT (B,H) f32, cT (B,H) f32).
    """
    T, B, I = x_tm.shape
    H = h0.shape[-1]
    Tc = _largest_divisor_leq(T, max_t_chunk)
    Bt = 8 if B % 8 == 0 else B           # >1 B-tiles (megacore) only when legal
    nb, nt = B // Bt, T // Tc

    in_specs = [
        pl.BlockSpec((Tc, Bt, I), lambda b, t: (t, b, 0)),
        pl.BlockSpec((I, 4 * H), lambda b, t: (0, 0)),
        pl.BlockSpec((4, H, H), lambda b, t: (0, 0, 0)),
        pl.BlockSpec((1, 4 * H), lambda b, t: (0, 0)),
        pl.BlockSpec((Bt, H), lambda b, t: (b, 0)),
        pl.BlockSpec((Bt, H), lambda b, t: (b, 0)),
    ]
    out_specs = (
        pl.BlockSpec((Tc, Bt, H), lambda b, t: (t, b, 0)),
        pl.BlockSpec((Bt, H), lambda b, t: (b, 0)),
        pl.BlockSpec((Bt, H), lambda b, t: (b, 0)),
    )
    out_shape = (
        jax.ShapeDtypeStruct((T, B, H), jnp.bfloat16),
        jax.ShapeDtypeStruct((B, H), jnp.float32),
        jax.ShapeDtypeStruct((B, H), jnp.float32),
    )
    scratch = [pltpu.VMEM((Tc, Bt, H), jnp.float32) for _ in range(4)]
    scratch += [pltpu.VMEM((Bt, H), jnp.float32), pltpu.VMEM((Bt, H), jnp.float32)]

    return pl.pallas_call(
        _lstm_kernel,
        grid=(nb, nt),
        in_specs=in_specs,
        out_specs=out_specs,
        out_shape=out_shape,
        scratch_shapes=scratch,
        compiler_params=pltpu.CompilerParams(
            dimension_semantics=("parallel", "arbitrary"),
            vmem_limit_bytes=64 * 1024 * 1024),
    )(x_tm, wih_t, whh_s, bias, h0, c0)


# ----------------------------------------------------------------------------
# Attention + fused (concat|stop) projection kernel, gridded over Td tiles.
# ----------------------------------------------------------------------------
def _attn_proj_kernel(dec_ref, mem_ref, wd_ref, wc_ref, b_ref,
                      out_ref, att_ref, ctx_ref):
    # dec_ref: (B, Tt, H) bf16; mem_ref: (B, Te, H) bf16
    # wd/wc:   (H, P) bf16 (concat weight split into decoder-half / context-half,
    #           stop head fused as an extra column, padded to lane-dense P)
    # b_ref:   (1, P) f32
    B = dec_ref.shape[0]
    wd = wd_ref[...]
    wc = wc_ref[...]
    b = b_ref[...]
    for bi in range(B):                     # static unroll: no per-batch grid overhead
        dec = dec_ref[bi]                   # (Tt, H)
        mem = mem_ref[bi]                   # (Te, H)
        # Luong dot-product scores via NT dot_general (no explicit memory transpose)
        scores = lax.dot_general(dec, mem,
                                 dimension_numbers=(((1,), (1,)), ((), ())),
                                 preferred_element_type=jnp.float32)   # (Tt, Te)
        scores = scores - jnp.max(scores, axis=-1, keepdims=True)
        e = jnp.exp(scores)
        # exact reciprocal: keeps attention rows summing to 1 within f32 precision
        att = e * pl.reciprocal(jnp.sum(e, axis=-1, keepdims=True))
        ctx = jnp.dot(att.astype(jnp.bfloat16), mem,
                      preferred_element_type=jnp.float32)              # (Tt, H)
        # Fused concat+stop projection without an in-kernel concatenate:
        #   [dec | ctx] @ [[Wd],[Wc]] + b
        proj = (jnp.dot(dec, wd, preferred_element_type=jnp.float32)
                + jnp.dot(ctx.astype(jnp.bfloat16), wc, preferred_element_type=jnp.float32)
                + b)                                                   # (Tt, P)
        out_ref[bi] = proj
        att_ref[bi] = att
        ctx_ref[bi] = ctx


def attend_and_project(dec, memory, w_dec, w_ctx, bias):
    """dec: (B,Td,H) bf16, memory: (B,Te,H) bf16.  Returns (proj, att, ctx) in f32."""
    B, Td, H = dec.shape
    Te = memory.shape[1]
    P = w_dec.shape[1]
    Tt = _pick_td_tile(Td)

    in_specs = [
        pl.BlockSpec((B, Tt, H), lambda i: (0, i, 0)),
        pl.BlockSpec((B, Te, H), lambda i: (0, 0, 0)),
        pl.BlockSpec((H, P), lambda i: (0, 0)),
        pl.BlockSpec((H, P), lambda i: (0, 0)),
        pl.BlockSpec((1, P), lambda i: (0, 0)),
    ]
    out_specs = (
        pl.BlockSpec((B, Tt, P), lambda i: (0, i, 0)),
        pl.BlockSpec((B, Tt, Te), lambda i: (0, i, 0)),
        pl.BlockSpec((B, Tt, H), lambda i: (0, i, 0)),
    )
    out_shape = (
        jax.ShapeDtypeStruct((B, Td, P), jnp.float32),
        jax.ShapeDtypeStruct((B, Td, Te), jnp.float32),
        jax.ShapeDtypeStruct((B, Td, H), jnp.float32),
    )
    return pl.pallas_call(
        _attn_proj_kernel,
        grid=(Td // Tt,),
        in_specs=in_specs,
        out_specs=out_specs,
        out_shape=out_shape,
        compiler_params=pltpu.CompilerParams(
            dimension_semantics=("parallel",),
            vmem_limit_bytes=64 * 1024 * 1024),
    )(dec, memory, w_dec, w_ctx, bias)


# ----------------------------------------------------------------------------
# LuongDecoder wrapper (weights pre-transposed / pre-split ONCE in __init__)
# ----------------------------------------------------------------------------
class LuongDecoderPallas:
    def __init__(self, insize, hidden_size, out_size, drop, key):
        self.hidden_size = hidden_size
        self.out_size = out_size
        self.drop = tuple(drop)  # dropout probs: eval-mode identity (see TODO)
        H = hidden_size
        keys = jax.random.split(key, 4 * len(drop) + 4)

        def unif(k, shape, fan_in):
            s = 1.0 / jnp.sqrt(jnp.float32(fan_in))
            return jax.random.uniform(k, shape, jnp.float32, -s, s)

        self.lstm_params = []
        ki = 0
        layer_in = insize
        for _ in drop:
            w_ih = unif(keys[ki], (4 * H, layer_in), H); ki += 1
            w_hh = unif(keys[ki], (4 * H, H), H); ki += 1
            b_ih = unif(keys[ki], (4 * H,), H); ki += 1
            b_hh = unif(keys[ki], (4 * H,), H); ki += 1
            # pre-transposed combined input weight (gate order i,f,g,o along columns)
            wih_t = jnp.transpose(w_ih).astype(jnp.bfloat16)                       # (in, 4H)
            # per-gate pre-transposed recurrent weights
            whh_s = jnp.transpose(w_hh.reshape(4, H, H), (0, 2, 1)).astype(jnp.bfloat16)  # (4,H,H)
            bias = (b_ih + b_hh).reshape(1, 4 * H)                                 # f32
            self.lstm_params.append((wih_t, whh_s, bias))
            layer_in = H

        w_concat = unif(keys[ki], (out_size, 2 * H), 2 * H); ki += 1
        b_concat = unif(keys[ki], (out_size,), 2 * H); ki += 1
        w_stop = unif(keys[ki], (1, 2 * H), 2 * H); ki += 1
        b_stop = unif(keys[ki], (1,), 2 * H); ki += 1

        # Fuse concat + stop heads into one projection, padded to a lane-dense width.
        n_out = out_size + 1
        P = ((n_out + 127) // 128) * 128
        w_full = jnp.concatenate([jnp.transpose(w_concat), jnp.transpose(w_stop)],
                                 axis=1)                                           # (2H, out+1)
        w_full = jnp.pad(w_full, ((0, 0), (0, P - n_out)))
        self.w_dec = w_full[:H].astype(jnp.bfloat16)   # multiplies decoder states
        self.w_ctx = w_full[H:].astype(jnp.bfloat16)   # multiplies context
        self.b_full = jnp.pad(jnp.concatenate([b_concat, b_stop]),
                              (0, P - n_out)).reshape(1, P)                        # f32

        self.memory = None
        self.memory_bf16 = None
        self.hidden = None

    def init(self, memory):
        self.memory = memory
        self.memory_bf16 = memory.astype(jnp.bfloat16)
        last = memory[:, -1, :]                        # (B, H)
        # PyTorch stores (1, B, H); keep the same leading num-layers=1 axis.
        self.hidden = (last[None], last[None])

    def forward(self, x):
        h = self.hidden[0][0]                          # (B, H) f32
        c = self.hidden[1][0]
        # one time-major transpose in, one transpose out for the whole LSTM stack
        x_tm = jnp.transpose(x, (1, 0, 2)).astype(jnp.bfloat16)   # (T, B, in)
        for (wih_t, whh_s, bias) in self.lstm_params:
            x_tm, h, c = lstm_layer_tm(x_tm, wih_t, whh_s, bias, h, c)
            # TODO(synk): nn.Dropout treated as eval-mode identity.
        self.hidden = (h[None], c[None])
        dec = jnp.transpose(x_tm, (1, 0, 2))                       # (B, Td, H) bf16
        out_full, att_weights, context = attend_and_project(
            dec, self.memory_bf16, self.w_dec, self.w_ctx, self.b_full)
        output = out_full[..., :self.out_size]
        stop = out_full[..., self.out_size:self.out_size + 1]
        return output, stop, att_weights, context


# ----------------------------------------------------------------------------
if __name__ == "__main__":
    B, T_dec, T_enc = 2, 8, 8
    insize, hidden, out_size = 32, 32, 32
    drop = (0.1, 0.1)  # two LSTM layers; dropout identity in eval mode

    key = jax.random.PRNGKey(0)
    k_param, k_mem, k_in = jax.random.split(key, 3)

    model = LuongDecoderPallas(insize, hidden, out_size, drop, k_param)
    memory = jax.random.normal(k_mem, (B, T_enc, hidden), jnp.float32)
    dec_in = jax.random.normal(k_in, (B, T_dec, insize), jnp.float32)

    model.init(memory)
    output, stop, att_weights, context = model.forward(dec_in)
    jax.block_until_ready((output, stop, att_weights, context))

    assert output.shape == (B, T_dec, out_size)
    assert stop.shape == (B, T_dec, 1)
    assert att_weights.shape == (B, T_dec, T_enc)
    assert context.shape == (B, T_dec, hidden)
    assert bool(jnp.all(jnp.isfinite(output)))
    # attention rows sum to 1
    assert bool(jnp.allclose(jnp.sum(att_weights, axis=-1), 1.0, atol=1e-5))

    print("KERNEL_OK")
</pallas_src>

<mosaic_0001>
module attributes {stable_mosaic.version = 11 : i64} {
  func.func @_lstm_kernel(%arg0: i32, %arg1: i32, %arg2: memref<8x2x32xbf16, #tpu.memory_space<vmem>>, %arg3: memref<32x128xbf16, #tpu.memory_space<vmem>>, %arg4: memref<4x32x32xbf16, #tpu.memory_space<vmem>>, %arg5: memref<1x128xf32, #tpu.memory_space<vmem>>, %arg6: memref<2x32xf32, #tpu.memory_space<vmem>>, %arg7: memref<2x32xf32, #tpu.memory_space<vmem>>, %arg8: memref<8x2x32xbf16, #tpu.memory_space<vmem>>, %arg9: memref<2x32xf32, #tpu.memory_space<vmem>>, %arg10: memref<2x32xf32, #tpu.memory_space<vmem>>, %arg11: memref<8x2x32xf32, #tpu.memory_space<vmem>>, %arg12: memref<8x2x32xf32, #tpu.memory_space<vmem>>, %arg13: memref<8x2x32xf32, #tpu.memory_space<vmem>>, %arg14: memref<8x2x32xf32, #tpu.memory_space<vmem>>, %arg15: memref<2x32xf32, #tpu.memory_space<vmem>>, %arg16: memref<2x32xf32, #tpu.memory_space<vmem>>) attributes {dimension_semantics = [#tpu.dimension_semantics<parallel>, #tpu.dimension_semantics<arbitrary>], iteration_bounds = array<i64: 1, 1>, scalar_prefetch = 0 : i64, scratch_operands = 6 : i64, tpu.core_type = #tpu.core_type<tc>, window_params = [{transform_indices = @transform_0, window_bounds = array<i64: 8, 2, 32>}, {pipeline_mode = #tpu.pipeline_mode<synchronous>, transform_indices = @transform_1, window_bounds = array<i64: 32, 128>}, {pipeline_mode = #tpu.pipeline_mode<synchronous>, transform_indices = @transform_2, window_bounds = array<i64: 4, 32, 32>}, {pipeline_mode = #tpu.pipeline_mode<synchronous>, transform_indices = @transform_3, window_bounds = array<i64: 1, 128>}, {transform_indices = @transform_4, window_bounds = array<i64: 2, 32>}, {transform_indices = @transform_5, window_bounds = array<i64: 2, 32>}, {transform_indices = @transform_6, window_bounds = array<i64: 8, 2, 32>}, {transform_indices = @transform_7, window_bounds = array<i64: 2, 32>}, {transform_indices = @transform_8, window_bounds = array<i64: 2, 32>}]} {
    %c0_i32 = arith.constant 0 : i32
    %0 = arith.cmpi eq, %arg1, %c0_i32 : i32
    %1 = arith.extui %0 : i1 to i32
    %c0_i32_0 = arith.constant 0 : i32
    %2 = arith.cmpi ne, %1, %c0_i32_0 : i32
    scf.if %2 {
      %c0_283 = arith.constant 0 : index
      %c0_284 = arith.constant 0 : index
      %564 = vector.load %arg6[%c0_283, %c0_284] : memref<2x32xf32, #tpu.memory_space<vmem>>, vector<2x32xf32>
      %c0_285 = arith.constant 0 : index
      %c0_286 = arith.constant 0 : index
      %565 = vector.load %arg15[%c0_285, %c0_286] : memref<2x32xf32, #tpu.memory_space<vmem>>, vector<2x32xf32>
      tpu.vector_store %arg15[%c0_285, %c0_286], %564 {strides = array<i32>} : memref<2x32xf32, #tpu.memory_space<vmem>>, vector<2x32xf32>,
      %c0_287 = arith.constant 0 : index
      %c0_288 = arith.constant 0 : index
      %566 = vector.load %arg7[%c0_287, %c0_288] : memref<2x32xf32, #tpu.memory_space<vmem>>, vector<2x32xf32>
      %c0_289 = arith.constant 0 : index
      %c0_290 = arith.constant 0 : index
      %567 = vector.load %arg16[%c0_289, %c0_290] : memref<2x32xf32, #tpu.memory_space<vmem>>, vector<2x32xf32>
      tpu.vector_store %arg16[%c0_289, %c0_290], %566 {strides = array<i32>} : memref<2x32xf32, #tpu.memory_space<vmem>>, vector<2x32xf32>,
    } else {
    }
    %c0 = arith.constant 0 : index
    %c0_1 = arith.constant 0 : index
    %3 = vector.load %arg3[%c0, %c0_1] : memref<32x128xbf16, #tpu.memory_space<vmem>>, vector<32x128xbf16>
    %c0_2 = arith.constant 0 : index
    %c0_3 = arith.constant 0 : index
    %4 = vector.load %arg5[%c0_2, %c0_3] : memref<1x128xf32, #tpu.memory_space<vmem>>, vector<1x128xf32>
    %c0_4 = arith.constant 0 : index
    %c0_5 = arith.constant 0 : index
    %c0_6 = arith.constant 0 : index
    %5 = vector.load %arg2[%c0_4, %c0_5, %c0_6] : memref<8x2x32xbf16, #tpu.memory_space<vmem>>, vector<1x2x32xbf16>
    %6 = vector.shape_cast %5 : vector<1x2x32xbf16> to vector<2x32xbf16>
    %cst = arith.constant dense<0.000000e+00> : vector<2x128xf32>
    %7 = tpu.matmul %6, %3, %cst {dimension_numbers = #tpu.dot_dimension_numbers<[1], [0], [0], [1], [0, 0, 1, 1], [], []>} : vector<2x32xbf16>, vector<32x128xbf16>, vector<2x128xf32> -> vector<2x128xf32>
    %8 = vector.broadcast %4 : vector<1x128xf32> to vector<2x128xf32>
    %9 = arith.addf %7, %8 : vector<2x128xf32>
    %10 = vector.extract_strided_slice %9 {offsets = [0, 0], sizes = [2, 32], strides = [1, 1]} : vector<2x128xf32> to vector<2x32xf32>
    %c0_7 = arith.constant 0 : index
    %c0_8 = arith.constant 0 : index
    %c0_9 = arith.constant 0 : index
    %11 = vector.load %arg11[%c0_7, %c0_8, %c0_9] : memref<8x2x32xf32, #tpu.memory_space<vmem>>, vector<1x2x32xf32>
    %12 = vector.shape_cast %11 : vector<1x2x32xf32> to vector<2x32xf32>
    %13 = vector.shape_cast %10 : vector<2x32xf32> to vector<1x2x32xf32>
    tpu.vector_store %arg11[%c0_7, %c0_8, %c0_9], %13 {strides = array<i32>} : memref<8x2x32xf32, #tpu.memory_space<vmem>>, vector<1x2x32xf32>,
    %14 = vector.extract_strided_slice %9 {offsets = [0, 32], sizes = [2, 32], strides = [1, 1]} : vector<2x128xf32> to vector<2x32xf32>
    %c0_10 = arith.constant 0 : index
    %c0_11 = arith.constant 0 : index
    %c0_12 = arith.constant 0 : index
    %15 = vector.load %arg12[%c0_10, %c0_11, %c0_12] : memref<8x2x32xf32, #tpu.memory_space<vmem>>, vector<1x2x32xf32>
    %16 = vector.shape_cast %15 : vector<1x2x32xf32> to vector<2x32xf32>
    %17 = vector.shape_cast %14 : vector<2x32xf32> to vector<1x2x32xf32>
    tpu.vector_store %arg12[%c0_10, %c0_11, %c0_12], %17 {strides = array<i32>} : memref<8x2x32xf32, #tpu.memory_space<vmem>>, vector<1x2x32xf32>,
    %18 = vector.extract_strided_slice %9 {offsets = [0, 64], sizes = [2, 32], strides = [1, 1]} : vector<2x128xf32> to vector<2x32xf32>
    %c0_13 = arith.constant 0 : index
    %c0_14 = arith.constant 0 : index
    %c0_15 = arith.constant 0 : index
    %19 = vector.load %arg13[%c0_13, %c0_14, %c0_15] : memref<8x2x32xf32, #tpu.memory_space<vmem>>, vector<1x2x32xf32>
    %20 = vector.shape_cast %19 : vector<1x2x32xf32> to vector<2x32xf32>
    %21 = vector.shape_cast %18 : vector<2x32xf32> to vector<1x2x32xf32>
    tpu.vector_store %arg13[%c0_13, %c0_14, %c0_15], %21 {strides = array<i32>} : memref<8x2x32xf32, #tpu.memory_space<vmem>>, vector<1x2x32xf32>,
    %22 = vector.extract_strided_slice %9 {offsets = [0, 96], sizes = [2, 32], strides = [1, 1]} : vector<2x128xf32> to vector<2x32xf32>
    %c0_16 = arith.constant 0 : index
    %c0_17 = arith.constant 0 : index
    %c0_18 = arith.constant 0 : index
    %23 = vector.load %arg14[%c0_16, %c0_17, %c0_18] : memref<8x2x32xf32, #tpu.memory_space<vmem>>, vector<1x2x32xf32>
    %24 = vector.shape_cast %23 : vector<1x2x32xf32> to vector<2x32xf32>
    %25 = vector.shape_cast %22 : vector<2x32xf32> to vector<1x2x32xf32>
    tpu.vector_store %arg14[%c0_16, %c0_17, %c0_18], %25 {strides = array<i32>} : memref<8x2x32xf32, #tpu.memory_space<vmem>>, vector<1x2x32xf32>,
    %c1 = arith.constant 1 : index
    %c0_19 = arith.constant 0 : index
    %c0_20 = arith.constant 0 : index
    %26 = vector.load %arg2[%c1, %c0_19, %c0_20] : memref<8x2x32xbf16, #tpu.memory_space<vmem>>, vector<1x2x32xbf16>
    %27 = vector.shape_cast %26 : vector<1x2x32xbf16> to vector<2x32xbf16>
    %cst_21 = arith.constant dense<0.000000e+00> : vector<2x128xf32>
    %28 = tpu.matmul %27, %3, %cst_21 {dimension_numbers = #tpu.dot_dimension_numbers<[1], [0], [0], [1], [0, 0, 1, 1], [], []>} : vector<2x32xbf16>, vector<32x128xbf16>, vector<2x128xf32> -> vector<2x128xf32>
    %29 = vector.broadcast %4 : vector<1x128xf32> to vector<2x128xf32>
    %30 = arith.addf %28, %29 : vector<2x128xf32>
    %31 = vector.extract_strided_slice %30 {offsets = [0, 0], sizes = [2, 32], strides = [1, 1]} : vector<2x128xf32> to vector<2x32xf32>
    %c1_22 = arith.constant 1 : index
    %c0_23 = arith.constant 0 : index
    %c0_24 = arith.constant 0 : index
    %32 = vector.load %arg11[%c1_22, %c0_23, %c0_24] : memref<8x2x32xf32, #tpu.memory_space<vmem>>, vector<1x2x32xf32>
    %33 = vector.shape_cast %32 : vector<1x2x32xf32> to vector<2x32xf32>
    %34 = vector.shape_cast %31 : vector<2x32xf32> to vector<1x2x32xf32>
    tpu.vector_store %arg11[%c1_22, %c0_23, %c0_24], %34 {strides = array<i32>} : memref<8x2x32xf32, #tpu.memory_space<vmem>>, vector<1x2x32xf32>,
    %35 = vector.extract_strided_slice %30 {offsets = [0, 32], sizes = [2, 32], strides = [1, 1]} : vector<2x128xf32> to vector<2x32xf32>
    %c1_25 = arith.constant 1 : index
    %c0_26 = arith.constant 0 : index
    %c0_27 = arith.constant 0 : index
    %36 = vector.load %arg12[%c1_25, %c0_26, %c0_27] : memref<8x2x32xf32, #tpu.memory_space<vmem>>, vector<1x2x32xf32>
    %37 = vector.shape_cast %36 : vector<1x2x32xf32> to vector<2x32xf32>
    %38 = vector.shape_cast %35 : vector<2x32xf32> to vector<1x2x32xf32>
    tpu.vector_store %arg12[%c1_25, %c0_26, %c0_27], %38 {strides = array<i32>} : memref<8x2x32xf32, #tpu.memory_space<vmem>>, vector<1x2x32xf32>,
    %39 = vector.extract_strided_slice %30 {offsets = [0, 64], sizes = [2, 32], strides = [1, 1]} : vector<2x128xf32> to vector<2x32xf32>
    %c1_28 = arith.constant 1 : index
    %c0_29 = arith.constant 0 : index
    %c0_30 = arith.constant 0 : index
    %40 = vector.load %arg13[%c1_28, %c0_29, %c0_30] : memref<8x2x32xf32, #tpu.memory_space<vmem>>, vector<1x2x32xf32>
    %41 = vector.shape_cast %40 : vector<1x2x32xf32> to vector<2x32xf32>
    %42 = vector.shape_cast %39 : vector<2x32xf32> to vector<1x2x32xf32>
    tpu.vector_store %arg13[%c1_28, %c0_29, %c0_30], %42 {strides = array<i32>} : memref<8x2x32xf32, #tpu.memory_space<vmem>>, vector<1x2x32xf32>,
    %43 = vector.extract_strided_slice %30 {offsets = [0, 96], sizes = [2, 32], strides = [1, 1]} : vector<2x128xf32> to vector<2x32xf32>
    %c1_31 = arith.constant 1 : index
    %c0_32 = arith.constant 0 : index
    %c0_33 = arith.constant 0 : index
    %44 = vector.load %arg14[%c1_31, %c0_32, %c0_33] : memref<8x2x32xf32, #tpu.memory_space<vmem>>, vector<1x2x32xf32>
    %45 = vector.shape_cast %44 : vector<1x2x32xf32> to vector<2x32xf32>
    %46 = vector.shape_cast %43 : vector<2x32xf32> to vector<1x2x32xf32>
    tpu.vector_store %arg14[%c1_31, %c0_32, %c0_33], %46 {strides = array<i32>} : memref<8x2x32xf32, #tpu.memory_space<vmem>>, vector<1x2x32xf32>,
    %c2 = arith.constant 2 : index
    %c0_34 = arith.constant 0 : index
    %c0_35 = arith.constant 0 : index
    %47 = vector.load %arg2[%c2, %c0_34, %c0_35] : memref<8x2x32xbf16, #tpu.memory_space<vmem>>, vector<1x2x32xbf16>
    %48 = vector.shape_cast %47 : vector<1x2x32xbf16> to vector<2x32xbf16>
    %cst_36 = arith.constant dense<0.000000e+00> : vector<2x128xf32>
    %49 = tpu.matmul %48, %3, %cst_36 {dimension_numbers = #tpu.dot_dimension_numbers<[1], [0], [0], [1], [0, 0, 1, 1], [], []>} : vector<2x32xbf16>, vector<32x128xbf16>, vector<2x128xf32> -> vector<2x128xf32>
    %50 = vector.broadcast %4 : vector<1x128xf32> to vector<2x128xf32>
    %51 = arith.addf %49, %50 : vector<2x128xf32>
    %52 = vector.extract_strided_slice %51 {offsets = [0, 0], sizes = [2, 32], strides = [1, 1]} : vector<2x128xf32> to vector<2x32xf32>
    %c2_37 = arith.constant 2 : index
    %c0_38 = arith.constant 0 : index
    %c0_39 = arith.constant 0 : index
    %53 = vector.load %arg11[%c2_37, %c0_38, %c0_39] : memref<8x2x32xf32, #tpu.memory_space<vmem>>, vector<1x2x32xf32>
    %54 = vector.shape_cast %53 : vector<1x2x32xf32> to vector<2x32xf32>
    %55 = vector.shape_cast %52 : vector<2x32xf32> to vector<1x2x32xf32>
    tpu.vector_store %arg11[%c2_37, %c0_38, %c0_39], %55 {strides = array<i32>} : memref<8x2x32xf32, #tpu.memory_space<vmem>>, vector<1x2x32xf32>,
    %56 = vector.extract_strided_slice %51 {offsets = [0, 32], sizes = [2, 32], strides = [1, 1]} : vector<2x128xf32> to vector<2x32xf32>
    %c2_40 = arith.constant 2 : index
    %c0_41 = arith.constant 0 : index
    %c0_42 = arith.constant 0 : index
    %57 = vector.load %arg12[%c2_40, %c0_41, %c0_42] : memref<8x2x32xf32, #tpu.memory_space<vmem>>, vector<1x2x32xf32>
    %58 = vector.shape_cast %57 : vector<1x2x32xf32> to vector<2x32xf32>
    %59 = vector.shape_cast %56 : vector<2x32xf32> to vector<1x2x32xf32>
    tpu.vector_store %arg12[%c2_40, %c0_41, %c0_42], %59 {strides = array<i32>} : memref<8x2x32xf32, #tpu.memory_space<vmem>>, vector<1x2x32xf32>,
    %60 = vector.extract_strided_slice %51 {offsets = [0, 64], sizes = [2, 32], strides = [1, 1]} : vector<2x128xf32> to vector<2x32xf32>
    %c2_43 = arith.constant 2 : index
    %c0_44 = arith.constant 0 : index
    %c0_45 = arith.constant 0 : index
    %61 = vector.load %arg13[%c2_43, %c0_44, %c0_45] : memref<8x2x32xf32, #tpu.memory_space<vmem>>, vector<1x2x32xf32>
    %62 = vector.shape_cast %61 : vector<1x2x32xf32> to vector<2x32xf32>
    %63 = vector.shape_cast %60 : vector<2x32xf32> to vector<1x2x32xf32>
    tpu.vector_store %arg13[%c2_43, %c0_44, %c0_45], %63 {strides = array<i32>} : memref<8x2x32xf32, #tpu.memory_space<vmem>>, vector<1x2x32xf32>,
    %64 = vector.extract_strided_slice %51 {offsets = [0, 96], sizes = [2, 32], strides = [1, 1]} : vector<2x128xf32> to vector<2x32xf32>
    %c2_46 = arith.constant 2 : index
    %c0_47 = arith.constant 0 : index
    %c0_48 = arith.constant 0 : index
    %65 = vector.load %arg14[%c2_46, %c0_47, %c0_48] : memref<8x2x32xf32, #tpu.memory_space<vmem>>, vector<1x2x32xf32>
    %66 = vector.shape_cast %65 : vector<1x2x32xf32> to vector<2x32xf32>
    %67 = vector.shape_cast %64 : vector<2x32xf32> to vector<1x2x32xf32>
    tpu.vector_store %arg14[%c2_46, %c0_47, %c0_48], %67 {strides = array<i32>} : memref<8x2x32xf32, #tpu.memory_space<vmem>>, vector<1x2x32xf32>,
    %c3 = arith.constant 3 : index
    %c0_49 = arith.constant 0 : index
    %c0_50 = arith.constant 0 : index
    %68 = vector.load %arg2[%c3, %c0_49, %c0_50] : memref<8x2x32xbf16, #tpu.memory_space<vmem>>, vector<1x2x32xbf16>
    %69 = vector.shape_cast %68 : vector<1x2x32xbf16> to vector<2x32xbf16>
    %cst_51 = arith.constant dense<0.000000e+00> : vector<2x128xf32>
    %70 = tpu.matmul %69, %3, %cst_51 {dimension_numbers = #tpu.dot_dimension_numbers<[1], [0], [0], [1], [0, 0, 1, 1], [], []>} : vector<2x32xbf16>, vector<32x128xbf16>, vector<2x128xf32> -> vector<2x128xf32>
    %71 = vector.broadcast %4 : vector<1x128xf32> to vector<2x128xf32>
    %72 = arith.addf %70, %71 : vector<2x128xf32>
    %73 = vector.extract_strided_slice %72 {offsets = [0, 0], sizes = [2, 32], strides = [1, 1]} : vector<2x128xf32> to vector<2x32xf32>
    %c3_52 = arith.constant 3 : index
    %c0_53 = arith.constant 0 : index
    %c0_54 = arith.constant 0 : index
    %74 = vector.load %arg11[%c3_52, %c0_53, %c0_54] : memref<8x2x32xf32, #tpu.memory_space<vmem>>, vector<1x2x32xf32>
    %75 = vector.shape_cast %74 : vector<1x2x32xf32> to vector<2x32xf32>
    %76 = vector.shape_cast %73 : vector<2x32xf32> to vector<1x2x32xf32>
    tpu.vector_store %arg11[%c3_52, %c0_53, %c0_54], %76 {strides = array<i32>} : memref<8x2x32xf32, #tpu.memory_space<vmem>>, vector<1x2x32xf32>,
    %77 = vector.extract_strided_slice %72 {offsets = [0, 32], sizes = [2, 32], strides = [1, 1]} : vector<2x128xf32> to vector<2x32xf32>
    %c3_55 = arith.constant 3 : index
    %c0_56 = arith.constant 0 : index
    %c0_57 = arith.constant 0 : index
    %78 = vector.load %arg12[%c3_55, %c0_56, %c0_57] : memref<8x2x32xf32, #tpu.memory_space<vmem>>, vector<1x2x32xf32>
    %79 = vector.shape_cast %78 : vector<1x2x32xf32> to vector<2x32xf32>
    %80 = vector.shape_cast %77 : vector<2x32xf32> to vector<1x2x32xf32>
    tpu.vector_store %arg12[%c3_55, %c0_56, %c0_57], %80 {strides = array<i32>} : memref<8x2x32xf32, #tpu.memory_space<vmem>>, vector<1x2x32xf32>,
    %81 = vector.extract_strided_slice %72 {offsets = [0, 64], sizes = [2, 32], strides = [1, 1]} : vector<2x128xf32> to vector<2x32xf32>
    %c3_58 = arith.constant 3 : index
    %c0_59 = arith.constant 0 : index
    %c0_60 = arith.constant 0 : index
    %82 = vector.load %arg13[%c3_58, %c0_59, %c0_60] : memref<8x2x32xf32, #tpu.memory_space<vmem>>, vector<1x2x32xf32>
    %83 = vector.shape_cast %82 : vector<1x2x32xf32> to vector<2x32xf32>
    %84 = vector.shape_cast %81 : vector<2x32xf32> to vector<1x2x32xf32>
    tpu.vector_store %arg13[%c3_58, %c0_59, %c0_60], %84 {strides = array<i32>} : memref<8x2x32xf32, #tpu.memory_space<vmem>>, vector<1x2x32xf32>,
    %85 = vector.extract_strided_slice %72 {offsets = [0, 96], sizes = [2, 32], strides = [1, 1]} : vector<2x128xf32> to vector<2x32xf32>
    %c3_61 = arith.constant 3 : index
    %c0_62 = arith.constant 0 : index
    %c0_63 = arith.constant 0 : index
    %86 = vector.load %arg14[%c3_61, %c0_62, %c0_63] : memref<8x2x32xf32, #tpu.memory_space<vmem>>, vector<1x2x32xf32>
    %87 = vector.shape_cast %86 : vector<1x2x32xf32> to vector<2x32xf32>
    %88 = vector.shape_cast %85 : vector<2x32xf32> to vector<1x2x32xf32>
    tpu.vector_store %arg14[%c3_61, %c0_62, %c0_63], %88 {strides = array<i32>} : memref<8x2x32xf32, #tpu.memory_space<vmem>>, vector<1x2x32xf32>,
    %c4 = arith.constant 4 : index
    %c0_64 = arith.constant 0 : index
    %c0_65 = arith.constant 0 : index
    %89 = vector.load %arg2[%c4, %c0_64, %c0_65] : memref<8x2x32xbf16, #tpu.memory_space<vmem>>, vector<1x2x32xbf16>
    %90 = vector.shape_cast %89 : vector<1x2x32xbf16> to vector<2x32xbf16>
    %cst_66 = arith.constant dense<0.000000e+00> : vector<2x128xf32>
    %91 = tpu.matmul %90, %3, %cst_66 {dimension_numbers = #tpu.dot_dimension_numbers<[1], [0], [0], [1], [0, 0, 1, 1], [], []>} : vector<2x32xbf16>, vector<32x128xbf16>, vector<2x128xf32> -> vector<2x128xf32>
    %92 = vector.broadcast %4 : vector<1x128xf32> to vector<2x128xf32>
    %93 = arith.addf %91, %92 : vector<2x128xf32>
    %94 = vector.extract_strided_slice %93 {offsets = [0, 0], sizes = [2, 32], strides = [1, 1]} : vector<2x128xf32> to vector<2x32xf32>
    %c4_67 = arith.constant 4 : index
    %c0_68 = arith.constant 0 : index
    %c0_69 = arith.constant 0 : index
    %95 = vector.load %arg11[%c4_67, %c0_68, %c0_69] : memref<8x2x32xf32, #tpu.memory_space<vmem>>, vector<1x2x32xf32>
    %96 = vector.shape_cast %95 : vector<1x2x32xf32> to vector<2x32xf32>
    %97 = vector.shape_cast %94 : vector<2x32xf32> to vector<1x2x32xf32>
    tpu.vector_store %arg11[%c4_67, %c0_68, %c0_69], %97 {strides = array<i32>} : memref<8x2x32xf32, #tpu.memory_space<vmem>>, vector<1x2x32xf32>,
    %98 = vector.extract_strided_slice %93 {offsets = [0, 32], sizes = [2, 32], strides = [1, 1]} : vector<2x128xf32> to vector<2x32xf32>
    %c4_70 = arith.constant 4 : index
    %c0_71 = arith.constant 0 : index
    %c0_72 = arith.constant 0 : index
    %99 = vector.load %arg12[%c4_70, %c0_71, %c0_72] : memref<8x2x32xf32, #tpu.memory_space<vmem>>, vector<1x2x32xf32>
    %100 = vector.shape_cast %99 : vector<1x2x32xf32> to vector<2x32xf32>
    %101 = vector.shape_cast %98 : vector<2x32xf32> to vector<1x2x32xf32>
    tpu.vector_store %arg12[%c4_70, %c0_71, %c0_72], %101 {strides = array<i32>} : memref<8x2x32xf32, #tpu.memory_space<vmem>>, vector<1x2x32xf32>,
    %102 = vector.extract_strided_slice %93 {offsets = [0, 64], sizes = [2, 32], strides = [1, 1]} : vector<2x128xf32> to vector<2x32xf32>
    %c4_73 = arith.constant 4 : index
    %c0_74 = arith.constant 0 : index
    %c0_75 = arith.constant 0 : index
    %103 = vector.load %arg13[%c4_73, %c0_74, %c0_75] : memref<8x2x32xf32, #tpu.memory_space<vmem>>, vector<1x2x32xf32>
    %104 = vector.shape_cast %103 : vector<1x2x32xf32> to vector<2x32xf32>
    %105 = vector.shape_cast %102 : vector<2x32xf32> to vector<1x2x32xf32>
    tpu.vector_store %arg13[%c4_73, %c0_74, %c0_75], %105 {strides = array<i32>} : memref<8x2x32xf32, #tpu.memory_space<vmem>>, vector<1x2x32xf32>,
    %106 = vector.extract_strided_slice %93 {offsets = [0, 96], sizes = [2, 32], strides = [1, 1]} : vector<2x128xf32> to vector<2x32xf32>
    %c4_76 = arith.constant 4 : index
    %c0_77 = arith.constant 0 : index
    %c0_78 = arith.constant 0 : index
    %107 = vector.load %arg14[%c4_76, %c0_77, %c0_78] : memref<8x2x32xf32, #tpu.memory_space<vmem>>, vector<1x2x32xf32>
    %108 = vector.shape_cast %107 : vector<1x2x32xf32> to vector<2x32xf32>
    %109 = vector.shape_cast %106 : vector<2x32xf32> to vector<1x2x32xf32>
    tpu.vector_store %arg14[%c4_76, %c0_77, %c0_78], %109 {strides = array<i32>} : memref<8x2x32xf32, #tpu.memory_space<vmem>>, vector<1x2x32xf32>,
    %c5 = arith.constant 5 : index
    %c0_79 = arith.constant 0 : index
    %c0_80 = arith.constant 0 : index
    %110 = vector.load %arg2[%c5, %c0_79, %c0_80] : memref<8x2x32xbf16, #tpu.memory_space<vmem>>, vector<1x2x32xbf16>
    %111 = vector.shape_cast %110 : vector<1x2x32xbf16> to vector<2x32xbf16>
    %cst_81 = arith.constant dense<0.000000e+00> : vector<2x128xf32>
    %112 = tpu.matmul %111, %3, %cst_81 {dimension_numbers = #tpu.dot_dimension_numbers<[1], [0], [0], [1], [0, 0, 1, 1], [], []>} : vector<2x32xbf16>, vector<32x128xbf16>, vector<2x128xf32> -> vector<2x128xf32>
    %113 = vector.broadcast %4 : vector<1x128xf32> to vector<2x128xf32>
    %114 = arith.addf %112, %113 : vector<2x128xf32>
    %115 = vector.extract_strided_slice %114 {offsets = [0, 0], sizes = [2, 32], strides = [1, 1]} : vector<2x128xf32> to vector<2x32xf32>
    %c5_82 = arith.constant 5 : index
    %c0_83 = arith.constant 0 : index
    %c0_84 = arith.constant 0 : index
    %116 = vector.load %arg11[%c5_82, %c0_83, %c0_84] : memref<8x2x32xf32, #tpu.memory_space<vmem>>, vector<1x2x32xf32>
    %117 = vector.shape_cast %116 : vector<1x2x32xf32> to vector<2x32xf32>
    %118 = vector.shape_cast %115 : vector<2x32xf32> to vector<1x2x32xf32>
    tpu.vector_store %arg11[%c5_82, %c0_83, %c0_84], %118 {strides = array<i32>} : memref<8x2x32xf32, #tpu.memory_space<vmem>>, vector<1x2x32xf32>,
    %119 = vector.extract_strided_slice %114 {offsets = [0, 32], sizes = [2, 32], strides = [1, 1]} : vector<2x128xf32> to vector<2x32xf32>
    %c5_85 = arith.constant 5 : index
    %c0_86 = arith.constant 0 : index
    %c0_87 = arith.constant 0 : index
    %120 = vector.load %arg12[%c5_85, %c0_86, %c0_87] : memref<8x2x32xf32, #tpu.memory_space<vmem>>, vector<1x2x32xf32>
    %121 = vector.shape_cast %120 : vector<1x2x32xf32> to vector<2x32xf32>
    %122 = vector.shape_cast %119 : vector<2x32xf32> to vector<1x2x32xf32>
    tpu.vector_store %arg12[%c5_85, %c0_86, %c0_87], %122 {strides = array<i32>} : memref<8x2x32xf32, #tpu.memory_space<vmem>>, vector<1x2x32xf32>,
    %123 = vector.extract_strided_slice %114 {offsets = [0, 64], sizes = [2, 32], strides = [1, 1]} : vector<2x128xf32> to vector<2x32xf32>
    %c5_88 = arith.constant 5 : index
    %c0_89 = arith.constant 0 : index
    %c0_90 = arith.constant 0 : index
    %124 = vector.load %arg13[%c5_88, %c0_89, %c0_90] : memref<8x2x32xf32, #tpu.memory_space<vmem>>, vector<1x2x32xf32>
    %125 = vector.shape_cast %124 : vector<1x2x32xf32> to vector<2x32xf32>
    %126 = vector.shape_cast %123 : vector<2x32xf32> to vector<1x2x32xf32>
    tpu.vector_store %arg13[%c5_88, %c0_89, %c0_90], %126 {strides = array<i32>} : memref<8x2x32xf32, #tpu.memory_space<vmem>>, vector<1x2x32xf32>,
    %127 = vector.extract_strided_slice %114 {offsets = [0, 96], sizes = [2, 32], strides = [1, 1]} : vector<2x128xf32> to vector<2x32xf32>
    %c5_91 = arith.constant 5 : index
    %c0_92 = arith.constant 0 : index
    %c0_93 = arith.constant 0 : index
    %128 = vector.load %arg14[%c5_91, %c0_92, %c0_93] : memref<8x2x32xf32, #tpu.memory_space<vmem>>, vector<1x2x32xf32>
    %129 = vector.shape_cast %128 : vector<1x2x32xf32> to vector<2x32xf32>
    %130 = vector.shape_cast %127 : vector<2x32xf32> to vector<1x2x32xf32>
    tpu.vector_store %arg14[%c5_91, %c0_92, %c0_93], %130 {strides = array<i32>} : memref<8x2x32xf32, #tpu.memory_space<vmem>>, vector<1x2x32xf32>,
    %c6 = arith.constant 6 : index
    %c0_94 = arith.constant 0 : index
    %c0_95 = arith.constant 0 : index
    %131 = vector.load %arg2[%c6, %c0_94, %c0_95] : memref<8x2x32xbf16, #tpu.memory_space<vmem>>, vector<1x2x32xbf16>
    %132 = vector.shape_cast %131 : vector<1x2x32xbf16> to vector<2x32xbf16>
    %cst_96 = arith.constant dense<0.000000e+00> : vector<2x128xf32>
    %133 = tpu.matmul %132, %3, %cst_96 {dimension_numbers = #tpu.dot_dimension_numbers<[1], [0], [0], [1], [0, 0, 1, 1], [], []>} : vector<2x32xbf16>, vector<32x128xbf16>, vector<2x128xf32> -> vector<2x128xf32>
    %134 = vector.broadcast %4 : vector<1x128xf32> to vector<2x128xf32>
    %135 = arith.addf %133, %134 : vector<2x128xf32>
    %136 = vector.extract_strided_slice %135 {offsets = [0, 0], sizes = [2, 32], strides = [1, 1]} : vector<2x128xf32> to vector<2x32xf32>
    %c6_97 = arith.constant 6 : index
    %c0_98 = arith.constant 0 : index
    %c0_99 = arith.constant 0 : index
    %137 = vector.load %arg11[%c6_97, %c0_98, %c0_99] : memref<8x2x32xf32, #tpu.memory_space<vmem>>, vector<1x2x32xf32>
    %138 = vector.shape_cast %137 : vector<1x2x32xf32> to vector<2x32xf32>
    %139 = vector.shape_cast %136 : vector<2x32xf32> to vector<1x2x32xf32>
    tpu.vector_store %arg11[%c6_97, %c0_98, %c0_99], %139 {strides = array<i32>} : memref<8x2x32xf32, #tpu.memory_space<vmem>>, vector<1x2x32xf32>,
    %140 = vector.extract_strided_slice %135 {offsets = [0, 32], sizes = [2, 32], strides = [1, 1]} : vector<2x128xf32> to vector<2x32xf32>
    %c6_100 = arith.constant 6 : index
    %c0_101 = arith.constant 0 : index
    %c0_102 = arith.constant 0 : index
    %141 = vector.load %arg12[%c6_100, %c0_101, %c0_102] : memref<8x2x32xf32, #tpu.memory_space<vmem>>, vector<1x2x32xf32>
    %142 = vector.shape_cast %141 : vector<1x2x32xf32> to vector<2x32xf32>
    %143 = vector.shape_cast %140 : vector<2x32xf32> to vector<1x2x32xf32>
    tpu.vector_store %arg12[%c6_100, %c0_101, %c0_102], %143 {strides = array<i32>} : memref<8x2x32xf32, #tpu.memory_space<vmem>>, vector<1x2x32xf32>,
    %144 = vector.extract_strided_slice %135 {offsets = [0, 64], sizes = [2, 32], strides = [1, 1]} : vector<2x128xf32> to vector<2x32xf32>
    %c6_103 = arith.constant 6 : index
    %c0_104 = arith.constant 0 : index
    %c0_105 = arith.constant 0 : index
    %145 = vector.load %arg13[%c6_103, %c0_104, %c0_105] : memref<8x2x32xf32, #tpu.memory_space<vmem>>, vector<1x2x32xf32>
    %146 = vector.shape_cast %145 : vector<1x2x32xf32> to vector<2x32xf32>
    %147 = vector.shape_cast %144 : vector<2x32xf32> to vector<1x2x32xf32>
    tpu.vector_store %arg13[%c6_103, %c0_104, %c0_105], %147 {strides = array<i32>} : memref<8x2x32xf32, #tpu.memory_space<vmem>>, vector<1x2x32xf32>,
    %148 = vector.extract_strided_slice %135 {offsets = [0, 96], sizes = [2, 32], strides = [1, 1]} : vector<2x128xf32> to vector<2x32xf32>
    %c6_106 = arith.constant 6 : index
    %c0_107 = arith.constant 0 : index
    %c0_108 = arith.constant 0 : index
    %149 = vector.load %arg14[%c6_106, %c0_107, %c0_108] : memref<8x2x32xf32, #tpu.memory_space<vmem>>, vector<1x2x32xf32>
    %150 = vector.shape_cast %149 : vector<1x2x32xf32> to vector<2x32xf32>
    %151 = vector.shape_cast %148 : vector<2x32xf32> to vector<1x2x32xf32>
    tpu.vector_store %arg14[%c6_106, %c0_107, %c0_108], %151 {strides = array<i32>} : memref<8x2x32xf32, #tpu.memory_space<vmem>>, vector<1x2x32xf32>,
    %c7 = arith.constant 7 : index
    %c0_109 = arith.constant 0 : index
    %c0_110 = arith.constant 0 : index
    %152 = vector.load %arg2[%c7, %c0_109, %c0_110] : memref<8x2x32xbf16, #tpu.memory_space<vmem>>, vector<1x2x32xbf16>
    %153 = vector.shape_cast %152 : vector<1x2x32xbf16> to vector<2x32xbf16>
    %cst_111 = arith.constant dense<0.000000e+00> : vector<2x128xf32>
    %154 = tpu.matmul %153, %3, %cst_111 {dimension_numbers = #tpu.dot_dimension_numbers<[1], [0], [0], [1], [0, 0, 1, 1], [], []>} : vector<2x32xbf16>, vector<32x128xbf16>, vector<2x128xf32> -> vector<2x128xf32>
    %155 = vector.broadcast %4 : vector<1x128xf32> to vector<2x128xf32>
    %156 = arith.addf %154, %155 : vector<2x128xf32>
    %157 = vector.extract_strided_slice %156 {offsets = [0, 0], sizes = [2, 32], strides = [1, 1]} : vector<2x128xf32> to vector<2x32xf32>
    %c7_112 = arith.constant 7 : index
    %c0_113 = arith.constant 0 : index
    %c0_114 = arith.constant 0 : index
    %158 = vector.load %arg11[%c7_112, %c0_113, %c0_114] : memref<8x2x32xf32, #tpu.memory_space<vmem>>, vector<1x2x32xf32>
    %159 = vector.shape_cast %158 : vector<1x2x32xf32> to vector<2x32xf32>
    %160 = vector.shape_cast %157 : vector<2x32xf32> to vector<1x2x32xf32>
    tpu.vector_store %arg11[%c7_112, %c0_113, %c0_114], %160 {strides = array<i32>} : memref<8x2x32xf32, #tpu.memory_space<vmem>>, vector<1x2x32xf32>,
    %161 = vector.extract_strided_slice %156 {offsets = [0, 32], sizes = [2, 32], strides = [1, 1]} : vector<2x128xf32> to vector<2x32xf32>
    %c7_115 = arith.constant 7 : index
    %c0_116 = arith.constant 0 : index
    %c0_117 = arith.constant 0 : index
    %162 = vector.load %arg12[%c7_115, %c0_116, %c0_117] : memref<8x2x32xf32, #tpu.memory_space<vmem>>, vector<1x2x32xf32>
    %163 = vector.shape_cast %162 : vector<1x2x32xf32> to vector<2x32xf32>
    %164 = vector.shape_cast %161 : vector<2x32xf32> to vector<1x2x32xf32>
    tpu.vector_store %arg12[%c7_115, %c0_116, %c0_117], %164 {strides = array<i32>} : memref<8x2x32xf32, #tpu.memory_space<vmem>>, vector<1x2x32xf32>,
    %165 = vector.extract_strided_slice %156 {offsets = [0, 64], sizes = [2, 32], strides = [1, 1]} : vector<2x128xf32> to vector<2x32xf32>
    %c7_118 = arith.constant 7 : index
    %c0_119 = arith.constant 0 : index
    %c0_120 = arith.constant 0 : index
    %166 = vector.load %arg13[%c7_118, %c0_119, %c0_120] : memref<8x2x32xf32, #tpu.memory_space<vmem>>, vector<1x2x32xf32>
    %167 = vector.shape_cast %166 : vector<1x2x32xf32> to vector<2x32xf32>
    %168 = vector.shape_cast %165 : vector<2x32xf32> to vector<1x2x32xf32>
    tpu.vector_store %arg13[%c7_118, %c0_119, %c0_120], %168 {strides = array<i32>} : memref<8x2x32xf32, #tpu.memory_space<vmem>>, vector<1x2x32xf32>,
    %169 = vector.extract_strided_slice %156 {offsets = [0, 96], sizes = [2, 32], strides = [1, 1]} : vector<2x128xf32> to vector<2x32xf32>
    %c7_121 = arith.constant 7 : index
    %c0_122 = arith.constant 0 : index
    %c0_123 = arith.constant 0 : index
    %170 = vector.load %arg14[%c7_121, %c0_122, %c0_123] : memref<8x2x32xf32, #tpu.memory_space<vmem>>, vector<1x2x32xf32>
    %171 = vector.shape_cast %170 : vector<1x2x32xf32> to vector<2x32xf32>
    %172 = vector.shape_cast %169 : vector<2x32xf32> to vector<1x2x32xf32>
    tpu.vector_store %arg14[%c7_121, %c0_122, %c0_123], %172 {strides = array<i32>} : memref<8x2x32xf32, #tpu.memory_space<vmem>>, vector<1x2x32xf32>,
    %c0_124 = arith.constant 0 : index
    %c0_125 = arith.constant 0 : index
    %c0_126 = arith.constant 0 : index
    %173 = vector.load %arg4[%c0_124, %c0_125, %c0_126] : memref<4x32x32xbf16, #tpu.memory_space<vmem>>, vector<1x32x32xbf16>
    %174 = vector.shape_cast %173 : vector<1x32x32xbf16> to vector<32x32xbf16>
    %c1_127 = arith.constant 1 : index
    %c0_128 = arith.constant 0 : index
    %c0_129 = arith.constant 0 : index
    %175 = vector.load %arg4[%c1_127, %c0_128, %c0_129] : memref<4x32x32xbf16, #tpu.memory_space<vmem>>, vector<1x32x32xbf16>
    %176 = vector.shape_cast %175 : vector<1x32x32xbf16> to vector<32x32xbf16>
    %c2_130 = arith.constant 2 : index
    %c0_131 = arith.constant 0 : index
    %c0_132 = arith.constant 0 : index
    %177 = vector.load %arg4[%c2_130, %c0_131, %c0_132] : memref<4x32x32xbf16, #tpu.memory_space<vmem>>, vector<1x32x32xbf16>
    %178 = vector.shape_cast %177 : vector<1x32x32xbf16> to vector<32x32xbf16>
    %c3_133 = arith.constant 3 : index
    %c0_134 = arith.constant 0 : index
    %c0_135 = arith.constant 0 : index
    %179 = vector.load %arg4[%c3_133, %c0_134, %c0_135] : memref<4x32x32xbf16, #tpu.memory_space<vmem>>, vector<1x32x32xbf16>
    %180 = vector.shape_cast %179 : vector<1x32x32xbf16> to vector<32x32xbf16>
    %c0_136 = arith.constant 0 : index
    %c0_137 = arith.constant 0 : index
    %181 = vector.load %arg15[%c0_136, %c0_137] : memref<2x32xf32, #tpu.memory_space<vmem>>, vector<2x32xf32>
    %c0_138 = arith.constant 0 : index
    %c0_139 = arith.constant 0 : index
    %182 = vector.load %arg16[%c0_138, %c0_139] : memref<2x32xf32, #tpu.memory_space<vmem>>, vector<2x32xf32>
    %c0_i32_140 = arith.constant 0 : i32
    %183 = arith.truncf %181 : vector<2x32xf32> to vector<2x32xbf16>
    %184 = arith.index_cast %c0_i32_140 : i32 to index
    %c0_141 = arith.constant 0 : index
    %c0_142 = arith.constant 0 : index
    %185 = vector.load %arg11[%184, %c0_141, %c0_142] : memref<8x2x32xf32, #tpu.memory_space<vmem>>, vector<1x2x32xf32>
    %186 = vector.shape_cast %185 : vector<1x2x32xf32> to vector<2x32xf32>
    %cst_143 = arith.constant dense<0.000000e+00> : vector<2x32xf32>
    %187 = tpu.matmul %183, %174, %cst_143 {dimension_numbers = #tpu.dot_dimension_numbers<[1], [0], [0], [1], [0, 0, 1, 1], [], []>} : vector<2x32xbf16>, vector<32x32xbf16>, vector<2x32xf32> -> vector<2x32xf32>
    %188 = arith.addf %186, %187 : vector<2x32xf32>
    %189 = arith.negf %188 : vector<2x32xf32>
    %190 = math.exp %189 : vector<2x32xf32>
    %cst_144 = arith.constant 1.000000e+00 : f32
    %191 = vector.broadcast %cst_144 : f32 to vector<2x32xf32>
    %192 = arith.addf %191, %190 : vector<2x32xf32>
    %193 = arith.divf %191, %192 : vector<2x32xf32>
    %194 = arith.index_cast %c0_i32_140 : i32 to index
    %c0_145 = arith.constant 0 : index
    %c0_146 = arith.constant 0 : index
    %195 = vector.load %arg12[%194, %c0_145, %c0_146] : memref<8x2x32xf32, #tpu.memory_space<vmem>>, vector<1x2x32xf32>
    %196 = vector.shape_cast %195 : vector<1x2x32xf32> to vector<2x32xf32>
    %cst_147 = arith.constant dense<0.000000e+00> : vector<2x32xf32>
    %197 = tpu.matmul %183, %176, %cst_147 {dimension_numbers = #tpu.dot_dimension_numbers<[1], [0], [0], [1], [0, 0, 1, 1], [], []>} : vector<2x32xbf16>, vector<32x32xbf16>, vector<2x32xf32> -> vector<2x32xf32>
    %198 = arith.addf %196, %197 : vector<2x32xf32>
    %199 = arith.negf %198 : vector<2x32xf32>
    %200 = math.exp %199 : vector<2x32xf32>
    %cst_148 = arith.constant 1.000000e+00 : f32
    %201 = vector.broadcast %cst_148 : f32 to vector<2x32xf32>
    %202 = arith.addf %201, %200 : vector<2x32xf32>
    %203 = arith.divf %201, %202 : vector<2x32xf32>
    %204 = arith.index_cast %c0_i32_140 : i32 to index
    %c0_149 = arith.constant 0 : index
    %c0_150 = arith.constant 0 : index
    %205 = vector.load %arg13[%204, %c0_149, %c0_150] : memref<8x2x32xf32, #tpu.memory_space<vmem>>, vector<1x2x32xf32>
    %206 = vector.shape_cast %205 : vector<1x2x32xf32> to vector<2x32xf32>
    %cst_151 = arith.constant dense<0.000000e+00> : vector<2x32xf32>
    %207 = tpu.matmul %183, %178, %cst_151 {dimension_numbers = #tpu.dot_dimension_numbers<[1], [0], [0], [1], [0, 0, 1, 1], [], []>} : vector<2x32xbf16>, vector<32x32xbf16>, vector<2x32xf32> -> vector<2x32xf32>
    %208 = arith.addf %206, %207 : vector<2x32xf32>
    %209 = math.tanh %208 : vector<2x32xf32>
    %210 = arith.index_cast %c0_i32_140 : i32 to index
    %c0_152 = arith.constant 0 : index
    %c0_153 = arith.constant 0 : index
    %211 = vector.load %arg14[%210, %c0_152, %c0_153] : memref<8x2x32xf32, #tpu.memory_space<vmem>>, vector<1x2x32xf32>
    %212 = vector.shape_cast %211 : vector<1x2x32xf32> to vector<2x32xf32>
    %cst_154 = arith.constant dense<0.000000e+00> : vector<2x32xf32>
    %213 = tpu.matmul %183, %180, %cst_154 {dimension_numbers = #tpu.dot_dimension_numbers<[1], [0], [0], [1], [0, 0, 1, 1], [], []>} : vector<2x32xbf16>, vector<32x32xbf16>, vector<2x32xf32> -> vector<2x32xf32>
    %214 = arith.addf %212, %213 : vector<2x32xf32>
    %215 = arith.negf %214 : vector<2x32xf32>
    %216 = math.exp %215 : vector<2x32xf32>
    %cst_155 = arith.constant 1.000000e+00 : f32
    %217 = vector.broadcast %cst_155 : f32 to vector<2x32xf32>
    %218 = arith.addf %217, %216 : vector<2x32xf32>
    %219 = arith.divf %217, %218 : vector<2x32xf32>
    %220 = arith.mulf %203, %182 : vector<2x32xf32>
    %221 = arith.mulf %193, %209 : vector<2x32xf32>
    %222 = arith.addf %220, %221 : vector<2x32xf32>
    %223 = math.tanh %222 : vector<2x32xf32>
    %224 = arith.mulf %219, %223 : vector<2x32xf32>
    %225 = arith.truncf %224 : vector<2x32xf32> to vector<2x32xbf16>
    %226 = arith.index_cast %c0_i32_140 : i32 to index
    %c0_156 = arith.constant 0 : index
    %c0_157 = arith.constant 0 : index
    %227 = vector.load %arg8[%226, %c0_156, %c0_157] : memref<8x2x32xbf16, #tpu.memory_space<vmem>>, vector<1x2x32xbf16>
    %228 = vector.shape_cast %227 : vector<1x2x32xbf16> to vector<2x32xbf16>
    %229 = vector.shape_cast %225 : vector<2x32xbf16> to vector<1x2x32xbf16>
    tpu.vector_store %arg8[%226, %c0_156, %c0_157], %229 {strides = array<i32>} : memref<8x2x32xbf16, #tpu.memory_space<vmem>>, vector<1x2x32xbf16>,
    %c1_i32 = arith.constant 1 : i32
    %230 = arith.truncf %224 : vector<2x32xf32> to vector<2x32xbf16>
    %231 = arith.index_cast %c1_i32 : i32 to index
    %c0_158 = arith.constant 0 : index
    %c0_159 = arith.constant 0 : index
    %232 = vector.load %arg11[%231, %c0_158, %c0_159] : memref<8x2x32xf32, #tpu.memory_space<vmem>>, vector<1x2x32xf32>
    %233 = vector.shape_cast %232 : vector<1x2x32xf32> to vector<2x32xf32>
    %cst_160 = arith.constant dense<0.000000e+00> : vector<2x32xf32>
    %234 = tpu.matmul %230, %174, %cst_160 {dimension_numbers = #tpu.dot_dimension_numbers<[1], [0], [0], [1], [0, 0, 1, 1], [], []>} : vector<2x32xbf16>, vector<32x32xbf16>, vector<2x32xf32> -> vector<2x32xf32>
    %235 = arith.addf %233, %234 : vector<2x32xf32>
    %236 = arith.negf %235 : vector<2x32xf32>
    %237 = math.exp %236 : vector<2x32xf32>
    %cst_161 = arith.constant 1.000000e+00 : f32
    %238 = vector.broadcast %cst_161 : f32 to vector<2x32xf32>
    %239 = arith.addf %238, %237 : vector<2x32xf32>
    %240 = arith.divf %238, %239 : vector<2x32xf32>
    %241 = arith.index_cast %c1_i32 : i32 to index
    %c0_162 = arith.constant 0 : index
    %c0_163 = arith.constant 0 : index
    %242 = vector.load %arg12[%241, %c0_162, %c0_163] : memref<8x2x32xf32, #tpu.memory_space<vmem>>, vector<1x2x32xf32>
    %243 = vector.shape_cast %242 : vector<1x2x32xf32> to vector<2x32xf32>
    %cst_164 = arith.constant dense<0.000000e+00> : vector<2x32xf32>
    %244 = tpu.matmul %230, %176, %cst_164 {dimension_numbers = #tpu.dot_dimension_numbers<[1], [0], [0], [1], [0, 0, 1, 1], [], []>} : vector<2x32xbf16>, vector<32x32xbf16>, vector<2x32xf32> -> vector<2x32xf32>
    %245 = arith.addf %243, %244 : vector<2x32xf32>
    %246 = arith.negf %245 : vector<2x32xf32>
    %247 = math.exp %246 : vector<2x32xf32>
    %cst_165 = arith.constant 1.000000e+00 : f32
    %248 = vector.broadcast %cst_165 : f32 to vector<2x32xf32>
    %249 = arith.addf %248, %247 : vector<2x32xf32>
    %250 = arith.divf %248, %249 : vector<2x32xf32>
    %251 = arith.index_cast %c1_i32 : i32 to index
    %c0_166 = arith.constant 0 : index
    %c0_167 = arith.constant 0 : index
    %252 = vector.load %arg13[%251, %c0_166, %c0_167] : memref<8x2x32xf32, #tpu.memory_space<vmem>>, vector<1x2x32xf32>
    %253 = vector.shape_cast %252 : vector<1x2x32xf32> to vector<2x32xf32>
    %cst_168 = arith.constant dense<0.000000e+00> : vector<2x32xf32>
    %254 = tpu.matmul %230, %178, %cst_168 {dimension_numbers = #tpu.dot_dimension_numbers<[1], [0], [0], [1], [0, 0, 1, 1], [], []>} : vector<2x32xbf16>, vector<32x32xbf16>, vector<2x32xf32> -> vector<2x32xf32>
    %255 = arith.addf %253, %254 : vector<2x32xf32>
    %256 = math.tanh %255 : vector<2x32xf32>
    %257 = arith.index_cast %c1_i32 : i32 to index
    %c0_169 = arith.constant 0 : index
    %c0_170 = arith.constant 0 : index
    %258 = vector.load %arg14[%257, %c0_169, %c0_170] : memref<8x2x32xf32, #tpu.memory_space<vmem>>, vector<1x2x32xf32>
    %259 = vector.shape_cast %258 : vector<1x2x32xf32> to vector<2x32xf32>
    %cst_171 = arith.constant dense<0.000000e+00> : vector<2x32xf32>
    %260 = tpu.matmul %230, %180, %cst_171 {dimension_numbers = #tpu.dot_dimension_numbers<[1], [0], [0], [1], [0, 0, 1, 1], [], []>} : vector<2x32xbf16>, vector<32x32xbf16>, vector<2x32xf32> -> vector<2x32xf32>
    %261 = arith.addf %259, %260 : vector<2x32xf32>
    %262 = arith.negf %261 : vector<2x32xf32>
    %263 = math.exp %262 : vector<2x32xf32>
    %cst_172 = arith.constant 1.000000e+00 : f32
    %264 = vector.broadcast %cst_172 : f32 to vector<2x32xf32>
    %265 = arith.addf %264, %263 : vector<2x32xf32>
    %266 = arith.divf %264, %265 : vector<2x32xf32>
    %267 = arith.mulf %250, %222 : vector<2x32xf32>
    %268 = arith.mulf %240, %256 : vector<2x32xf32>
    %269 = arith.addf %267, %268 : vector<2x32xf32>
    %270 = math.tanh %269 : vector<2x32xf32>
    %271 = arith.mulf %266, %270 : vector<2x32xf32>
    %272 = arith.truncf %271 : vector<2x32xf32> to vector<2x32xbf16>
    %273 = arith.index_cast %c1_i32 : i32 to index
    %c0_173 = arith.constant 0 : index
    %c0_174 = arith.constant 0 : index
    %274 = vector.load %arg8[%273, %c0_173, %c0_174] : memref<8x2x32xbf16, #tpu.memory_space<vmem>>, vector<1x2x32xbf16>
    %275 = vector.shape_cast %274 : vector<1x2x32xbf16> to vector<2x32xbf16>
    %276 = vector.shape_cast %272 : vector<2x32xbf16> to vector<1x2x32xbf16>
    tpu.vector_store %arg8[%273, %c0_173, %c0_174], %276 {strides = array<i32>} : memref<8x2x32xbf16, #tpu.memory_space<vmem>>, vector<1x2x32xbf16>,
    %c2_i32 = arith.constant 2 : i32
    %277 = arith.truncf %271 : vector<2x32xf32> to vector<2x32xbf16>
    %278 = arith.index_cast %c2_i32 : i32 to index
    %c0_175 = arith.constant 0 : index
    %c0_176 = arith.constant 0 : index
    %279 = vector.load %arg11[%278, %c0_175, %c0_176] : memref<8x2x32xf32, #tpu.memory_space<vmem>>, vector<1x2x32xf32>
    %280 = vector.shape_cast %279 : vector<1x2x32xf32> to vector<2x32xf32>
    %cst_177 = arith.constant dense<0.000000e+00> : vector<2x32xf32>
    %281 = tpu.matmul %277, %174, %cst_177 {dimension_numbers = #tpu.dot_dimension_numbers<[1], [0], [0], [1], [0, 0, 1, 1], [], []>} : vector<2x32xbf16>, vector<32x32xbf16>, vector<2x32xf32> -> vector<2x32xf32>
    %282 = arith.addf %280, %281 : vector<2x32xf32>
    %283 = arith.negf %282 : vector<2x32xf32>
    %284 = math.exp %283 : vector<2x32xf32>
    %cst_178 = arith.constant 1.000000e+00 : f32
    %285 = vector.broadcast %cst_178 : f32 to vector<2x32xf32>
    %286 = arith.addf %285, %284 : vector<2x32xf32>
    %287 = arith.divf %285, %286 : vector<2x32xf32>
    %288 = arith.index_cast %c2_i32 : i32 to index
    %c0_179 = arith.constant 0 : index
    %c0_180 = arith.constant 0 : index
    %289 = vector.load %arg12[%288, %c0_179, %c0_180] : memref<8x2x32xf32, #tpu.memory_space<vmem>>, vector<1x2x32xf32>
    %290 = vector.shape_cast %289 : vector<1x2x32xf32> to vector<2x32xf32>
    %cst_181 = arith.constant dense<0.000000e+00> : vector<2x32xf32>
    %291 = tpu.matmul %277, %176, %cst_181 {dimension_numbers = #tpu.dot_dimension_numbers<[1], [0], [0], [1], [0, 0, 1, 1], [], []>} : vector<2x32xbf16>, vector<32x32xbf16>, vector<2x32xf32> -> vector<2x32xf32>
    %292 = arith.addf %290, %291 : vector<2x32xf32>
    %293 = arith.negf %292 : vector<2x32xf32>
    %294 = math.exp %293 : vector<2x32xf32>
    %cst_182 = arith.constant 1.000000e+00 : f32
    %295 = vector.broadcast %cst_182 : f32 to vector<2x32xf32>
    %296 = arith.addf %295, %294 : vector<2x32xf32>
    %297 = arith.divf %295, %296 : vector<2x32xf32>
    %298 = arith.index_cast %c2_i32 : i32 to index
    %c0_183 = arith.constant 0 : index
    %c0_184 = arith.constant 0 : index
    %299 = vector.load %arg13[%298, %c0_183, %c0_184] : memref<8x2x32xf32, #tpu.memory_space<vmem>>, vector<1x2x32xf32>
    %300 = vector.shape_cast %299 : vector<1x2x32xf32> to vector<2x32xf32>
    %cst_185 = arith.constant dense<0.000000e+00> : vector<2x32xf32>
    %301 = tpu.matmul %277, %178, %cst_185 {dimension_numbers = #tpu.dot_dimension_numbers<[1], [0], [0], [1], [0, 0, 1, 1], [], []>} : vector<2x32xbf16>, vector<32x32xbf16>, vector<2x32xf32> -> vector<2x32xf32>
    %302 = arith.addf %300, %301 : vector<2x32xf32>
    %303 = math.tanh %302 : vector<2x32xf32>
    %304 = arith.index_cast %c2_i32 : i32 to index
    %c0_186 = arith.constant 0 : index
    %c0_187 = arith.constant 0 : index
    %305 = vector.load %arg14[%304, %c0_186, %c0_187] : memref<8x2x32xf32, #tpu.memory_space<vmem>>, vector<1x2x32xf32>
    %306 = vector.shape_cast %305 : vector<1x2x32xf32> to vector<2x32xf32>
    %cst_188 = arith.constant dense<0.000000e+00> : vector<2x32xf32>
    %307 = tpu.matmul %277, %180, %cst_188 {dimension_numbers = #tpu.dot_dimension_numbers<[1], [0], [0], [1], [0, 0, 1, 1], [], []>} : vector<2x32xbf16>, vector<32x32xbf16>, vector<2x32xf32> -> vector<2x32xf32>
    %308 = arith.addf %306, %307 : vector<2x32xf32>
    %309 = arith.negf %308 : vector<2x32xf32>
    %310 = math.exp %309 : vector<2x32xf32>
    %cst_189 = arith.constant 1.000000e+00 : f32
    %311 = vector.broadcast %cst_189 : f32 to vector<2x32xf32>
    %312 = arith.addf %311, %310 : vector<2x32xf32>
    %313 = arith.divf %311, %312 : vector<2x32xf32>
    %314 = arith.mulf %297, %269 : vector<2x32xf32>
    %315 = arith.mulf %287, %303 : vector<2x32xf32>
    %316 = arith.addf %314, %315 : vector<2x32xf32>
    %317 = math.tanh %316 : vector<2x32xf32>
    %318 = arith.mulf %313, %317 : vector<2x32xf32>
    %319 = arith.truncf %318 : vector<2x32xf32> to vector<2x32xbf16>
    %320 = arith.index_cast %c2_i32 : i32 to index
    %c0_190 = arith.constant 0 : index
    %c0_191 = arith.constant 0 : index
    %321 = vector.load %arg8[%320, %c0_190, %c0_191] : memref<8x2x32xbf16, #tpu.memory_space<vmem>>, vector<1x2x32xbf16>
    %322 = vector.shape_cast %321 : vector<1x2x32xbf16> to vector<2x32xbf16>
    %323 = vector.shape_cast %319 : vector<2x32xbf16> to vector<1x2x32xbf16>
    tpu.vector_store %arg8[%320, %c0_190, %c0_191], %323 {strides = array<i32>} : memref<8x2x32xbf16, #tpu.memory_space<vmem>>, vector<1x2x32xbf16>,
    %c3_i32 = arith.constant 3 : i32
    %324 = arith.truncf %318 : vector<2x32xf32> to vector<2x32xbf16>
    %325 = arith.index_cast %c3_i32 : i32 to index
    %c0_192 = arith.constant 0 : index
    %c0_193 = arith.constant 0 : index
    %326 = vector.load %arg11[%325, %c0_192, %c0_193] : memref<8x2x32xf32, #tpu.memory_space<vmem>>, vector<1x2x32xf32>
    %327 = vector.shape_cast %326 : vector<1x2x32xf32> to vector<2x32xf32>
    %cst_194 = arith.constant dense<0.000000e+00> : vector<2x32xf32>
    %328 = tpu.matmul %324, %174, %cst_194 {dimension_numbers = #tpu.dot_dimension_numbers<[1], [0], [0], [1], [0, 0, 1, 1], [], []>} : vector<2x32xbf16>, vector<32x32xbf16>, vector<2x32xf32> -> vector<2x32xf32>
    %329 = arith.addf %327, %328 : vector<2x32xf32>
    %330 = arith.negf %329 : vector<2x32xf32>
    %331 = math.exp %330 : vector<2x32xf32>
    %cst_195 = arith.constant 1.000000e+00 : f32
    %332 = vector.broadcast %cst_195 : f32 to vector<2x32xf32>
    %333 = arith.addf %332, %331 : vector<2x32xf32>
    %334 = arith.divf %332, %333 : vector<2x32xf32>
    %335 = arith.index_cast %c3_i32 : i32 to index
    %c0_196 = arith.constant 0 : index
    %c0_197 = arith.constant 0 : index
    %336 = vector.load %arg12[%335, %c0_196, %c0_197] : memref<8x2x32xf32, #tpu.memory_space<vmem>>, vector<1x2x32xf32>
    %337 = vector.shape_cast %336 : vector<1x2x32xf32> to vector<2x32xf32>
    %cst_198 = arith.constant dense<0.000000e+00> : vector<2x32xf32>
    %338 = tpu.matmul %324, %176, %cst_198 {dimension_numbers = #tpu.dot_dimension_numbers<[1], [0], [0], [1], [0, 0, 1, 1], [], []>} : vector<2x32xbf16>, vector<32x32xbf16>, vector<2x32xf32> -> vector<2x32xf32>
    %339 = arith.addf %337, %338 : vector<2x32xf32>
    %340 = arith.negf %339 : vector<2x32xf32>
    %341 = math.exp %340 : vector<2x32xf32>
    %cst_199 = arith.constant 1.000000e+00 : f32
    %342 = vector.broadcast %cst_199 : f32 to vector<2x32xf32>
    %343 = arith.addf %342, %341 : vector<2x32xf32>
    %344 = arith.divf %342, %343 : vector<2x32xf32>
    %345 = arith.index_cast %c3_i32 : i32 to index
    %c0_200 = arith.constant 0 : index
    %c0_201 = arith.constant 0 : index
    %346 = vector.load %arg13[%345, %c0_200, %c0_201] : memref<8x2x32xf32, #tpu.memory_space<vmem>>, vector<1x2x32xf32>
    %347 = vector.shape_cast %346 : vector<1x2x32xf32> to vector<2x32xf32>
    %cst_202 = arith.constant dense<0.000000e+00> : vector<2x32xf32>
    %348 = tpu.matmul %324, %178, %cst_202 {dimension_numbers = #tpu.dot_dimension_numbers<[1], [0], [0], [1], [0, 0, 1, 1], [], []>} : vector<2x32xbf16>, vector<32x32xbf16>, vector<2x32xf32> -> vector<2x32xf32>
    %349 = arith.addf %347, %348 : vector<2x32xf32>
    %350 = math.tanh %349 : vector<2x32xf32>
    %351 = arith.index_cast %c3_i32 : i32 to index
    %c0_203 = arith.constant 0 : index
    %c0_204 = arith.constant 0 : index
    %352 = vector.load %arg14[%351, %c0_203, %c0_204] : memref<8x2x32xf32, #tpu.memory_space<vmem>>, vector<1x2x32xf32>
    %353 = vector.shape_cast %352 : vector<1x2x32xf32> to vector<2x32xf32>
    %cst_205 = arith.constant dense<0.000000e+00> : vector<2x32xf32>
    %354 = tpu.matmul %324, %180, %cst_205 {dimension_numbers = #tpu.dot_dimension_numbers<[1], [0], [0], [1], [0, 0, 1, 1], [], []>} : vector<2x32xbf16>, vector<32x32xbf16>, vector<2x32xf32> -> vector<2x32xf32>
    %355 = arith.addf %353, %354 : vector<2x32xf32>
    %356 = arith.negf %355 : vector<2x32xf32>
    %357 = math.exp %356 : vector<2x32xf32>
    %cst_206 = arith.constant 1.000000e+00 : f32
    %358 = vector.broadcast %cst_206 : f32 to vector<2x32xf32>
    %359 = arith.addf %358, %357 : vector<2x32xf32>
    %360 = arith.divf %358, %359 : vector<2x32xf32>
    %361 = arith.mulf %344, %316 : vector<2x32xf32>
    %362 = arith.mulf %334, %350 : vector<2x32xf32>
    %363 = arith.addf %361, %362 : vector<2x32xf32>
    %364 = math.tanh %363 : vector<2x32xf32>
    %365 = arith.mulf %360, %364 : vector<2x32xf32>
    %366 = arith.truncf %365 : vector<2x32xf32> to vector<2x32xbf16>
    %367 = arith.index_cast %c3_i32 : i32 to index
    %c0_207 = arith.constant 0 : index
    %c0_208 = arith.constant 0 : index
    %368 = vector.load %arg8[%367, %c0_207, %c0_208] : memref<8x2x32xbf16, #tpu.memory_space<vmem>>, vector<1x2x32xbf16>
    %369 = vector.shape_cast %368 : vector<1x2x32xbf16> to vector<2x32xbf16>
    %370 = vector.shape_cast %366 : vector<2x32xbf16> to vector<1x2x32xbf16>
    tpu.vector_store %arg8[%367, %c0_207, %c0_208], %370 {strides = array<i32>} : memref<8x2x32xbf16, #tpu.memory_space<vmem>>, vector<1x2x32xbf16>,
    %c4_i32 = arith.constant 4 : i32
    %371 = arith.truncf %365 : vector<2x32xf32> to vector<2x32xbf16>
    %372 = arith.index_cast %c4_i32 : i32 to index
    %c0_209 = arith.constant 0 : index
    %c0_210 = arith.constant 0 : index
    %373 = vector.load %arg11[%372, %c0_209, %c0_210] : memref<8x2x32xf32, #tpu.memory_space<vmem>>, vector<1x2x32xf32>
    %374 = vector.shape_cast %373 : vector<1x2x32xf32> to vector<2x32xf32>
    %cst_211 = arith.constant dense<0.000000e+00> : vector<2x32xf32>
    %375 = tpu.matmul %371, %174, %cst_211 {dimension_numbers = #tpu.dot_dimension_numbers<[1], [0], [0], [1], [0, 0, 1, 1], [], []>} : vector<2x32xbf16>, vector<32x32xbf16>, vector<2x32xf32> -> vector<2x32xf32>
    %376 = arith.addf %374, %375 : vector<2x32xf32>
    %377 = arith.negf %376 : vector<2x32xf32>
    %378 = math.exp %377 : vector<2x32xf32>
    %cst_212 = arith.constant 1.000000e+00 : f32
    %379 = vector.broadcast %cst_212 : f32 to vector<2x32xf32>
    %380 = arith.addf %379, %378 : vector<2x32xf32>
    %381 = arith.divf %379, %380 : vector<2x32xf32>
    %382 = arith.index_cast %c4_i32 : i32 to index
    %c0_213 = arith.constant 0 : index
    %c0_214 = arith.constant 0 : index
    %383 = vector.load %arg12[%382, %c0_213, %c0_214] : memref<8x2x32xf32, #tpu.memory_space<vmem>>, vector<1x2x32xf32>
    %384 = vector.shape_cast %383 : vector<1x2x32xf32> to vector<2x32xf32>
    %cst_215 = arith.constant dense<0.000000e+00> : vector<2x32xf32>
    %385 = tpu.matmul %371, %176, %cst_215 {dimension_numbers = #tpu.dot_dimension_numbers<[1], [0], [0], [1], [0, 0, 1, 1], [], []>} : vector<2x32xbf16>, vector<32x32xbf16>, vector<2x32xf32> -> vector<2x32xf32>
    %386 = arith.addf %384, %385 : vector<2x32xf32>
    %387 = arith.negf %386 : vector<2x32xf32>
    %388 = math.exp %387 : vector<2x32xf32>
    %cst_216 = arith.constant 1.000000e+00 : f32
    %389 = vector.broadcast %cst_216 : f32 to vector<2x32xf32>
    %390 = arith.addf %389, %388 : vector<2x32xf32>
    %391 = arith.divf %389, %390 : vector<2x32xf32>
    %392 = arith.index_cast %c4_i32 : i32 to index
    %c0_217 = arith.constant 0 : index
    %c0_218 = arith.constant 0 : index
    %393 = vector.load %arg13[%392, %c0_217, %c0_218] : memref<8x2x32xf32, #tpu.memory_space<vmem>>, vector<1x2x32xf32>
    %394 = vector.shape_cast %393 : vector<1x2x32xf32> to vector<2x32xf32>
    %cst_219 = arith.constant dense<0.000000e+00> : vector<2x32xf32>
    %395 = tpu.matmul %371, %178, %cst_219 {dimension_numbers = #tpu.dot_dimension_numbers<[1], [0], [0], [1], [0, 0, 1, 1], [], []>} : vector<2x32xbf16>, vector<32x32xbf16>, vector<2x32xf32> -> vector<2x32xf32>
    %396 = arith.addf %394, %395 : vector<2x32xf32>
    %397 = math.tanh %396 : vector<2x32xf32>
    %398 = arith.index_cast %c4_i32 : i32 to index
    %c0_220 = arith.constant 0 : index
    %c0_221 = arith.constant 0 : index
    %399 = vector.load %arg14[%398, %c0_220, %c0_221] : memref<8x2x32xf32, #tpu.memory_space<vmem>>, vector<1x2x32xf32>
    %400 = vector.shape_cast %399 : vector<1x2x32xf32> to vector<2x32xf32>
    %cst_222 = arith.constant dense<0.000000e+00> : vector<2x32xf32>
    %401 = tpu.matmul %371, %180, %cst_222 {dimension_numbers = #tpu.dot_dimension_numbers<[1], [0], [0], [1], [0, 0, 1, 1], [], []>} : vector<2x32xbf16>, vector<32x32xbf16>, vector<2x32xf32> -> vector<2x32xf32>
    %402 = arith.addf %400, %401 : vector<2x32xf32>
    %403 = arith.negf %402 : vector<2x32xf32>
    %404 = math.exp %403 : vector<2x32xf32>
    %cst_223 = arith.constant 1.000000e+00 : f32
    %405 = vector.broadcast %cst_223 : f32 to vector<2x32xf32>
    %406 = arith.addf %405, %404 : vector<2x32xf32>
    %407 = arith.divf %405, %406 : vector<2x32xf32>
    %408 = arith.mulf %391, %363 : vector<2x32xf32>
    %409 = arith.mulf %381, %397 : vector<2x32xf32>
    %410 = arith.addf %408, %409 : vector<2x32xf32>
    %411 = math.tanh %410 : vector<2x32xf32>
    %412 = arith.mulf %407, %411 : vector<2x32xf32>
    %413 = arith.truncf %412 : vector<2x32xf32> to vector<2x32xbf16>
    %414 = arith.index_cast %c4_i32 : i32 to index
    %c0_224 = arith.constant 0 : index
    %c0_225 = arith.constant 0 : index
    %415 = vector.load %arg8[%414, %c0_224, %c0_225] : memref<8x2x32xbf16, #tpu.memory_space<vmem>>, vector<1x2x32xbf16>
    %416 = vector.shape_cast %415 : vector<1x2x32xbf16> to vector<2x32xbf16>
    %417 = vector.shape_cast %413 : vector<2x32xbf16> to vector<1x2x32xbf16>
    tpu.vector_store %arg8[%414, %c0_224, %c0_225], %417 {strides = array<i32>} : memref<8x2x32xbf16, #tpu.memory_space<vmem>>, vector<1x2x32xbf16>,
    %c5_i32 = arith.constant 5 : i32
    %418 = arith.truncf %412 : vector<2x32xf32> to vector<2x32xbf16>
    %419 = arith.index_cast %c5_i32 : i32 to index
    %c0_226 = arith.constant 0 : index
    %c0_227 = arith.constant 0 : index
    %420 = vector.load %arg11[%419, %c0_226, %c0_227] : memref<8x2x32xf32, #tpu.memory_space<vmem>>, vector<1x2x32xf32>
    %421 = vector.shape_cast %420 : vector<1x2x32xf32> to vector<2x32xf32>
    %cst_228 = arith.constant dense<0.000000e+00> : vector<2x32xf32>
    %422 = tpu.matmul %418, %174, %cst_228 {dimension_numbers = #tpu.dot_dimension_numbers<[1], [0], [0], [1], [0, 0, 1, 1], [], []>} : vector<2x32xbf16>, vector<32x32xbf16>, vector<2x32xf32> -> vector<2x32xf32>
    %423 = arith.addf %421, %422 : vector<2x32xf32>
    %424 = arith.negf %423 : vector<2x32xf32>
    %425 = math.exp %424 : vector<2x32xf32>
    %cst_229 = arith.constant 1.000000e+00 : f32
    %426 = vector.broadcast %cst_229 : f32 to vector<2x32xf32>
    %427 = arith.addf %426, %425 : vector<2x32xf32>
    %428 = arith.divf %426, %427 : vector<2x32xf32>
    %429 = arith.index_cast %c5_i32 : i32 to index
    %c0_230 = arith.constant 0 : index
    %c0_231 = arith.constant 0 : index
    %430 = vector.load %arg12[%429, %c0_230, %c0_231] : memref<8x2x32xf32, #tpu.memory_space<vmem>>, vector<1x2x32xf32>
    %431 = vector.shape_cast %430 : vector<1x2x32xf32> to vector<2x32xf32>
    %cst_232 = arith.constant dense<0.000000e+00> : vector<2x32xf32>
    %432 = tpu.matmul %418, %176, %cst_232 {dimension_numbers = #tpu.dot_dimension_numbers<[1], [0], [0], [1], [0, 0, 1, 1], [], []>} : vector<2x32xbf16>, vector<32x32xbf16>, vector<2x32xf32> -> vector<2x32xf32>
    %433 = arith.addf %431, %432 : vector<2x32xf32>
    %434 = arith.negf %433 : vector<2x32xf32>
    %435 = math.exp %434 : vector<2x32xf32>
    %cst_233 = arith.constant 1.000000e+00 : f32
    %436 = vector.broadcast %cst_233 : f32 to vector<2x32xf32>
    %437 = arith.addf %436, %435 : vector<2x32xf32>
    %438 = arith.divf %436, %437 : vector<2x32xf32>
    %439 = arith.index_cast %c5_i32 : i32 to index
    %c0_234 = arith.constant 0 : index
    %c0_235 = arith.constant 0 : index
    %440 = vector.load %arg13[%439, %c0_234, %c0_235] : memref<8x2x32xf32, #tpu.memory_space<vmem>>, vector<1x2x32xf32>
    %441 = vector.shape_cast %440 : vector<1x2x32xf32> to vector<2x32xf32>
    %cst_236 = arith.constant dense<0.000000e+00> : vector<2x32xf32>
    %442 = tpu.matmul %418, %178, %cst_236 {dimension_numbers = #tpu.dot_dimension_numbers<[1], [0], [0], [1], [0, 0, 1, 1], [], []>} : vector<2x32xbf16>, vector<32x32xbf16>, vector<2x32xf32> -> vector<2x32xf32>
    %443 = arith.addf %441, %442 : vector<2x32xf32>
    %444 = math.tanh %443 : vector<2x32xf32>
    %445 = arith.index_cast %c5_i32 : i32 to index
    %c0_237 = arith.constant 0 : index
    %c0_238 = arith.constant 0 : index
    %446 = vector.load %arg14[%445, %c0_237, %c0_238] : memref<8x2x32xf32, #tpu.memory_space<vmem>>, vector<1x2x32xf32>
    %447 = vector.shape_cast %446 : vector<1x2x32xf32> to vector<2x32xf32>
    %cst_239 = arith.constant dense<0.000000e+00> : vector<2x32xf32>
    %448 = tpu.matmul %418, %180, %cst_239 {dimension_numbers = #tpu.dot_dimension_numbers<[1], [0], [0], [1], [0, 0, 1, 1], [], []>} : vector<2x32xbf16>, vector<32x32xbf16>, vector<2x32xf32> -> vector<2x32xf32>
    %449 = arith.addf %447, %448 : vector<2x32xf32>
    %450 = arith.negf %449 : vector<2x32xf32>
    %451 = math.exp %450 : vector<2x32xf32>
    %cst_240 = arith.constant 1.000000e+00 : f32
    %452 = vector.broadcast %cst_240 : f32 to vector<2x32xf32>
    %453 = arith.addf %452, %451 : vector<2x32xf32>
    %454 = arith.divf %452, %453 : vector<2x32xf32>
    %455 = arith.mulf %438, %410 : vector<2x32xf32>
    %456 = arith.mulf %428, %444 : vector<2x32xf32>
    %457 = arith.addf %455, %456 : vector<2x32xf32>
    %458 = math.tanh %457 : vector<2x32xf32>
    %459 = arith.mulf %454, %458 : vector<2x32xf32>
    %460 = arith.truncf %459 : vector<2x32xf32> to vector<2x32xbf16>
    %461 = arith.index_cast %c5_i32 : i32 to index
    %c0_241 = arith.constant 0 : index
    %c0_242 = arith.constant 0 : index
    %462 = vector.load %arg8[%461, %c0_241, %c0_242] : memref<8x2x32xbf16, #tpu.memory_space<vmem>>, vector<1x2x32xbf16>
    %463 = vector.shape_cast %462 : vector<1x2x32xbf16> to vector<2x32xbf16>
    %464 = vector.shape_cast %460 : vector<2x32xbf16> to vector<1x2x32xbf16>
    tpu.vector_store %arg8[%461, %c0_241, %c0_242], %464 {strides = array<i32>} : memref<8x2x32xbf16, #tpu.memory_space<vmem>>, vector<1x2x32xbf16>,
    %c6_i32 = arith.constant 6 : i32
    %465 = arith.truncf %459 : vector<2x32xf32> to vector<2x32xbf16>
    %466 = arith.index_cast %c6_i32 : i32 to index
    %c0_243 = arith.constant 0 : index
    %c0_244 = arith.constant 0 : index
    %467 = vector.load %arg11[%466, %c0_243, %c0_244] : memref<8x2x32xf32, #tpu.memory_space<vmem>>, vector<1x2x32xf32>
    %468 = vector.shape_cast %467 : vector<1x2x32xf32> to vector<2x32xf32>
    %cst_245 = arith.constant dense<0.000000e+00> : vector<2x32xf32>
    %469 = tpu.matmul %465, %174, %cst_245 {dimension_numbers = #tpu.dot_dimension_numbers<[1], [0], [0], [1], [0, 0, 1, 1], [], []>} : vector<2x32xbf16>, vector<32x32xbf16>, vector<2x32xf32> -> vector<2x32xf32>
    %470 = arith.addf %468, %469 : vector<2x32xf32>
    %471 = arith.negf %470 : vector<2x32xf32>
    %472 = math.exp %471 : vector<2x32xf32>
    %cst_246 = arith.constant 1.000000e+00 : f32
    %473 = vector.broadcast %cst_246 : f32 to vector<2x32xf32>
    %474 = arith.addf %473, %472 : vector<2x32xf32>
    %475 = arith.divf %473, %474 : vector<2x32xf32>
    %476 = arith.index_cast %c6_i32 : i32 to index
    %c0_247 = arith.constant 0 : index
    %c0_248 = arith.constant 0 : index
    %477 = vector.load %arg12[%476, %c0_247, %c0_248] : memref<8x2x32xf32, #tpu.memory_space<vmem>>, vector<1x2x32xf32>
    %478 = vector.shape_cast %477 : vector<1x2x32xf32> to vector<2x32xf32>
    %cst_249 = arith.constant dense<0.000000e+00> : vector<2x32xf32>
    %479 = tpu.matmul %465, %176, %cst_249 {dimension_numbers = #tpu.dot_dimension_numbers<[1], [0], [0], [1], [0, 0, 1, 1], [], []>} : vector<2x32xbf16>, vector<32x32xbf16>, vector<2x32xf32> -> vector<2x32xf32>
    %480 = arith.addf %478, %479 : vector<2x32xf32>
    %481 = arith.negf %480 : vector<2x32xf32>
    %482 = math.exp %481 : vector<2x32xf32>
    %cst_250 = arith.constant 1.000000e+00 : f32
    %483 = vector.broadcast %cst_250 : f32 to vector<2x32xf32>
    %484 = arith.addf %483, %482 : vector<2x32xf32>
    %485 = arith.divf %483, %484 : vector<2x32xf32>
    %486 = arith.index_cast %c6_i32 : i32 to index
    %c0_251 = arith.constant 0 : index
    %c0_252 = arith.constant 0 : index
    %487 = vector.load %arg13[%486, %c0_251, %c0_252] : memref<8x2x32xf32, #tpu.memory_space<vmem>>, vector<1x2x32xf32>
    %488 = vector.shape_cast %487 : vector<1x2x32xf32> to vector<2x32xf32>
    %cst_253 = arith.constant dense<0.000000e+00> : vector<2x32xf32>
    %489 = tpu.matmul %465, %178, %cst_253 {dimension_numbers = #tpu.dot_dimension_numbers<[1], [0], [0], [1], [0, 0, 1, 1], [], []>} : vector<2x32xbf16>, vector<32x32xbf16>, vector<2x32xf32> -> vector<2x32xf32>
    %490 = arith.addf %488, %489 : vector<2x32xf32>
    %491 = math.tanh %490 : vector<2x32xf32>
    %492 = arith.index_cast %c6_i32 : i32 to index
    %c0_254 = arith.constant 0 : index
    %c0_255 = arith.constant 0 : index
    %493 = vector.load %arg14[%492, %c0_254, %c0_255] : memref<8x2x32xf32, #tpu.memory_space<vmem>>, vector<1x2x32xf32>
    %494 = vector.shape_cast %493 : vector<1x2x32xf32> to vector<2x32xf32>
    %cst_256 = arith.constant dense<0.000000e+00> : vector<2x32xf32>
    %495 = tpu.matmul %465, %180, %cst_256 {dimension_numbers = #tpu.dot_dimension_numbers<[1], [0], [0], [1], [0, 0, 1, 1], [], []>} : vector<2x32xbf16>, vector<32x32xbf16>, vector<2x32xf32> -> vector<2x32xf32>
    %496 = arith.addf %494, %495 : vector<2x32xf32>
    %497 = arith.negf %496 : vector<2x32xf32>
    %498 = math.exp %497 : vector<2x32xf32>
    %cst_257 = arith.constant 1.000000e+00 : f32
    %499 = vector.broadcast %cst_257 : f32 to vector<2x32xf32>
    %500 = arith.addf %499, %498 : vector<2x32xf32>
    %501 = arith.divf %499, %500 : vector<2x32xf32>
    %502 = arith.mulf %485, %457 : vector<2x32xf32>
    %503 = arith.mulf %475, %491 : vector<2x32xf32>
    %504 = arith.addf %502, %503 : vector<2x32xf32>
    %505 = math.tanh %504 : vector<2x32xf32>
    %506 = arith.mulf %501, %505 : vector<2x32xf32>
    %507 = arith.truncf %506 : vector<2x32xf32> to vector<2x32xbf16>
    %508 = arith.index_cast %c6_i32 : i32 to index
    %c0_258 = arith.constant 0 : index
    %c0_259 = arith.constant 0 : index
    %509 = vector.load %arg8[%508, %c0_258, %c0_259] : memref<8x2x32xbf16, #tpu.memory_space<vmem>>, vector<1x2x32xbf16>
    %510 = vector.shape_cast %509 : vector<1x2x32xbf16> to vector<2x32xbf16>
    %511 = vector.shape_cast %507 : vector<2x32xbf16> to vector<1x2x32xbf16>
    tpu.vector_store %arg8[%508, %c0_258, %c0_259], %511 {strides = array<i32>} : memref<8x2x32xbf16, #tpu.memory_space<vmem>>, vector<1x2x32xbf16>,
    %c7_i32 = arith.constant 7 : i32
    %512 = arith.truncf %506 : vector<2x32xf32> to vector<2x32xbf16>
    %513 = arith.index_cast %c7_i32 : i32 to index
    %c0_260 = arith.constant 0 : index
    %c0_261 = arith.constant 0 : index
    %514 = vector.load %arg11[%513, %c0_260, %c0_261] : memref<8x2x32xf32, #tpu.memory_space<vmem>>, vector<1x2x32xf32>
    %515 = vector.shape_cast %514 : vector<1x2x32xf32> to vector<2x32xf32>
    %cst_262 = arith.constant dense<0.000000e+00> : vector<2x32xf32>
    %516 = tpu.matmul %512, %174, %cst_262 {dimension_numbers = #tpu.dot_dimension_numbers<[1], [0], [0], [1], [0, 0, 1, 1], [], []>} : vector<2x32xbf16>, vector<32x32xbf16>, vector<2x32xf32> -> vector<2x32xf32>
    %517 = arith.addf %515, %516 : vector<2x32xf32>
    %518 = arith.negf %517 : vector<2x32xf32>
    %519 = math.exp %518 : vector<2x32xf32>
    %cst_263 = arith.constant 1.000000e+00 : f32
    %520 = vector.broadcast %cst_263 : f32 to vector<2x32xf32>
    %521 = arith.addf %520, %519 : vector<2x32xf32>
    %522 = arith.divf %520, %521 : vector<2x32xf32>
    %523 = arith.index_cast %c7_i32 : i32 to index
    %c0_264 = arith.constant 0 : index
    %c0_265 = arith.constant 0 : index
    %524 = vector.load %arg12[%523, %c0_264, %c0_265] : memref<8x2x32xf32, #tpu.memory_space<vmem>>, vector<1x2x32xf32>
    %525 = vector.shape_cast %524 : vector<1x2x32xf32> to vector<2x32xf32>
    %cst_266 = arith.constant dense<0.000000e+00> : vector<2x32xf32>
    %526 = tpu.matmul %512, %176, %cst_266 {dimension_numbers = #tpu.dot_dimension_numbers<[1], [0], [0], [1], [0, 0, 1, 1], [], []>} : vector<2x32xbf16>, vector<32x32xbf16>, vector<2x32xf32> -> vector<2x32xf32>
    %527 = arith.addf %525, %526 : vector<2x32xf32>
    %528 = arith.negf %527 : vector<2x32xf32>
    %529 = math.exp %528 : vector<2x32xf32>
    %cst_267 = arith.constant 1.000000e+00 : f32
    %530 = vector.broadcast %cst_267 : f32 to vector<2x32xf32>
    %531 = arith.addf %530, %529 : vector<2x32xf32>
    %532 = arith.divf %530, %531 : vector<2x32xf32>
    %533 = arith.index_cast %c7_i32 : i32 to index
    %c0_268 = arith.constant 0 : index
    %c0_269 = arith.constant 0 : index
    %534 = vector.load %arg13[%533, %c0_268, %c0_269] : memref<8x2x32xf32, #tpu.memory_space<vmem>>, vector<1x2x32xf32>
    %535 = vector.shape_cast %534 : vector<1x2x32xf32> to vector<2x32xf32>
    %cst_270 = arith.constant dense<0.000000e+00> : vector<2x32xf32>
    %536 = tpu.matmul %512, %178, %cst_270 {dimension_numbers = #tpu.dot_dimension_numbers<[1], [0], [0], [1], [0, 0, 1, 1], [], []>} : vector<2x32xbf16>, vector<32x32xbf16>, vector<2x32xf32> -> vector<2x32xf32>
    %537 = arith.addf %535, %536 : vector<2x32xf32>
    %538 = math.tanh %537 : vector<2x32xf32>
    %539 = arith.index_cast %c7_i32 : i32 to index
    %c0_271 = arith.constant 0 : index
    %c0_272 = arith.constant 0 : index
    %540 = vector.load %arg14[%539, %c0_271, %c0_272] : memref<8x2x32xf32, #tpu.memory_space<vmem>>, vector<1x2x32xf32>
    %541 = vector.shape_cast %540 : vector<1x2x32xf32> to vector<2x32xf32>
    %cst_273 = arith.constant dense<0.000000e+00> : vector<2x32xf32>
    %542 = tpu.matmul %512, %180, %cst_273 {dimension_numbers = #tpu.dot_dimension_numbers<[1], [0], [0], [1], [0, 0, 1, 1], [], []>} : vector<2x32xbf16>, vector<32x32xbf16>, vector<2x32xf32> -> vector<2x32xf32>
    %543 = arith.addf %541, %542 : vector<2x32xf32>
    %544 = arith.negf %543 : vector<2x32xf32>
    %545 = math.exp %544 : vector<2x32xf32>
    %cst_274 = arith.constant 1.000000e+00 : f32
    %546 = vector.broadcast %cst_274 : f32 to vector<2x32xf32>
    %547 = arith.addf %546, %545 : vector<2x32xf32>
    %548 = arith.divf %546, %547 : vector<2x32xf32>
    %549 = arith.mulf %532, %504 : vector<2x32xf32>
    %550 = arith.mulf %522, %538 : vector<2x32xf32>
    %551 = arith.addf %549, %550 : vector<2x32xf32>
    %552 = math.tanh %551 : vector<2x32xf32>
    %553 = arith.mulf %548, %552 : vector<2x32xf32>
    %554 = arith.truncf %553 : vector<2x32xf32> to vector<2x32xbf16>
    %555 = arith.index_cast %c7_i32 : i32 to index
    %c0_275 = arith.constant 0 : index
    %c0_276 = arith.constant 0 : index
    %556 = vector.load %arg8[%555, %c0_275, %c0_276] : memref<8x2x32xbf16, #tpu.memory_space<vmem>>, vector<1x2x32xbf16>
    %557 = vector.shape_cast %556 : vector<1x2x32xbf16> to vector<2x32xbf16>
    %558 = vector.shape_cast %554 : vector<2x32xbf16> to vector<1x2x32xbf16>
    tpu.vector_store %arg8[%555, %c0_275, %c0_276], %558 {strides = array<i32>} : memref<8x2x32xbf16, #tpu.memory_space<vmem>>, vector<1x2x32xbf16>,
    %c8_i32 = arith.constant 8 : i32
    %c0_277 = arith.constant 0 : index
    %c0_278 = arith.constant 0 : index
    %559 = vector.load %arg15[%c0_277, %c0_278] : memref<2x32xf32, #tpu.memory_space<vmem>>, vector<2x32xf32>
    tpu.vector_store %arg15[%c0_277, %c0_278], %553 {strides = array<i32>} : memref<2x32xf32, #tpu.memory_space<vmem>>, vector<2x32xf32>,
    %c0_279 = arith.constant 0 : index
    %c0_280 = arith.constant 0 : index
    %560 = vector.load %arg16[%c0_279, %c0_280] : memref<2x32xf32, #tpu.memory_space<vmem>>, vector<2x32xf32>
    tpu.vector_store %arg16[%c0_279, %c0_280], %551 {strides = array<i32>} : memref<2x32xf32, #tpu.memory_space<vmem>>, vector<2x32xf32>,
    %c0_i32_281 = arith.constant 0 : i32
    %561 = arith.cmpi eq, %arg1, %c0_i32_281 : i32
    %562 = arith.extui %561 : i1 to i32
    %c0_i32_282 = arith.constant 0 : i32
    %563 = arith.cmpi ne, %562, %c0_i32_282 : i32
    scf.if %563 {
      %c0_283 = arith.constant 0 : index
      %c0_284 = arith.constant 0 : index
      %564 = vector.load %arg9[%c0_283, %c0_284] : memref<2x32xf32, #tpu.memory_space<vmem>>, vector<2x32xf32>
      tpu.vector_store %arg9[%c0_283, %c0_284], %553 {strides = array<i32>} : memref<2x32xf32, #tpu.memory_space<vmem>>, vector<2x32xf32>,
      %c0_285 = arith.constant 0 : index
      %c0_286 = arith.constant 0 : index
      %565 = vector.load %arg10[%c0_285, %c0_286] : memref<2x32xf32, #tpu.memory_space<vmem>>, vector<2x32xf32>
      tpu.vector_store %arg10[%c0_285, %c0_286], %551 {strides = array<i32>} : memref<2x32xf32, #tpu.memory_space<vmem>>, vector<2x32xf32>,
    } else {
    }
    return
  }
  func.func @transform_0(%arg0: i32, %arg1: i32) -> (i32, i32, i32) {
    %c0_i32 = arith.constant 0 : i32
    %c0_i32_0 = arith.constant 0 : i32
    return %arg1, %arg0, %c0_i32 : i32, i32, i32
  }
  func.func @transform_1(%arg0: i32, %arg1: i32) -> (i32, i32) {
    %c0_i32 = arith.constant 0 : i32
    %c0_i32_0 = arith.constant 0 : i32
    %c0_i32_1 = arith.constant 0 : i32
    return %c0_i32, %c0_i32_0 : i32, i32
  }
  func.func @transform_2(%arg0: i32, %arg1: i32) -> (i32, i32, i32) {
    %c0_i32 = arith.constant 0 : i32
    %c0_i32_0 = arith.constant 0 : i32
    %c0_i32_1 = arith.constant 0 : i32
    %c0_i32_2 = arith.constant 0 : i32
    return %c0_i32, %c0_i32_0, %c0_i32_1 : i32, i32, i32
  }
  func.func @transform_3(%arg0: i32, %arg1: i32) -> (i32, i32) {
    %c0_i32 = arith.constant 0 : i32
    %c0_i32_0 = arith.constant 0 : i32
    %c0_i32_1 = arith.constant 0 : i32
    return %c0_i32, %c0_i32_0 : i32, i32
  }
  func.func @transform_4(%arg0: i32, %arg1: i32) -> (i32, i32) {
    %c0_i32 = arith.constant 0 : i32
    %c0_i32_0 = arith.constant 0 : i32
    return %arg0, %c0_i32 : i32, i32
  }
  func.func @transform_5(%arg0: i32, %arg1: i32) -> (i32, i32) {
    %c0_i32 = arith.constant 0 : i32
    %c0_i32_0 = arith.constant 0 : i32
    return %arg0, %c0_i32 : i32, i32
  }
  func.func @transform_6(%arg0: i32, %arg1: i32) -> (i32, i32, i32) {
    %c0_i32 = arith.constant 0 : i32
    %c0_i32_0 = arith.constant 0 : i32
    return %arg1, %arg0, %c0_i32 : i32, i32, i32
  }
  func.func @transform_7(%arg0: i32, %arg1: i32) -> (i32, i32) {
    %c0_i32 = arith.constant 0 : i32
    %c0_i32_0 = arith.constant 0 : i32
    return %arg0, %c0_i32 : i32, i32
  }
  func.func @transform_8(%arg0: i32, %arg1: i32) -> (i32, i32) {
    %c0_i32 = arith.constant 0 : i32
    %c0_i32_0 = arith.constant 0 : i32
    return %arg0, %c0_i32 : i32, i32
  }
}

</mosaic_0001>

<bundles_post_ra>
// kernel: tpu_custom_call.1
= control target key start
LH: loop header
LB: loop body
LE: loop exit
PB: predicated region body
PF: predicated region fallthrough
CT: control target
= control target key end

     0   :  { %14 = vsyncpa [#allocation9], 0  ;;  %s3824_s0 = inlined_call_operand.hbm [shape: bf16[8,2,32], index: 0, kind: input, shape index: {}]   ;;  %s3825_s1 = inlined_call_operand.hbm [shape: bf16[32,128], index: 1, kind: input, shape index: {}]   ;;  %s3826_s2 = inlined_call_operand.hbm [shape: bf16[4,32,32], index: 2, kind: input, shape index: {}]   ;;  %s3827_s3 = inlined_call_operand.hbm [shape: f32[1,128], index: 3, kind: input, shape index: {}]   ;;  %s3828_s4 = inlined_call_operand.hbm [shape: f32[2,32], index: 4, kind: input, shape index: {}]   ;;  %s3829_s5 = inlined_call_operand.hbm [shape: f32[2,32], index: 5, kind: input, shape index: {}]   ;;  %s3830_s6 = inlined_call_operand.hbm [shape: bf16[8,2,32], index: 6, kind: output, shape index: {0}]   ;;  %s3831_s7 = inlined_call_operand.hbm [shape: f32[2,32], index: 7, kind: output, shape index: {1}]   ;;  %s3832_s8 = inlined_call_operand.hbm [shape: f32[2,32], index: 8, kind: output, shape index: {2}]  }
   0x1   :  { %15 = vsyncpa [#allocation12], 0 }
   0x2   :  { %16 = vsyncpa [#allocation15], 0 }
   0x3   :  { %17 = vsyncpa [#allocation18], 0 }
   0x4   :  { %18 = vsyncpa [#allocation10], 0 }
   0x5   :  { %19 = vsyncpa [#allocation21], 0  ;;  %s3234_s27 = smov [#allocation11]   ;;  %s3024_s9 = scalar_lea.hbm %s3825_s1, 256 }
   0x6   :  { %s37_s28 = sshll.u32 %s3234_s27, 4  ;;  %p3025_p0 = scmp.ne.s32.totalorder %s3825_s1, %s3024_s9  ;;  %s38_s28 = int_to_ptr.vmem [resolvable:$true] %s37_s28 }
   0x7   :  { %p3028_p1 = scmp.lt.u32.totalorder %s3024_s9, %s3825_s1 }
   0x9   :  { %p3030_p2 = pnand %p3028_p1, %p3025_p0 }
   0xb   :  { %3033 = shalt.err (!%p3030_p2)
}
   0xc   :  { %s3034_s14 = scalar_lea.vmem %s38_s28, 256  ;;  %p3039_p4 = scmp.lt.s32.totalorder %s38_s28, %s38_s28 }
   0xd   :  { %p3035_p3 = scmp.ne.s32.totalorder %s38_s28, %s3034_s14  ;;  %p3040_p5 = scmp.lt.s32.totalorder %s3034_s14, %s3034_s14 }
   0xf   :  { %p3041_p6 = por %p3040_p5, %p3039_p4 }
  0x11   :  { %p3042_p7 = pnand %p3041_p6, %p3035_p3 }
  0x13   :  { %3045 = shalt.err (!%p3042_p7)
}
  0x14   :  { %s3235_s15 = smov 64   ;;  %s3236_s16 = smov 4  }
  0x15   :  { %43 = dma.hbm_to_vmem [thread:$0]  %s3825_s1, 256, %s38_s28, [#allocation12], %s3235_s15, %s3235_s15, %s3236_s16  }
  0x16   :  { %s3237_s19 = smov [#allocation14]   ;;  %s3238_s21 = smov [#allocation8]  }
  0x17   :  { %s62_s20 = sshll.u32 %s3237_s19, 4  ;;  %s25_s22 = sshll.u32 %s3238_s21, 4  ;;  %s63_s20 = int_to_ptr.vmem [resolvable:$true] %s62_s20  ;;  %s26_s22 = int_to_ptr.vmem [resolvable:$true] %s25_s22 }
  0x18   :  { %s3046_s25 = scalar_lea.hbm %s3827_s3, 16 }
  0x19   :  { %p3047_p8 = scmp.ne.s32.totalorder %s3827_s3, %s3046_s25  ;;  %p3050_p9 = scmp.lt.u32.totalorder %s3046_s25, %s3827_s3 }
  0x1b   :  { %p3052_p10 = pnand %p3050_p9, %p3047_p8 }
  0x1d   :  { %3055 = shalt.err (!%p3052_p10)
}
  0x1e   :  { %s3056_s1 = scalar_lea.vmem %s63_s20, 16  ;;  %s3060_s28 = scalar_lea.vmem %s63_s20, 32 }
  0x1f   :  { %p3057_p11 = scmp.ne.s32.totalorder %s63_s20, %s3056_s1  ;;  %p3061_p12 = scmp.lt.s32.totalorder %s63_s20, %s63_s20 }
  0x20   :  { %p3062_p13 = scmp.lt.s32.totalorder %s3060_s28, %s3056_s1 }
  0x22   :  { %p3063_p0 = por %p3062_p13, %p3061_p12 }
  0x24   :  { %p3064_p1 = pnand %p3063_p0, %p3057_p11 }
  0x26   :  { %3067 = shalt.err (!%p3064_p1)
}
  0x27   :  { %65 = dma.hbm_to_vmem [thread:$0]  %s3827_s3, 16, %s63_s20, [#allocation15]  }
  0x28   :  { %s3068_s13 = scalar_lea.hbm %s3824_s0, 128 }
  0x29   :  { %p3069_p2 = scmp.ne.s32.totalorder %s3824_s0, %s3068_s13  ;;  %p3072_p3 = scmp.lt.u32.totalorder %s3068_s13, %s3824_s0 }
  0x2b   :  { %p3074_p4 = pnand %p3072_p3, %p3069_p2 }
  0x2d   :  { %3077 = shalt.err (!%p3074_p4)
}
  0x2e   :  { %s3078_s21 = scalar_lea.vmem %s26_s22, 128  ;;  %p3083_p6 = scmp.lt.s32.totalorder %s26_s22, %s26_s22 }
  0x2f   :  { %p3079_p5 = scmp.ne.s32.totalorder %s26_s22, %s3078_s21  ;;  %p3084_p7 = scmp.lt.s32.totalorder %s3078_s21, %s3078_s21 }
  0x31   :  { %p3085_p8 = por %p3084_p7, %p3083_p6 }
  0x33   :  { %p3086_p9 = pnand %p3085_p8, %p3079_p5 }
  0x35   :  { %3089 = shalt.err (!%p3086_p9)
}
  0x36   :  { %s3239_s3 = smov 16   ;;  %s3240_s20 = smov 1  }
  0x37   :  { %31 = dma.hbm_to_vmem [thread:$0]  %s3824_s0, 128, %s26_s22, [#allocation9], %s3239_s3, %s3239_s3, %s3240_s20  }
  0x38   :  { %s3241_s25 = smov [#allocation13]   ;;  %s3242_s27 = smov [#allocation16]  }
  0x39   :  { %s49_s26 = sshll.u32 %s3241_s25, 4  ;;  %s72_s29 = sshll.u32 %s3242_s27, 4  ;;  %s50_s26 = int_to_ptr.vmem [resolvable:$true] %s49_s26  ;;  %s73_s29 = int_to_ptr.vmem [resolvable:$true] %s72_s29 }
  0x3a   :  { %s3090_s28 = scalar_lea.hbm %s3826_s2, 1024 }
  0x3b   :  { %p3091_p10 = scmp.ne.s32.totalorder %s3826_s2, %s3090_s28  ;;  %p3094_p11 = scmp.lt.u32.totalorder %s3090_s28, %s3826_s2 }
  0x3d   :  { %p3096_p12 = pnand %p3094_p11, %p3091_p10 }
  0x3f   :  { %3099 = shalt.err (!%p3096_p12)
}
  0x40   :  { %s3100_s0 = scalar_lea.vmem %s50_s26, 1024  ;;  %p3105_p0 = scmp.lt.s32.totalorder %s50_s26, %s50_s26 }
  0x41   :  { %p3101_p13 = scmp.ne.s32.totalorder %s50_s26, %s3100_s0  ;;  %p3106_p1 = scmp.lt.s32.totalorder %s3100_s0, %s3100_s0 }
  0x43   :  { %p3107_p2 = por %p3106_p1, %p3105_p0 }
  0x45   :  { %p3108_p3 = pnand %p3107_p2, %p3101_p13 }
  0x47   :  { %3111 = shalt.err (!%p3108_p3)
}
  0x48   :  { %55 = dma.hbm_to_vmem [thread:$0]  %s3826_s2, 1024, %s50_s26, [#allocation12], %s3235_s15, %s3235_s15, %s3236_s16  }
  0x49   :  { %s3112_s18 = scalar_lea.hbm %s3828_s4, 32 }
  0x4a   :  { %p3113_p4 = scmp.ne.s32.totalorder %s3828_s4, %s3112_s18  ;;  %p3116_p5 = scmp.lt.u32.totalorder %s3112_s18, %s3828_s4 }
  0x4c   :  { %p3118_p6 = pnand %p3116_p5, %p3113_p4 }
  0x4e   :  { %3121 = shalt.err (!%p3118_p6)
}
  0x4f   :  { %s3122_s25 = scalar_lea.vmem %s73_s29, 32  ;;  %p3127_p8 = scmp.lt.s32.totalorder %s73_s29, %s73_s29 }
  0x50   :  { %p3123_p7 = scmp.ne.s32.totalorder %s73_s29, %s3122_s25  ;;  %p3128_p9 = scmp.lt.s32.totalorder %s3122_s25, %s3122_s25 }
  0x52   :  { %p3129_p10 = por %p3128_p9, %p3127_p8 }
  0x54   :  { %p3130_p11 = pnand %p3129_p10, %p3123_p7 }
  0x56   :  { %3133 = shalt.err (!%p3130_p11)
}
  0x57   :  { %75 = dma.hbm_to_vmem [thread:$0]  %s3828_s4, 32, %s73_s29, [#allocation15]  }
  0x58   :  { %s3243_s26 = smov [#allocation17]   ;;  %s3134_s28 = scalar_lea.hbm %s3829_s5, 32 }
  0x59   :  { %s82_s27 = sshll.u32 %s3243_s26, 4  ;;  %p3135_p12 = scmp.ne.s32.totalorder %s3829_s5, %s3134_s28  ;;  %s83_s27 = int_to_ptr.vmem [resolvable:$true] %s82_s27 }
  0x5a   :  { %p3138_p13 = scmp.lt.u32.totalorder %s3134_s28, %s3829_s5 }
  0x5c   :  { %p3140_p0 = pnand %p3138_p13, %p3135_p12 }
  0x5e   :  { %3143 = shalt.err (!%p3140_p0)
}
  0x5f   :  { %s3144_s0 = scalar_lea.vmem %s83_s27, 32  ;;  %p3149_p2 = scmp.lt.s32.totalorder %s83_s27, %s83_s27 }
  0x60   :  { %p3145_p1 = scmp.ne.s32.totalorder %s83_s27, %s3144_s0  ;;  %p3150_p3 = scmp.lt.s32.totalorder %s3144_s0, %s3144_s0 }
  0x62   :  { %p3151_p4 = por %p3150_p3, %p3149_p2 }
  0x64   :  { %p3152_p5 = pnand %p3151_p4, %p3145_p1 }
  0x66   :  { %3155 = shalt.err (!%p3152_p5)
}
  0x67   :  { %85 = dma.hbm_to_vmem [thread:$0]  %s3829_s5, 32, %s83_s27, [#allocation18]  }
  0x68   :  { %3222 = dma.done.wait [#allocation9], 128  }
  0x69   :  { %3223 = vsyncadd [#allocation9], 4294967168 }
  0x6a   :  { %3224 = dma.done.wait [#allocation12], 1280  }
  0x6b   :  { %3225 = vsyncadd [#allocation12], 4294966016 }
  0x6c   :  { %3226 = dma.done.wait [#allocation15], 48  }
  0x6d   :  { %3227 = vsyncadd [#allocation15], 4294967248 }
  0x6e   :  { %3228 = dma.done.wait [#allocation18], 32  }
  0x6f   :  { %3229 = vsyncadd [#allocation18], 4294967264  ;;  %v3244_v0 = vmov 0.0   ;;  %vm3245_vm0 = vmmov 0   ;;  %v2878_v1 = vld [vmem:[#allocation11] sm:$0xff]   ;;  %v2879_v2 = vld [vmem:[#allocation11 + $0x8] sm:$0xff]  }
  0x70   :  { %2541 = vmatprep.subr.bf16.mxu0 %v3244_v0  ;;  %2545 = vmatprep.mubr.msk.bf16.mxu0 %vm3245_vm0, %v3244_v0  ;;  %vm110_vm1 = vcmask 254976   ;;  %v109_v3 = vld [vmem:[#allocation16] sm:$0x3]  ;;  %v119_v4 = vld [vmem:[#allocation8] sm:$0x1]  ;;  %vm138_vm2 = vcmask 261120  }
  0x71   :  { %2549 = vmatprep.subr.bf16.mxu1 %v3244_v0  ;;  %2553 = vmatprep.mubr.msk.bf16.mxu1 %vm3245_vm0, %v3244_v0  ;;  %111 = vst.msk [vmem:[#allocation6] sm:$0x3] %vm110_vm1, %v109_v3  ;;  %v198_v5 = vld [vmem:[#allocation8 + $0x1] sm:$0x1]  ;;  %v261_v6 = vld [vmem:[#allocation8 + $0x2] sm:$0x1] }
  0x72   :  { %2542 = vmatpush3.bf16.msra.mxu0 %v2878_v1  ;;  %2550 = vmatpush3.bf16.msra.mxu1 %v2878_v1  ;;  %v324_v7 = vld [vmem:[#allocation8 + $0x3] sm:$0x1]  ;;  %v387_v8 = vld [vmem:[#allocation8 + $0x4] sm:$0x1]  ;;  %v450_v9 = vld [vmem:[#allocation8 + $0x5] sm:$0x1] }
  0x73   :  { %2543 = vmatprep.subr.bf16.mxu0 %v3244_v0  ;;  %2551 = vmatprep.subr.bf16.mxu1 %v3244_v0  ;;  %v513_v10 = vld [vmem:[#allocation8 + $0x6] sm:$0x1]  ;;  %v3416_v11 = vld [vmem:[#allocation13] sm:$0xff]   ;;  %v576_v12 = vld [vmem:[#allocation8 + $0x7] sm:$0x1]  ;;  %s3246_s5 = smov 32  }
  0x74   :  { %v3419_v13 = vld [vmem:[#allocation13 + $0x10] sm:$0xff]   ;;  %v3424_v14 = vld [vmem:[#allocation13 + $0x8] sm:$0xff]   ;;  %v3431_v16 = vld [vmem:[#allocation13 + $0x18] sm:$0xff]   ;;  %s3247_s22 = smov 96   ;;  %vm904_vm3 = vcmask 253952   ;;  %s3249_s14 = smov [#allocation22]  }
  0x75   :  { %v3437_v18 = vld [vmem:[#allocation13 + $0x20] sm:$0xff]   ;;  %v3441_v19 = vld [vmem:[#allocation13 + $0x30] sm:$0xff]   ;;  %v3446_v20 = vld [vmem:[#allocation13 + $0x28] sm:$0xff]   ;;  %s2327_s17 = sshll.u32 %s3249_s14, 4  ;;  %s3250_s18 = smov [#allocation19]   ;;  %s3768_s17 = int_to_ptr.vmem [resolvable:$true] %s2327_s17 }
  0x76   :  { %2544 = vmatpush3.bf16.msra.mxu0 %v2879_v2  ;;  %2552 = vmatpush3.bf16.msra.mxu1 %v2879_v2  ;;  %v3453_v21 = vld [vmem:[#allocation13 + $0x38] sm:$0xff]   ;;  %v112_v22 = vld [vmem:[#allocation17] sm:$0x3]  ;;  %v2346_v23 = vld [vmem:[#allocation14] ss:$0 sm:$0xff]  ;;  %s2304_s19 = sshll.u32 %s3250_s18, 4  ;;  %s3772_s19 = int_to_ptr.vmem [resolvable:$true] %s2304_s19 }
  0x77   :  { %2557 = vmatprep.subr.bf16.mxu0 %v3244_v0  ;;  %2565 = vmatprep.subr.bf16.mxu1 %v3244_v0  ;;  %113 = vst.msk [vmem:[#allocation7] sm:$0x3] %vm110_vm1, %v112_v22 }
  0x78   :  { %v657_v15 = vld [vmem:[#allocation6] sm:$0x3] }
  0x79   :  { %2546 = vmatmul.mubr.msk.bf16.vlgmr.msra.gmra.mrb[0].mxu0 %vm138_vm2, %v119_v4  ;;  %2554 = vmatmul.mubr.msk.bf16.vlgmr.msra.gmra.mrb[0].mxu1 %vm138_vm2, %v198_v5  ;;  %v659_v17 = vpack.c.bf16 %v657_v15, %v657_v15 }
  0x7a   :  { %2558 = vmatpush3.bf16.msra.mxu0 %v2878_v1  ;;  %2561 = vmatprep.mubr.msk.bf16.mxu0 %vm3245_vm0, %v3244_v0 }
  0x7b   :  { %2559 = vmatprep.subr.bf16.mxu0 %v3244_v0  ;;  %2566 = vmatpush3.bf16.msra.mxu1 %v2878_v1 }
  0x7c   :  { %2567 = vmatprep.subr.bf16.mxu1 %v3244_v0  ;;  %2569 = vmatprep.mubr.msk.bf16.mxu1 %vm3245_vm0, %v3244_v0 }
  0x7e   :  { %2560 = vmatpush3.bf16.msra.mxu0 %v2879_v2 }
  0x7f   :  { %2573 = vmatprep.subr.bf16.mxu0 %v3244_v0  ;;  %2568 = vmatpush3.bf16.msra.mxu1 %v2879_v2 }
  0x80   :  { %2581 = vmatprep.subr.bf16.mxu1 %v3244_v0 }
  0x81   :  { %2562 = vmatmul.mubr.msk.bf16.vlgmr.msra.gmra.mrb[4].mxu0 %vm138_vm2, %v261_v6 }
  0x82   :  { %2574 = vmatpush3.bf16.msra.mxu0 %v2878_v1  ;;  %2577 = vmatprep.mubr.msk.bf16.mxu0 %vm3245_vm0, %v3244_v0 }
  0x83   :  { %2575 = vmatprep.subr.bf16.mxu0 %v3244_v0  ;;  %2570 = vmatmul.mubr.msk.bf16.vlgmr.msra.gmra.mrb[4].mxu1 %vm138_vm2, %v324_v7 }
  0x84   :  { %2582 = vmatpush3.bf16.msra.mxu1 %v2878_v1  ;;  %2585 = vmatprep.mubr.msk.bf16.mxu1 %vm3245_vm0, %v3244_v0 }
  0x85   :  { %2583 = vmatprep.subr.bf16.mxu1 %v3244_v0 }
  0x86   :  { %2576 = vmatpush3.bf16.msra.mxu0 %v2879_v2 }
  0x87   :  { %2589 = vmatprep.subr.bf16.mxu0 %v3244_v0 }
  0x88   :  { %2584 = vmatpush3.bf16.msra.mxu1 %v2879_v2 }
  0x89   :  { %2578 = vmatmul.mubr.msk.bf16.vlgmr.msra.gmra.mrb[8].mxu0 %vm138_vm2, %v387_v8  ;;  %2597 = vmatprep.subr.bf16.mxu1 %v3244_v0 }
  0x8a   :  { %2590 = vmatpush3.bf16.msra.mxu0 %v2878_v1  ;;  %2593 = vmatprep.mubr.msk.bf16.mxu0 %vm3245_vm0, %v3244_v0 }
  0x8b   :  { %2591 = vmatprep.subr.bf16.mxu0 %v3244_v0  ;;  %2586 = vmatmul.mubr.msk.bf16.vlgmr.msra.gmra.mrb[8].mxu1 %vm138_vm2, %v450_v9 }
  0x8c   :  { %2598 = vmatpush3.bf16.msra.mxu1 %v2878_v1  ;;  %2601 = vmatprep.mubr.msk.bf16.mxu1 %vm3245_vm0, %v3244_v0 }
  0x8d   :  { %2599 = vmatprep.subr.bf16.mxu1 %v3244_v0 }
  0x8e   :  { %2592 = vmatpush3.bf16.msra.mxu0 %v2879_v2 }
  0x8f   :  { %2605 = vmatprep.subr.bf16.mxu0 %v3244_v0 }
  0x90   :  { %2600 = vmatpush3.bf16.msra.mxu1 %v2879_v2 }
  0x91   :  { %2594 = vmatmul.mubr.msk.bf16.vlgmr.msra.gmra.mrb[12].mxu0 %vm138_vm2, %v513_v10  ;;  %2613 = vmatprep.subr.bf16.mxu1 %v3244_v0 }
  0x92   :  { %2606 = vmatpush3.bf16.msra.mxu0 %v3416_v11  ;;  %2609 = vmatprep.mubr.msk.bf16.mxu0 %vm3245_vm0, %v3244_v0 }
  0x93   :  { %2607 = vmatprep.subr.bf16.mxu0 %v3244_v0  ;;  %2602 = vmatmul.mubr.msk.bf16.vlgmr.msra.gmra.mrb[12].mxu1 %vm138_vm2, %v576_v12 }
  0x94   :  { %2614 = vmatpush3.bf16.msra.mxu1 %v3419_v13  ;;  %2617 = vmatprep.mubr.msk.bf16.mxu1 %vm3245_vm0, %v3244_v0 }
  0x95   :  { %2615 = vmatprep.subr.bf16.mxu1 %v3244_v0 }
  0x96   :  { %2608 = vmatpush3.bf16.msra.mxu0 %v3424_v14 }
  0x97   :  { %2621 = vmatprep.subr.bf16.mxu0 %v3244_v0 }
  0x98   :  { %2616 = vmatpush3.bf16.msra.mxu1 %v3431_v16 }
  0x99   :  { %2610 = vmatmul.mubr.msk.bf16.vlgmr.msra.gmra.mrb[16].mxu0 %vm138_vm2, %v659_v17  ;;  %2629 = vmatprep.subr.bf16.mxu1 %v3244_v0 }
  0x9a   :  { %2622 = vmatpush3.bf16.msra.mxu0 %v3437_v18  ;;  %2625 = vmatprep.mubr.msk.bf16.mxu0 %vm3245_vm0, %v3244_v0 }
  0x9b   :  { %2618 = vmatmul.mubr.msk.bf16.vlgmr.msra.gmra.mrb[16].mxu1 %vm138_vm2, %v659_v17  ;;  %2623 = vmatprep.subr.bf16.mxu0 %v3244_v0 }
  0x9c   :  { %2630 = vmatpush3.bf16.msra.mxu1 %v3441_v19  ;;  %2633 = vmatprep.mubr.msk.bf16.mxu1 %vm3245_vm0, %v3244_v0 }
  0x9d   :  { %2631 = vmatprep.subr.bf16.mxu1 %v3244_v0 }
  0x9e   :  { %2624 = vmatpush3.bf16.msra.mxu0 %v3446_v20 }
  0x9f   :  { %2637 = vmatprep.subr.bf16.mxu0 %v3244_v0 }
  0xa0   :  { %2632 = vmatpush3.bf16.msra.mxu1 %v3453_v21 }
  0xa1   :  { %2626 = vmatmul.mubr.msk.bf16.vlgmr.msra.gmra.mrb[20].mxu0 %vm138_vm2, %v659_v17  ;;  %2645 = vmatprep.subr.bf16.mxu1 %v3244_v0 }
  0xa2   :  { %2638 = vmatpush3.bf16.msra.mxu0 %v3416_v11  ;;  %2641 = vmatprep.mubr.msk.bf16.mxu0 %vm3245_vm0, %v3244_v0 }
  0xa3   :  { %2634 = vmatmul.mubr.msk.bf16.vlgmr.msra.gmra.mrb[20].mxu1 %vm138_vm2, %v659_v17  ;;  %2639 = vmatprep.subr.bf16.mxu0 %v3244_v0 }
  0xa4   :  { %2646 = vmatpush3.bf16.msra.mxu1 %v3419_v13  ;;  %2649 = vmatprep.mubr.msk.bf16.mxu1 %vm3245_vm0, %v3244_v0 }
  0xa5   :  { %2647 = vmatprep.subr.bf16.mxu1 %v3244_v0 }
  0xa6   :  { %2640 = vmatpush3.bf16.msra.mxu0 %v3424_v14 }
  0xa7   :  { %2653 = vmatprep.subr.bf16.mxu0 %v3244_v0 }
  0xa8   :  { %2648 = vmatpush3.bf16.msra.mxu1 %v3431_v16 }
  0xa9   :  { %2661 = vmatprep.subr.bf16.mxu1 %v3244_v0 }
 0x14c   :  { %v176_v24 = vpop.f32.mrb[0].mxu0  ;;  %v236_v25 = vpop.f32.mrb[0].mxu1 }
 0x14d   :  { %v177_v26 = vadd.f32 %v2346_v23, %v176_v24  ;;  %v2547_v27 = vpop.f32.mrb[1].mxu0  ;;  %v237_v28 = vadd.f32 %v2346_v23, %v236_v25  ;;  %v2555_v29 = vpop.f32.mrb[1].mxu1 }
 0x14e   :  { %v179_v30 = vpop.f32.mrb[2].mxu0  ;;  %v239_v31 = vpop.f32.mrb[2].mxu1 }
 0x14f   :  { %183 = vst.msk [vmem:[#allocation2] sm:$0x3] %vm110_vm1, %v177_v26  ;;  %193 = vrot.lane.b32.xlu1 %v177_v26, %s3246_s5  ;;  %185 = vrot.lane.b32.xlu0 %v177_v26, %s3247_s22  ;;  %v2548_v32 = vpop.f32.mrb[3].mxu0  ;;  %243 = vst.msk [vmem:[#allocation2 + $0x2] sm:$0x3] %vm110_vm1, %v237_v28  ;;  %v2556_v33 = vpop.f32.mrb[3].mxu1 }
 0x153   :  { %189 = vrot.lane.b32.xlu0 %v177_v26, %s3235_s15  ;;  %245 = vrot.lane.b32.xlu1 %v237_v28, %s3247_s22 }
 0x154   :  { %v299_v34 = vpop.f32.mrb[4].mxu0 }
 0x155   :  { %v300_v35 = vadd.f32 %v2346_v23, %v299_v34  ;;  %v2563_v36 = vpop.f32.mrb[5].mxu0 }
 0x156   :  { %v302_v37 = vpop.f32.mrb[6].mxu0  ;;  %v362_v38 = vpop.f32.mrb[4].mxu1  ;;  %v660_v25 = vld [vmem:[#allocation2] sm:$0x3] }
 0x157   :  { %306 = vst.msk [vmem:[#allocation2 + $0x4] sm:$0x3] %vm110_vm1, %v300_v35  ;;  %v2564_v39 = vpop.f32.mrb[7].mxu0  ;;  %255 = vrot.lane.b32.xlu1 %v237_v28, %s3246_s5  ;;  %250 = vrot.lane.b32.xlu0 %v237_v28, %s3235_s15  ;;  %v363_v40 = vadd.f32 %v2346_v23, %v362_v38  ;;  %v2571_v41 = vpop.f32.mrb[5].mxu1 }
 0x158   :  { %v365_v42 = vpop.f32.mrb[6].mxu1 }
 0x159   :  { %369 = vst.msk [vmem:[#allocation2 + $0x6] sm:$0x3] %vm110_vm1, %v363_v40  ;;  %v2572_v43 = vpop.f32.mrb[7].mxu1 }
 0x15b   :  { %313 = vrot.lane.b32.xlu1 %v300_v35, %s3235_s15  ;;  %308 = vrot.lane.b32.xlu0 %v300_v35, %s3247_s22 }
 0x15c   :  { %v425_v44 = vpop.f32.mrb[8].mxu0 }
 0x15d   :  { %v426_v45 = vadd.f32 %v2346_v23, %v425_v44  ;;  %v2579_v46 = vpop.f32.mrb[9].mxu0 }
 0x15e   :  { %v428_v47 = vpop.f32.mrb[10].mxu0  ;;  %v488_v48 = vpop.f32.mrb[8].mxu1 }
 0x15f   :  { %432 = vst.msk [vmem:[#allocation2 + $0x8] sm:$0x3] %vm110_vm1, %v426_v45  ;;  %v2580_v49 = vpop.f32.mrb[11].mxu0  ;;  %371 = vrot.lane.b32.xlu1 %v363_v40, %s3247_s22  ;;  %318 = vrot.lane.b32.xlu0 %v300_v35, %s3246_s5  ;;  %v489_v50 = vadd.f32 %v2346_v23, %v488_v48  ;;  %v2587_v51 = vpop.f32.mrb[9].mxu1 }
 0x160   :  { %v491_v52 = vpop.f32.mrb[10].mxu1 }
 0x161   :  { %495 = vst.msk [vmem:[#allocation2 + $0xa] sm:$0x3] %vm110_vm1, %v489_v50  ;;  %v2588_v53 = vpop.f32.mrb[11].mxu1 }
 0x163   :  { %381 = vrot.lane.b32.xlu1 %v363_v40, %s3246_s5  ;;  %376 = vrot.lane.b32.xlu0 %v363_v40, %s3235_s15 }
 0x164   :  { %v551_v54 = vpop.f32.mrb[12].mxu0 }
 0x165   :  { %v552_v55 = vadd.f32 %v2346_v23, %v551_v54  ;;  %v2595_v56 = vpop.f32.mrb[13].mxu0 }
 0x166   :  { %v554_v57 = vpop.f32.mrb[14].mxu0  ;;  %v614_v58 = vpop.f32.mrb[12].mxu1 }
 0x167   :  { %558 = vst.msk [vmem:[#allocation2 + $0xc] sm:$0x3] %vm110_vm1, %v552_v55  ;;  %v2596_v59 = vpop.f32.mrb[15].mxu0  ;;  %439 = vrot.lane.b32.xlu1 %v426_v45, %s3235_s15  ;;  %434 = vrot.lane.b32.xlu0 %v426_v45, %s3247_s22  ;;  %v615_v60 = vadd.f32 %v2346_v23, %v614_v58  ;;  %v2603_v61 = vpop.f32.mrb[13].mxu1 }
 0x168   :  { %v617_v62 = vpop.f32.mrb[14].mxu1 }
 0x169   :  { %621 = vst.msk [vmem:[#allocation2 + $0xe] sm:$0x3] %vm110_vm1, %v615_v60  ;;  %v2604_v63 = vpop.f32.mrb[15].mxu1  ;;  %v658_v62 = vld [vmem:[#allocation7] sm:$0x3] }
 0x16b   :  { %497 = vrot.lane.b32.xlu1 %v489_v50, %s3247_s22  ;;  %444 = vrot.lane.b32.xlu0 %v426_v45, %s3246_s5 }
 0x16c   :  { %v710_v1 = vpop.f32.mrb[16].mxu0 }
 0x16d   :  { %v2611_v2 = vpop.f32.mrb[17].mxu0  ;;  %v716_v26 = vadd.f32 %v710_v1, %v660_v25 }
 0x16e   :  { %v770_v3 = vpop.f32.mrb[16].mxu1  ;;  %v713_v4 = vpop.f32.mrb[18].mxu0 }
 0x16f   :  { %507 = vrot.lane.b32.xlu1 %v489_v50, %s3246_s5  ;;  %502 = vrot.lane.b32.xlu0 %v489_v50, %s3235_s15  ;;  %v2619_v5 = vpop.f32.mrb[17].mxu1  ;;  %v2612_v6 = vpop.f32.mrb[19].mxu0  ;;  %v2360_v27 = vmul.f32 -1.442695, %v716_v26 }
 0x170   :  { %v773_v7 = vpop.f32.mrb[18].mxu1 }
 0x171   :  { %v2620_v8 = vpop.f32.mrb[19].mxu1  ;;  %2888 = vpow2.f32 %v2360_v27 }
 0x173   :  { %565 = vrot.lane.b32.xlu1 %v552_v55, %s3235_s15  ;;  %560 = vrot.lane.b32.xlu0 %v552_v55, %s3247_s22 }
 0x174   :  { %v830_v9 = vpop.f32.mrb[20].mxu0 }
 0x175   :  { %v2627_v10 = vpop.f32.mrb[21].mxu0 }
 0x176   :  { %v885_v12 = vpop.f32.mrb[20].mxu1  ;;  %v833_v15 = vpop.f32.mrb[22].mxu0 }
 0x177   :  { %623 = vrot.lane.b32.xlu1 %v615_v60, %s3247_s22  ;;  %570 = vrot.lane.b32.xlu0 %v552_v55, %s3246_s5  ;;  %v2635_v17 = vpop.f32.mrb[21].mxu1  ;;  %v2628_v22 = vpop.f32.mrb[23].mxu0 }
 0x178   :  { %v888_v23 = vpop.f32.mrb[22].mxu1  ;;  %v906_v22 = vld [vmem:[#allocation2 + $0x2] sm:$0x3] }
 0x179   :  { %v2636_v24 = vpop.f32.mrb[23].mxu1 }
 0x17b   :  { %633 = vrot.lane.b32.xlu1 %v615_v60, %s3246_s5  ;;  %628 = vrot.lane.b32.xlu0 %v615_v60, %s3235_s15  ;;  %v2889_v32 = vpop.eup %2888  ;;  %s3248_s15 = smov [#allocation20]  }
 0x17c   :  { %v720_v37 = vadd.f32 1.0, %v2889_v32  ;;  %s2317_s13 = sshll.u32 %s3248_s15, 4  ;;  %s2318_s13 = int_to_ptr.vmem [resolvable:$true] %s2317_s13 }
 0x17d   :  { %s3156_s21 = scalar_lea.vmem %s2318_s13, 32  ;;  %p3161_p7 = scmp.lt.s32.totalorder %s2318_s13, %s2318_s13 }
 0x17e   :  { %p3157_p6 = scmp.ne.s32.totalorder %s2318_s13, %s3156_s21  ;;  %p3162_p8 = scmp.lt.s32.totalorder %s3156_s21, %s3156_s21 }
 0x180   :  { %p3163_p9 = por %p3162_p8, %p3161_p7 }
 0x182   :  { %p3164_p10 = pnand %p3163_p9, %p3157_p6 }
 0x1c1   :  { %v194_v28 = vpop.permute.xlu1 %193  ;;  %v186_v29 = vpop.permute.xlu0 %185 }
 0x1c2   :  { %196 = vst.msk [vmem:[#allocation5] sm:$0x3] %vm110_vm1, %v194_v28  ;;  %188 = vst.msk [vmem:[#allocation3] sm:$0x3] %vm110_vm1, %v186_v29 }
 0x1c5   :  { %v190_v30 = vpop.permute.xlu0 %189  ;;  %v246_v31 = vpop.permute.xlu1 %245 }
 0x1c6   :  { %192 = vst.msk [vmem:[#allocation4] sm:$0x3] %vm110_vm1, %v190_v30  ;;  %249 = vst.msk [vmem:[#allocation3 + $0x2] sm:$0x3] %vm110_vm1, %v246_v31 }
 0x1c9   :  { %v723_v33 = vld [vmem:[#allocation3] sm:$0x3]  ;;  %v256_v34 = vpop.permute.xlu1 %255  ;;  %v251_v35 = vpop.permute.xlu0 %250 }
 0x1ca   :  { %v776_v36 = vadd.f32 %v770_v3, %v723_v33  ;;  %259 = vst.msk [vmem:[#allocation5 + $0x2] sm:$0x3] %vm110_vm1, %v256_v34  ;;  %254 = vst.msk [vmem:[#allocation4 + $0x2] sm:$0x3] %vm110_vm1, %v251_v35  ;;  %v838_v39 = vld [vmem:[#allocation5] sm:$0x3] }
 0x1cb   :  { %v891_v44 = vadd.f32 %v885_v12, %v838_v39 }
 0x1cc   :  { %v2364_v38 = vmul.f32 -1.442695, %v776_v36 }
 0x1cd   :  { %v783_v40 = vld [vmem:[#allocation4] sm:$0x3]  ;;  %v314_v41 = vpop.permute.xlu1 %313  ;;  %v309_v42 = vpop.permute.xlu0 %308  ;;  %v2371_v47 = vmul.f32 -1.442695, %v891_v44  ;;  %v957_v24 = vld [vmem:[#allocation3 + $0x2] sm:$0x3] }
 0x1ce   :  { %2890 = vpow2.f32 %v2364_v38  ;;  %v836_v43 = vadd.f32 %v830_v9, %v783_v40  ;;  %317 = vst.msk [vmem:[#allocation4 + $0x4] sm:$0x3] %vm110_vm1, %v314_v41  ;;  %312 = vst.msk [vmem:[#allocation3 + $0x4] sm:$0x3] %vm110_vm1, %v309_v42 }
 0x1cf   :  { %2892 = vrcp.f32 %v720_v37 }
 0x1d0   :  { %2894 = vtanh.f32 %v836_v43 }
 0x1d1   :  { %v372_v45 = vpop.permute.xlu1 %371  ;;  %v319_v46 = vpop.permute.xlu0 %318  ;;  %2896 = vpow2.f32 %v2371_v47  ;;  %v1048_v37 = vld [vmem:[#allocation5 + $0x2] sm:$0x3] }
 0x1d2   :  { %375 = vst.msk [vmem:[#allocation3 + $0x6] sm:$0x3] %vm110_vm1, %v372_v45  ;;  %322 = vst.msk [vmem:[#allocation5 + $0x4] sm:$0x3] %vm110_vm1, %v319_v46  ;;  %v1005_v46 = vld [vmem:[#allocation4 + $0x2] sm:$0x3] }
 0x1d5   :  { %v382_v48 = vpop.permute.xlu1 %381  ;;  %v377_v49 = vpop.permute.xlu0 %376 }
 0x1d6   :  { %385 = vst.msk [vmem:[#allocation5 + $0x6] sm:$0x3] %vm110_vm1, %v382_v48  ;;  %380 = vst.msk [vmem:[#allocation4 + $0x6] sm:$0x3] %vm110_vm1, %v377_v49 }
 0x1d8   :  { %v2891_v50 = vpop.eup %2890 }
 0x1d9   :  { %v2893_v51 = vpop.eup %2892  ;;  %v780_v52 = vadd.f32 1.0, %v2891_v50  ;;  %v440_v53 = vpop.permute.xlu1 %439 }
 0x1da   :  { %v435_v54 = vpop.permute.xlu0 %434  ;;  %v2895_v55 = vpop.eup %2894  ;;  %443 = vst.msk [vmem:[#allocation4 + $0x8] sm:$0x3] %vm110_vm1, %v440_v53 }
 0x1db   :  { %438 = vst.msk [vmem:[#allocation3 + $0x8] sm:$0x3] %vm110_vm1, %v435_v54  ;;  %2898 = vrcp.f32 %v780_v52  ;;  %v899_v56 = vmul.f32 %v2895_v55, %v2893_v51  ;;  %v2897_v61 = vpop.eup %2896 }
 0x1dc   :  { %v895_v1 = vadd.f32 1.0, %v2897_v61 }
 0x1dd   :  { %v498_v57 = vpop.permute.xlu1 %497 }
 0x1de   :  { %v445_v58 = vpop.permute.xlu0 %444  ;;  %501 = vst.msk [vmem:[#allocation3 + $0xa] sm:$0x3] %vm110_vm1, %v498_v57  ;;  %2900 = vrcp.f32 %v895_v1 }
 0x1df   :  { %448 = vst.msk [vmem:[#allocation5 + $0x8] sm:$0x3] %vm110_vm1, %v445_v58 }
 0x1e1   :  { %v508_v59 = vpop.permute.xlu1 %507 }
 0x1e2   :  { %v503_v60 = vpop.permute.xlu0 %502  ;;  %511 = vst.msk [vmem:[#allocation5 + $0xa] sm:$0x3] %vm110_vm1, %v508_v59 }
 0x1e3   :  { %506 = vst.msk [vmem:[#allocation4 + $0xa] sm:$0x3] %vm110_vm1, %v503_v60 }
 0x1e5   :  { %v2899_v63 = vpop.eup %2898  ;;  %v566_v2 = vpop.permute.xlu1 %565 }
 0x1e6   :  { %v561_v3 = vpop.permute.xlu0 %560  ;;  %v898_v4 = vmul.f32 %v2899_v63, %v658_v62  ;;  %569 = vst.msk [vmem:[#allocation4 + $0xc] sm:$0x3] %vm110_vm1, %v566_v2  ;;  %v1104_v2 = vld [vmem:[#allocation2 + $0x4] sm:$0x3] }
 0x1e7   :  { %564 = vst.msk [vmem:[#allocation3 + $0xc] sm:$0x3] %vm110_vm1, %v561_v3 }
 0x1e8   :  { %v3529_v5 = vadd.f32 %v899_v56, %v898_v4  ;;  %v2901_v10 = vpop.eup %2900  ;;  %v1155_v4 = vld [vmem:[#allocation3 + $0x4] sm:$0x3] }
 0x1e9   :  { %v624_v6 = vpop.permute.xlu1 %623 }
 0x1ea   :  { %v571_v7 = vpop.permute.xlu0 %570  ;;  %2902 = vtanh.f32 %v3529_v5  ;;  %627 = vst.msk [vmem:[#allocation3 + $0xe] sm:$0x3] %vm110_vm1, %v624_v6 }
 0x1eb   :  { %574 = vst.msk [vmem:[#allocation5 + $0xc] sm:$0x3] %vm110_vm1, %v571_v7 }
 0x1ed   :  { %v634_v8 = vpop.permute.xlu1 %633 }
 0x1ee   :  { %v629_v9 = vpop.permute.xlu0 %628  ;;  %637 = vst.msk [vmem:[#allocation5 + $0xe] sm:$0x3] %vm110_vm1, %v634_v8 }
 0x1ef   :  { %632 = vst.msk [vmem:[#allocation4 + $0xe] sm:$0x3] %vm110_vm1, %v629_v9 }
 0x1f4   :  { %v2903_v12 = vpop.eup %2902 }
 0x1f5   :  { %v902_v15 = vmul.f32 %v2903_v12, %v2901_v10 }
 0x1f7   :  { %v903_v17 = vpack.c.bf16 %v902_v15, %v902_v15 }
 0x1f9   :  { %2642 = vmatmul.mubr.msk.bf16.vlgmr.msra.gmra.mrb[24].mxu0 %vm138_vm2, %v903_v17  ;;  %2650 = vmatmul.mubr.msk.bf16.vlgmr.msra.gmra.mrb[24].mxu1 %vm138_vm2, %v903_v17  ;;  %905 = vst.msk [vmem:[#allocation19] sm:$0x1] %vm904_vm3, %v903_v17 }
 0x1fa   :  { %2654 = vmatpush3.bf16.msra.mxu0 %v3437_v18  ;;  %2662 = vmatpush3.bf16.msra.mxu1 %v3441_v19 }
 0x1fb   :  { %2655 = vmatprep.subr.bf16.mxu0 %v3244_v0  ;;  %2663 = vmatprep.subr.bf16.mxu1 %v3244_v0 }
 0x1fc   :  { %2657 = vmatprep.mubr.msk.bf16.mxu0 %vm3245_vm0, %v3244_v0  ;;  %2665 = vmatprep.mubr.msk.bf16.mxu1 %vm3245_vm0, %v3244_v0 }
 0x1fe   :  { %2656 = vmatpush3.bf16.msra.mxu0 %v3446_v20  ;;  %2664 = vmatpush3.bf16.msra.mxu1 %v3453_v21 }
 0x1ff   :  { %2669 = vmatprep.subr.bf16.mxu0 %v3244_v0  ;;  %2677 = vmatprep.subr.bf16.mxu1 %v3244_v0 }
 0x201   :  { %2658 = vmatmul.mubr.msk.bf16.vlgmr.msra.gmra.mrb[28].mxu0 %vm138_vm2, %v903_v17  ;;  %2666 = vmatmul.mubr.msk.bf16.vlgmr.msra.gmra.mrb[28].mxu1 %vm138_vm2, %v903_v17 }
 0x202   :  { %2670 = vmatpush3.bf16.msra.mxu0 %v3416_v11  ;;  %2678 = vmatpush3.bf16.msra.mxu1 %v3419_v13 }
 0x203   :  { %2671 = vmatprep.subr.bf16.mxu0 %v3244_v0  ;;  %2679 = vmatprep.subr.bf16.mxu1 %v3244_v0 }
 0x204   :  { %2673 = vmatprep.mubr.msk.bf16.mxu0 %vm3245_vm0, %v3244_v0  ;;  %2681 = vmatprep.mubr.msk.bf16.mxu1 %vm3245_vm0, %v3244_v0 }
 0x206   :  { %2672 = vmatpush3.bf16.msra.mxu0 %v3424_v14  ;;  %2680 = vmatpush3.bf16.msra.mxu1 %v3431_v16 }
 0x207   :  { %2685 = vmatprep.subr.bf16.mxu0 %v3244_v0  ;;  %2693 = vmatprep.subr.bf16.mxu1 %v3244_v0 }
 0x2cc   :  { %v944_v23 = vpop.f32.mrb[24].mxu0  ;;  %v992_v25 = vpop.f32.mrb[24].mxu1 }
 0x2cd   :  { %v950_v26 = vadd.f32 %v944_v23, %v906_v22  ;;  %v998_v27 = vadd.f32 %v992_v25, %v957_v24  ;;  %v2643_v28 = vpop.f32.mrb[25].mxu0  ;;  %v2651_v29 = vpop.f32.mrb[25].mxu1  ;;  %v1246_v25 = vld [vmem:[#allocation5 + $0x4] sm:$0x3] }
 0x2ce   :  { %v947_v30 = vpop.f32.mrb[26].mxu0  ;;  %v995_v31 = vpop.f32.mrb[26].mxu1 }
 0x2cf   :  { %v2373_v32 = vmul.f32 -1.442695, %v950_v26  ;;  %v2375_v33 = vmul.f32 -1.442695, %v998_v27  ;;  %v2644_v34 = vpop.f32.mrb[27].mxu0  ;;  %v2652_v35 = vpop.f32.mrb[27].mxu1 }
 0x2d0   :  { %v1203_v34 = vld [vmem:[#allocation4 + $0x4] sm:$0x3] }
 0x2d1   :  { %2904 = vpow2.f32 %v2373_v32 }
 0x2d2   :  { %2906 = vpow2.f32 %v2375_v33 }
 0x2d4   :  { %v1040_v36 = vpop.f32.mrb[28].mxu0  ;;  %v1083_v38 = vpop.f32.mrb[28].mxu1 }
 0x2d5   :  { %v1089_v39 = vadd.f32 %v1083_v38, %v1048_v37  ;;  %v2659_v40 = vpop.f32.mrb[29].mxu0  ;;  %v2667_v41 = vpop.f32.mrb[29].mxu1  ;;  %v1046_v48 = vadd.f32 %v1040_v36, %v1005_v46 }
 0x2d6   :  { %v1043_v42 = vpop.f32.mrb[30].mxu0  ;;  %v1086_v43 = vpop.f32.mrb[30].mxu1 }
 0x2d7   :  { %v2660_v44 = vpop.f32.mrb[31].mxu0  ;;  %v2668_v45 = vpop.f32.mrb[31].mxu1  ;;  %v2378_v47 = vmul.f32 -1.442695, %v1089_v39 }
 0x2d9   :  { %2908 = vpow2.f32 %v2378_v47 }
 0x2da   :  { %2910 = vtanh.f32 %v1046_v48 }
 0x2db   :  { %v2905_v49 = vpop.eup %2904 }
 0x2dc   :  { %v2907_v50 = vpop.eup %2906  ;;  %v954_v51 = vadd.f32 1.0, %v2905_v49 }
 0x2dd   :  { %v1002_v52 = vadd.f32 1.0, %v2907_v50 }
 0x2de   :  { %2912 = vrcp.f32 %v954_v51 }
 0x2df   :  { %2914 = vrcp.f32 %v1002_v52 }
 0x2e3   :  { %v2909_v53 = vpop.eup %2908 }
 0x2e4   :  { %v2911_v54 = vpop.eup %2910  ;;  %v1093_v58 = vadd.f32 1.0, %v2909_v53  ;;  %v1302_v53 = vld [vmem:[#allocation2 + $0x6] sm:$0x3] }
 0x2e6   :  { %2916 = vrcp.f32 %v1093_v58 }
 0x2e8   :  { %v2913_v55 = vpop.eup %2912 }
 0x2e9   :  { %v2915_v56 = vpop.eup %2914  ;;  %v1097_v57 = vmul.f32 %v2913_v55, %v2911_v54  ;;  %v1353_v55 = vld [vmem:[#allocation3 + $0x6] sm:$0x3] }
 0x2ea   :  { %v1096_v59 = vmul.f32 %v2915_v56, %v3529_v5 }
 0x2ec   :  { %v3566_v60 = vadd.f32 %v1097_v57, %v1096_v59 }
 0x2ee   :  { %2918 = vtanh.f32 %v3566_v60 }
 0x2f0   :  { %v2917_v61 = vpop.eup %2916 }
 0x2f8   :  { %v2919_v62 = vpop.eup %2918 }
 0x2f9   :  { %v1100_v63 = vmul.f32 %v2919_v62, %v2917_v61 }
 0x2fb   :  { %v1101_v1 = vpack.c.bf16 %v1100_v63, %v1100_v63 }
 0x2fd   :  { %2674 = vmatmul.mubr.msk.bf16.vlgmr.msra.gmra.mrb[32].mxu0 %vm138_vm2, %v1101_v1  ;;  %2682 = vmatmul.mubr.msk.bf16.vlgmr.msra.gmra.mrb[32].mxu1 %vm138_vm2, %v1101_v1  ;;  %1103 = vst.msk [vmem:[#allocation19 + $0x1] sm:$0x1] %vm904_vm3, %v1101_v1 }
 0x2fe   :  { %2686 = vmatpush3.bf16.msra.mxu0 %v3437_v18  ;;  %2694 = vmatpush3.bf16.msra.mxu1 %v3441_v19 }
 0x2ff   :  { %2687 = vmatprep.subr.bf16.mxu0 %v3244_v0  ;;  %2695 = vmatprep.subr.bf16.mxu1 %v3244_v0 }
 0x300   :  { %2689 = vmatprep.mubr.msk.bf16.mxu0 %vm3245_vm0, %v3244_v0  ;;  %2697 = vmatprep.mubr.msk.bf16.mxu1 %vm3245_vm0, %v3244_v0 }
 0x302   :  { %2688 = vmatpush3.bf16.msra.mxu0 %v3446_v20  ;;  %2696 = vmatpush3.bf16.msra.mxu1 %v3453_v21 }
 0x303   :  { %2701 = vmatprep.subr.bf16.mxu0 %v3244_v0  ;;  %2709 = vmatprep.subr.bf16.mxu1 %v3244_v0 }
 0x305   :  { %2690 = vmatmul.mubr.msk.bf16.vlgmr.msra.gmra.mrb[36].mxu0 %vm138_vm2, %v1101_v1  ;;  %2698 = vmatmul.mubr.msk.bf16.vlgmr.msra.gmra.mrb[36].mxu1 %vm138_vm2, %v1101_v1 }
 0x306   :  { %2702 = vmatpush3.bf16.msra.mxu0 %v3416_v11  ;;  %2710 = vmatpush3.bf16.msra.mxu1 %v3419_v13 }
 0x307   :  { %2703 = vmatprep.subr.bf16.mxu0 %v3244_v0  ;;  %2711 = vmatprep.subr.bf16.mxu1 %v3244_v0 }
 0x308   :  { %2705 = vmatprep.mubr.msk.bf16.mxu0 %vm3245_vm0, %v3244_v0  ;;  %2713 = vmatprep.mubr.msk.bf16.mxu1 %vm3245_vm0, %v3244_v0 }
 0x30a   :  { %2704 = vmatpush3.bf16.msra.mxu0 %v3424_v14  ;;  %2712 = vmatpush3.bf16.msra.mxu1 %v3431_v16 }
 0x30b   :  { %2717 = vmatprep.subr.bf16.mxu0 %v3244_v0  ;;  %2725 = vmatprep.subr.bf16.mxu1 %v3244_v0 }
 0x3d0   :  { %v1142_v3 = vpop.f32.mrb[32].mxu0  ;;  %v1190_v5 = vpop.f32.mrb[32].mxu1 }
 0x3d1   :  { %v1148_v6 = vadd.f32 %v1142_v3, %v1104_v2  ;;  %v1196_v7 = vadd.f32 %v1190_v5, %v1155_v4  ;;  %v2675_v8 = vpop.f32.mrb[33].mxu0  ;;  %v2683_v9 = vpop.f32.mrb[33].mxu1  ;;  %v1444_v5 = vld [vmem:[#allocation5 + $0x6] sm:$0x3] }
 0x3d2   :  { %v1145_v10 = vpop.f32.mrb[34].mxu0  ;;  %v1193_v12 = vpop.f32.mrb[34].mxu1 }
 0x3d3   :  { %v2380_v15 = vmul.f32 -1.442695, %v1148_v6  ;;  %v2382_v17 = vmul.f32 -1.442695, %v1196_v7  ;;  %v2676_v22 = vpop.f32.mrb[35].mxu0  ;;  %v2684_v23 = vpop.f32.mrb[35].mxu1 }
 0x3d4   :  { %v1401_v22 = vld [vmem:[#allocation4 + $0x6] sm:$0x3] }
 0x3d5   :  { %2920 = vpow2.f32 %v2380_v15 }
 0x3d6   :  { %2922 = vpow2.f32 %v2382_v17 }
 0x3d8   :  { %v1238_v24 = vpop.f32.mrb[36].mxu0  ;;  %v1281_v26 = vpop.f32.mrb[36].mxu1 }
 0x3d9   :  { %v1287_v27 = vadd.f32 %v1281_v26, %v1246_v25  ;;  %v2691_v28 = vpop.f32.mrb[37].mxu0  ;;  %v2699_v29 = vpop.f32.mrb[37].mxu1  ;;  %v1244_v36 = vadd.f32 %v1238_v24, %v1203_v34 }
 0x3da   :  { %v1241_v30 = vpop.f32.mrb[38].mxu0  ;;  %v1284_v31 = vpop.f32.mrb[38].mxu1 }
 0x3db   :  { %v2692_v32 = vpop.f32.mrb[39].mxu0  ;;  %v2700_v33 = vpop.f32.mrb[39].mxu1  ;;  %v2385_v35 = vmul.f32 -1.442695, %v1287_v27 }
 0x3dd   :  { %2924 = vpow2.f32 %v2385_v35 }
 0x3de   :  { %2926 = vtanh.f32 %v1244_v36 }
 0x3df   :  { %v2921_v37 = vpop.eup %2920 }
 0x3e0   :  { %v2923_v38 = vpop.eup %2922  ;;  %v1152_v39 = vadd.f32 1.0, %v2921_v37 }
 0x3e1   :  { %v1200_v40 = vadd.f32 1.0, %v2923_v38 }
 0x3e2   :  { %2928 = vrcp.f32 %v1152_v39 }
 0x3e3   :  { %2930 = vrcp.f32 %v1200_v40 }
 0x3e7   :  { %v2925_v41 = vpop.eup %2924 }
 0x3e8   :  { %v2927_v42 = vpop.eup %2926  ;;  %v1291_v46 = vadd.f32 1.0, %v2925_v41 }
 0x3ea   :  { %2932 = vrcp.f32 %v1291_v46 }
 0x3ec   :  { %v2929_v43 = vpop.eup %2928 }
 0x3ed   :  { %v2931_v44 = vpop.eup %2930  ;;  %v1295_v45 = vmul.f32 %v2929_v43, %v2927_v42 }
 0x3ee   :  { %v1294_v47 = vmul.f32 %v2931_v44, %v3566_v60 }
 0x3f0   :  { %v3599_v48 = vadd.f32 %v1295_v45, %v1294_v47 }
 0x3f2   :  { %2934 = vtanh.f32 %v3599_v48 }
 0x3f4   :  { %v2933_v49 = vpop.eup %2932 }
 0x3fc   :  { %v2935_v50 = vpop.eup %2934 }
 0x3fd   :  { %v1298_v51 = vmul.f32 %v2935_v50, %v2933_v49  ;;  %v1642_v49 = vld [vmem:[#allocation5 + $0x8] sm:$0x3] }
 0x3ff   :  { %v1299_v52 = vpack.c.bf16 %v1298_v51, %v1298_v51 }
 0x401   :  { %2706 = vmatmul.mubr.msk.bf16.vlgmr.msra.gmra.mrb[40].mxu0 %vm138_vm2, %v1299_v52  ;;  %2714 = vmatmul.mubr.msk.bf16.vlgmr.msra.gmra.mrb[40].mxu1 %vm138_vm2, %v1299_v52  ;;  %1301 = vst.msk [vmem:[#allocation19 + $0x2] sm:$0x1] %vm904_vm3, %v1299_v52 }
 0x402   :  { %2718 = vmatpush3.bf16.msra.mxu0 %v3437_v18  ;;  %2726 = vmatpush3.bf16.msra.mxu1 %v3441_v19 }
 0x403   :  { %2719 = vmatprep.subr.bf16.mxu0 %v3244_v0  ;;  %2727 = vmatprep.subr.bf16.mxu1 %v3244_v0 }
 0x404   :  { %2721 = vmatprep.mubr.msk.bf16.mxu0 %vm3245_vm0, %v3244_v0  ;;  %2729 = vmatprep.mubr.msk.bf16.mxu1 %vm3245_vm0, %v3244_v0 }
 0x406   :  { %2720 = vmatpush3.bf16.msra.mxu0 %v3446_v20  ;;  %2728 = vmatpush3.bf16.msra.mxu1 %v3453_v21 }
 0x407   :  { %2733 = vmatprep.subr.bf16.mxu0 %v3244_v0  ;;  %2741 = vmatprep.subr.bf16.mxu1 %v3244_v0 }
 0x409   :  { %2722 = vmatmul.mubr.msk.bf16.vlgmr.msra.gmra.mrb[44].mxu0 %vm138_vm2, %v1299_v52  ;;  %2730 = vmatmul.mubr.msk.bf16.vlgmr.msra.gmra.mrb[44].mxu1 %vm138_vm2, %v1299_v52 }
 0x40a   :  { %2734 = vmatpush3.bf16.msra.mxu0 %v3416_v11  ;;  %2742 = vmatpush3.bf16.msra.mxu1 %v3419_v13 }
 0x40b   :  { %2735 = vmatprep.subr.bf16.mxu0 %v3244_v0  ;;  %2743 = vmatprep.subr.bf16.mxu1 %v3244_v0 }
 0x40c   :  { %2737 = vmatprep.mubr.msk.bf16.mxu0 %vm3245_vm0, %v3244_v0  ;;  %2745 = vmatprep.mubr.msk.bf16.mxu1 %vm3245_vm0, %v3244_v0 }
 0x40e   :  { %2736 = vmatpush3.bf16.msra.mxu0 %v3424_v14  ;;  %2744 = vmatpush3.bf16.msra.mxu1 %v3431_v16 }
 0x40f   :  { %2749 = vmatprep.subr.bf16.mxu0 %v3244_v0  ;;  %2757 = vmatprep.subr.bf16.mxu1 %v3244_v0 }
 0x4d4   :  { %v1340_v54 = vpop.f32.mrb[40].mxu0  ;;  %v1388_v56 = vpop.f32.mrb[40].mxu1 }
 0x4d5   :  { %v1346_v57 = vadd.f32 %v1340_v54, %v1302_v53  ;;  %v1394_v58 = vadd.f32 %v1388_v56, %v1353_v55  ;;  %v2707_v59 = vpop.f32.mrb[41].mxu0  ;;  %v2715_v60 = vpop.f32.mrb[41].mxu1 }
 0x4d6   :  { %v1343_v61 = vpop.f32.mrb[42].mxu0  ;;  %v1391_v62 = vpop.f32.mrb[42].mxu1 }
 0x4d7   :  { %v2387_v63 = vmul.f32 -1.442695, %v1346_v57  ;;  %v2389_v1 = vmul.f32 -1.442695, %v1394_v58  ;;  %v2708_v2 = vpop.f32.mrb[43].mxu0  ;;  %v2716_v3 = vpop.f32.mrb[43].mxu1 }
 0x4d8   :  { %v1599_v58 = vld [vmem:[#allocation4 + $0x8] sm:$0x3] }
 0x4d9   :  { %2936 = vpow2.f32 %v2387_v63 }
 0x4da   :  { %2938 = vpow2.f32 %v2389_v1 }
 0x4dc   :  { %v1436_v4 = vpop.f32.mrb[44].mxu0  ;;  %v1479_v6 = vpop.f32.mrb[44].mxu1 }
 0x4dd   :  { %v1485_v7 = vadd.f32 %v1479_v6, %v1444_v5  ;;  %v2723_v8 = vpop.f32.mrb[45].mxu0  ;;  %v2731_v9 = vpop.f32.mrb[45].mxu1  ;;  %v1442_v24 = vadd.f32 %v1436_v4, %v1401_v22  ;;  %v3671_v22 = vld [vmem:[#allocation13 + $0x20] sm:$0xff]  }
 0x4de   :  { %v1439_v10 = vpop.f32.mrb[46].mxu0  ;;  %v1482_v12 = vpop.f32.mrb[46].mxu1 }
 0x4df   :  { %v2724_v15 = vpop.f32.mrb[47].mxu0  ;;  %v2732_v17 = vpop.f32.mrb[47].mxu1  ;;  %v2392_v23 = vmul.f32 -1.442695, %v1485_v7 }
 0x4e1   :  { %2940 = vpow2.f32 %v2392_v23  ;;  %v3674_v23 = vld [vmem:[#allocation13 + $0x30] sm:$0xff]  }
 0x4e2   :  { %2942 = vtanh.f32 %v1442_v24  ;;  %v3683_v24 = vld [vmem:[#allocation13 + $0x28] sm:$0xff]  }
 0x4e3   :  { %v2937_v25 = vpop.eup %2936 }
 0x4e4   :  { %v2939_v26 = vpop.eup %2938  ;;  %v1350_v27 = vadd.f32 1.0, %v2937_v25  ;;  %v3691_v25 = vld [vmem:[#allocation13] sm:$0xff]  }
 0x4e5   :  { %v1398_v28 = vadd.f32 1.0, %v2939_v26  ;;  %v3694_v26 = vld [vmem:[#allocation13 + $0x10] sm:$0xff]  }
 0x4e6   :  { %2944 = vrcp.f32 %v1350_v27  ;;  %v3706_v27 = vld [vmem:[#allocation13 + $0x18] sm:$0xff]  }
 0x4e7   :  { %2946 = vrcp.f32 %v1398_v28  ;;  %v1698_v28 = vld [vmem:[#allocation2 + $0xa] sm:$0x3] }
 0x4eb   :  { %v2941_v29 = vpop.eup %2940 }
 0x4ec   :  { %v2943_v30 = vpop.eup %2942  ;;  %v1489_v34 = vadd.f32 1.0, %v2941_v29 }
 0x4ee   :  { %2948 = vrcp.f32 %v1489_v34 }
 0x4f0   :  { %v2945_v31 = vpop.eup %2944 }
 0x4f1   :  { %v2947_v32 = vpop.eup %2946  ;;  %v1493_v33 = vmul.f32 %v2945_v31, %v2943_v30  ;;  %v1749_v30 = vld [vmem:[#allocation3 + $0xa] sm:$0x3] }
 0x4f2   :  { %v1492_v35 = vmul.f32 %v2947_v32, %v3599_v48 }
 0x4f4   :  { %v3632_v36 = vadd.f32 %v1493_v33, %v1492_v35 }
 0x4f6   :  { %2950 = vtanh.f32 %v3632_v36 }
 0x4f8   :  { %v2949_v37 = vpop.eup %2948 }
 0x500   :  { %v2951_v38 = vpop.eup %2950 }
 0x501   :  { %v1496_v39 = vmul.f32 %v2951_v38, %v2949_v37 }
 0x503   :  { %v1497_v40 = vpack.c.bf16 %v1496_v39, %v1496_v39 }
 0x505   :  { %2738 = vmatmul.mubr.msk.bf16.vlgmr.msra.gmra.mrb[48].mxu0 %vm138_vm2, %v1497_v40  ;;  %2746 = vmatmul.mubr.msk.bf16.vlgmr.msra.gmra.mrb[48].mxu1 %vm138_vm2, %v1497_v40  ;;  %1499 = vst.msk [vmem:[#allocation19 + $0x3] sm:$0x1] %vm904_vm3, %v1497_v40 }
 0x506   :  { %2750 = vmatpush3.bf16.msra.mxu0 %v3437_v18  ;;  %2758 = vmatpush3.bf16.msra.mxu1 %v3441_v19  ;;  %v1551_v18 = vld [vmem:[#allocation3 + $0x8] sm:$0x3] }
 0x507   :  { %2751 = vmatprep.subr.bf16.mxu0 %v3244_v0  ;;  %2759 = vmatprep.subr.bf16.mxu1 %v3244_v0 }
 0x508   :  { %2753 = vmatprep.mubr.msk.bf16.mxu0 %vm3245_vm0, %v3244_v0  ;;  %2761 = vmatprep.mubr.msk.bf16.mxu1 %vm3245_vm0, %v3244_v0 }
 0x50a   :  { %2752 = vmatpush3.bf16.msra.mxu0 %v3446_v20  ;;  %2760 = vmatpush3.bf16.msra.mxu1 %v3453_v21 }
 0x50b   :  { %2765 = vmatprep.subr.bf16.mxu0 %v3244_v0  ;;  %2773 = vmatprep.subr.bf16.mxu1 %v3244_v0 }
 0x50d   :  { %2754 = vmatmul.mubr.msk.bf16.vlgmr.msra.gmra.mrb[52].mxu0 %vm138_vm2, %v1497_v40  ;;  %2762 = vmatmul.mubr.msk.bf16.vlgmr.msra.gmra.mrb[52].mxu1 %vm138_vm2, %v1497_v40 }
 0x50e   :  { %2766 = vmatpush3.bf16.msra.mxu0 %v3416_v11  ;;  %2774 = vmatpush3.bf16.msra.mxu1 %v3419_v13  ;;  %v1500_v11 = vld [vmem:[#allocation2 + $0x8] sm:$0x3] }
 0x50f   :  { %2767 = vmatprep.subr.bf16.mxu0 %v3244_v0  ;;  %2775 = vmatprep.subr.bf16.mxu1 %v3244_v0 }
 0x510   :  { %2769 = vmatprep.mubr.msk.bf16.mxu0 %vm3245_vm0, %v3244_v0  ;;  %2777 = vmatprep.mubr.msk.bf16.mxu1 %vm3245_vm0, %v3244_v0 }
 0x512   :  { %2768 = vmatpush3.bf16.msra.mxu0 %v3424_v14  ;;  %2776 = vmatpush3.bf16.msra.mxu1 %v3431_v16 }
 0x513   :  { %2781 = vmatprep.subr.bf16.mxu0 %v3244_v0  ;;  %2789 = vmatprep.subr.bf16.mxu1 %v3244_v0 }
 0x5d8   :  { %v1538_v13 = vpop.f32.mrb[48].mxu0  ;;  %v1586_v19 = vpop.f32.mrb[48].mxu1 }
 0x5d9   :  { %v1544_v20 = vadd.f32 %v1538_v13, %v1500_v11  ;;  %v1592_v41 = vadd.f32 %v1586_v19, %v1551_v18  ;;  %v2739_v42 = vpop.f32.mrb[49].mxu0  ;;  %v2747_v43 = vpop.f32.mrb[49].mxu1  ;;  %v1840_v18 = vld [vmem:[#allocation5 + $0xa] sm:$0x3] }
 0x5da   :  { %v1541_v44 = vpop.f32.mrb[50].mxu0  ;;  %v1589_v45 = vpop.f32.mrb[50].mxu1 }
 0x5db   :  { %v2394_v46 = vmul.f32 -1.442695, %v1544_v20  ;;  %v2396_v47 = vmul.f32 -1.442695, %v1592_v41  ;;  %v2740_v48 = vpop.f32.mrb[51].mxu0  ;;  %v2748_v14 = vpop.f32.mrb[51].mxu1 }
 0x5dd   :  { %2952 = vpow2.f32 %v2394_v46 }
 0x5de   :  { %2954 = vpow2.f32 %v2396_v47  ;;  %v1797_v47 = vld [vmem:[#allocation4 + $0xa] sm:$0x3] }
 0x5e0   :  { %v1634_v16 = vpop.f32.mrb[52].mxu0  ;;  %v1677_v50 = vpop.f32.mrb[52].mxu1 }
 0x5e1   :  { %v1683_v51 = vadd.f32 %v1677_v50, %v1642_v49  ;;  %v2755_v52 = vpop.f32.mrb[53].mxu0  ;;  %v2763_v53 = vpop.f32.mrb[53].mxu1  ;;  %v1640_v60 = vadd.f32 %v1634_v16, %v1599_v58 }
 0x5e2   :  { %v1637_v54 = vpop.f32.mrb[54].mxu0  ;;  %v1680_v55 = vpop.f32.mrb[54].mxu1 }
 0x5e3   :  { %v2756_v56 = vpop.f32.mrb[55].mxu0  ;;  %v2764_v57 = vpop.f32.mrb[55].mxu1  ;;  %v2399_v59 = vmul.f32 -1.442695, %v1683_v51 }
 0x5e5   :  { %2956 = vpow2.f32 %v2399_v59 }
 0x5e6   :  { %2958 = vtanh.f32 %v1640_v60 }
 0x5e7   :  { %v2953_v61 = vpop.eup %2952 }
 0x5e8   :  { %v2955_v62 = vpop.eup %2954  ;;  %v1548_v63 = vadd.f32 1.0, %v2953_v61 }
 0x5e9   :  { %v1596_v1 = vadd.f32 1.0, %v2955_v62 }
 0x5ea   :  { %2960 = vrcp.f32 %v1548_v63 }
 0x5eb   :  { %2962 = vrcp.f32 %v1596_v1  ;;  %v3727_v1 = vld [vmem:[#allocation13 + $0x38] sm:$0xff]  }
 0x5ef   :  { %v2957_v2 = vpop.eup %2956 }
 0x5f0   :  { %v2959_v3 = vpop.eup %2958  ;;  %v1687_v7 = vadd.f32 1.0, %v2957_v2  ;;  %v1896_v2 = vld [vmem:[#allocation2 + $0xc] sm:$0x3] }
 0x5f2   :  { %2964 = vrcp.f32 %v1687_v7 }
 0x5f4   :  { %v2961_v4 = vpop.eup %2960 }
 0x5f5   :  { %v2963_v5 = vpop.eup %2962  ;;  %v1691_v6 = vmul.f32 %v2961_v4, %v2959_v3  ;;  %v1947_v4 = vld [vmem:[#allocation3 + $0xc] sm:$0x3] }
 0x5f6   :  { %v1690_v8 = vmul.f32 %v2963_v5, %v3632_v36 }
 0x5f8   :  { %v3665_v9 = vadd.f32 %v1691_v6, %v1690_v8 }
 0x5fa   :  { %2966 = vtanh.f32 %v3665_v9 }
 0x5fc   :  { %v2965_v10 = vpop.eup %2964 }
 0x604   :  { %v2967_v12 = vpop.eup %2966 }
 0x605   :  { %v1694_v15 = vmul.f32 %v2967_v12, %v2965_v10 }
 0x607   :  { %v1695_v17 = vpack.c.bf16 %v1694_v15, %v1694_v15 }
 0x609   :  { %2770 = vmatmul.mubr.msk.bf16.vlgmr.msra.gmra.mrb[56].mxu0 %vm138_vm2, %v1695_v17  ;;  %2778 = vmatmul.mubr.msk.bf16.vlgmr.msra.gmra.mrb[56].mxu1 %vm138_vm2, %v1695_v17  ;;  %1697 = vst.msk [vmem:[#allocation19 + $0x4] sm:$0x1] %vm904_vm3, %v1695_v17 }
 0x60a   :  { %2782 = vmatpush3.bf16.msra.mxu0 %v3671_v22  ;;  %2790 = vmatpush3.bf16.msra.mxu1 %v3674_v23 }
 0x60b   :  { %2783 = vmatprep.subr.bf16.mxu0 %v3244_v0  ;;  %2791 = vmatprep.subr.bf16.mxu1 %v3244_v0 }
 0x60c   :  { %2785 = vmatprep.mubr.msk.bf16.mxu0 %vm3245_vm0, %v3244_v0  ;;  %2793 = vmatprep.mubr.msk.bf16.mxu1 %vm3245_vm0, %v3244_v0 }
 0x60e   :  { %2784 = vmatpush3.bf16.msra.mxu0 %v3683_v24  ;;  %2792 = vmatpush3.bf16.msra.mxu1 %v3453_v21  ;;  %v3703_v21 = vld [vmem:[#allocation13 + $0x8] sm:$0xff]  }
 0x60f   :  { %2797 = vmatprep.subr.bf16.mxu0 %v3244_v0  ;;  %2805 = vmatprep.subr.bf16.mxu1 %v3244_v0 }
 0x611   :  { %2786 = vmatmul.mubr.msk.bf16.vlgmr.msra.gmra.mrb[60].mxu0 %vm138_vm2, %v1695_v17  ;;  %2794 = vmatmul.mubr.msk.bf16.vlgmr.msra.gmra.mrb[60].mxu1 %vm138_vm2, %v1695_v17 }
 0x612   :  { %2798 = vmatpush3.bf16.msra.mxu0 %v3691_v25  ;;  %2806 = vmatpush3.bf16.msra.mxu1 %v3694_v26 }
 0x613   :  { %2799 = vmatprep.subr.bf16.mxu0 %v3244_v0  ;;  %2807 = vmatprep.subr.bf16.mxu1 %v3244_v0 }
 0x614   :  { %2801 = vmatprep.mubr.msk.bf16.mxu0 %vm3245_vm0, %v3244_v0  ;;  %2809 = vmatprep.mubr.msk.bf16.mxu1 %vm3245_vm0, %v3244_v0 }
 0x616   :  { %2800 = vmatpush3.bf16.msra.mxu0 %v3703_v21  ;;  %2808 = vmatpush3.bf16.msra.mxu1 %v3706_v27 }
 0x617   :  { %2813 = vmatprep.subr.bf16.mxu0 %v3244_v0  ;;  %2821 = vmatprep.subr.bf16.mxu1 %v3244_v0 }
 0x6dc   :  { %v1736_v29 = vpop.f32.mrb[56].mxu0  ;;  %v1784_v31 = vpop.f32.mrb[56].mxu1 }
 0x6dd   :  { %v1742_v32 = vadd.f32 %v1736_v29, %v1698_v28  ;;  %v1790_v33 = vadd.f32 %v1784_v31, %v1749_v30  ;;  %v2771_v34 = vpop.f32.mrb[57].mxu0  ;;  %v2779_v35 = vpop.f32.mrb[57].mxu1 }
 0x6de   :  { %v1739_v36 = vpop.f32.mrb[58].mxu0  ;;  %v1787_v37 = vpop.f32.mrb[58].mxu1 }
 0x6df   :  { %v2401_v38 = vmul.f32 -1.442695, %v1742_v32  ;;  %v2403_v39 = vmul.f32 -1.442695, %v1790_v33  ;;  %v2772_v40 = vpop.f32.mrb[59].mxu0  ;;  %v2780_v11 = vpop.f32.mrb[59].mxu1 }
 0x6e0   :  { %v1995_v36 = vld [vmem:[#allocation4 + $0xc] sm:$0x3] }
 0x6e1   :  { %2968 = vpow2.f32 %v2401_v38 }
 0x6e2   :  { %2970 = vpow2.f32 %v2403_v39 }
 0x6e4   :  { %v1832_v13 = vpop.f32.mrb[60].mxu0  ;;  %v1875_v19 = vpop.f32.mrb[60].mxu1 }
 0x6e5   :  { %v1881_v20 = vadd.f32 %v1875_v19, %v1840_v18  ;;  %v2787_v41 = vpop.f32.mrb[61].mxu0  ;;  %v2795_v42 = vpop.f32.mrb[61].mxu1  ;;  %v1838_v14 = vadd.f32 %v1832_v13, %v1797_v47 }
 0x6e6   :  { %v1835_v43 = vpop.f32.mrb[62].mxu0  ;;  %v1878_v44 = vpop.f32.mrb[62].mxu1 }
 0x6e7   :  { %v2788_v45 = vpop.f32.mrb[63].mxu0  ;;  %v2796_v46 = vpop.f32.mrb[63].mxu1  ;;  %v2406_v48 = vmul.f32 -1.442695, %v1881_v20 }
 0x6e9   :  { %2972 = vpow2.f32 %v2406_v48 }
 0x6ea   :  { %2974 = vtanh.f32 %v1838_v14 }
 0x6eb   :  { %v2969_v16 = vpop.eup %2968 }
 0x6ec   :  { %v2971_v49 = vpop.eup %2970  ;;  %v1746_v50 = vadd.f32 1.0, %v2969_v16  ;;  %v2145_v16 = vld [vmem:[#allocation3 + $0xe] sm:$0x3] }
 0x6ed   :  { %v1794_v51 = vadd.f32 1.0, %v2971_v49 }
 0x6ee   :  { %2976 = vrcp.f32 %v1746_v50 }
 0x6ef   :  { %2978 = vrcp.f32 %v1794_v51 }
 0x6f3   :  { %v2973_v52 = vpop.eup %2972 }
 0x6f4   :  { %v2975_v53 = vpop.eup %2974  ;;  %v1885_v57 = vadd.f32 1.0, %v2973_v52 }
 0x6f6   :  { %2980 = vrcp.f32 %v1885_v57 }
 0x6f8   :  { %v2977_v54 = vpop.eup %2976 }
 0x6f9   :  { %v2979_v55 = vpop.eup %2978  ;;  %v1889_v56 = vmul.f32 %v2977_v54, %v2975_v53 }
 0x6fa   :  { %v1888_v58 = vmul.f32 %v2979_v55, %v3665_v9 }
 0x6fc   :  { %v3712_v59 = vadd.f32 %v1889_v56, %v1888_v58 }
 0x6fe   :  { %2982 = vtanh.f32 %v3712_v59 }
 0x700   :  { %v2981_v60 = vpop.eup %2980 }
 0x708   :  { %v2983_v61 = vpop.eup %2982 }
 0x709   :  { %v1892_v62 = vmul.f32 %v2983_v61, %v2981_v60 }
 0x70b   :  { %v1893_v63 = vpack.c.bf16 %v1892_v62, %v1892_v62 }
 0x70d   :  { %2802 = vmatmul.mubr.msk.bf16.vlgmr.msra.gmra.mrb[64].mxu0 %vm138_vm2, %v1893_v63  ;;  %2810 = vmatmul.mubr.msk.bf16.vlgmr.msra.gmra.mrb[64].mxu1 %vm138_vm2, %v1893_v63  ;;  %1895 = vst.msk [vmem:[#allocation19 + $0x5] sm:$0x1] %vm904_vm3, %v1893_v63 }
 0x70e   :  { %2814 = vmatpush3.bf16.msra.mxu0 %v3671_v22  ;;  %2822 = vmatpush3.bf16.msra.mxu1 %v3674_v23 }
 0x70f   :  { %2815 = vmatprep.subr.bf16.mxu0 %v3244_v0  ;;  %2823 = vmatprep.subr.bf16.mxu1 %v3244_v0 }
 0x710   :  { %2817 = vmatprep.mubr.msk.bf16.mxu0 %vm3245_vm0, %v3244_v0  ;;  %2825 = vmatprep.mubr.msk.bf16.mxu1 %vm3245_vm0, %v3244_v0 }
 0x712   :  { %2816 = vmatpush3.bf16.msra.mxu0 %v3683_v24  ;;  %2824 = vmatpush3.bf16.msra.mxu1 %v3727_v1 }
 0x713   :  { %2829 = vmatprep.subr.bf16.mxu0 %v3244_v0  ;;  %2837 = vmatprep.subr.bf16.mxu1 %v3244_v0 }
 0x715   :  { %2818 = vmatmul.mubr.msk.bf16.vlgmr.msra.gmra.mrb[68].mxu0 %vm138_vm2, %v1893_v63  ;;  %2826 = vmatmul.mubr.msk.bf16.vlgmr.msra.gmra.mrb[68].mxu1 %vm138_vm2, %v1893_v63 }
 0x716   :  { %2830 = vmatpush3.bf16.msra.mxu0 %v3691_v25  ;;  %2838 = vmatpush3.bf16.msra.mxu1 %v3694_v26 }
 0x717   :  { %2831 = vmatprep.subr.bf16.mxu0 %v3244_v0  ;;  %2839 = vmatprep.subr.bf16.mxu1 %v3244_v0 }
 0x718   :  { %2833 = vmatprep.mubr.msk.bf16.mxu0 %vm3245_vm0, %v3244_v0  ;;  %2841 = vmatprep.mubr.msk.bf16.mxu1 %vm3245_vm0, %v3244_v0 }
 0x71a   :  { %2832 = vmatpush3.bf16.msra.mxu0 %v3703_v21  ;;  %2840 = vmatpush3.bf16.msra.mxu1 %v3706_v27  ;;  %v2038_v27 = vld [vmem:[#allocation5 + $0xc] sm:$0x3] }
 0x71b   :  { %2845 = vmatprep.subr.bf16.mxu0 %v3244_v0  ;;  %2853 = vmatprep.subr.bf16.mxu1 %v3244_v0 }
 0x7e0   :  { %v1934_v3 = vpop.f32.mrb[64].mxu0  ;;  %v1982_v5 = vpop.f32.mrb[64].mxu1 }
 0x7e1   :  { %v1940_v6 = vadd.f32 %v1934_v3, %v1896_v2  ;;  %v1988_v7 = vadd.f32 %v1982_v5, %v1947_v4  ;;  %v2803_v8 = vpop.f32.mrb[65].mxu0  ;;  %v2811_v9 = vpop.f32.mrb[65].mxu1  ;;  %v2193_v5 = vld [vmem:[#allocation4 + $0xe] sm:$0x3] }
 0x7e2   :  { %v1937_v10 = vpop.f32.mrb[66].mxu0  ;;  %v1985_v12 = vpop.f32.mrb[66].mxu1 }
 0x7e3   :  { %v2408_v15 = vmul.f32 -1.442695, %v1940_v6  ;;  %v2410_v17 = vmul.f32 -1.442695, %v1988_v7  ;;  %v2804_v25 = vpop.f32.mrb[67].mxu0  ;;  %v2812_v26 = vpop.f32.mrb[67].mxu1 }
 0x7e5   :  { %2984 = vpow2.f32 %v2408_v15 }
 0x7e6   :  { %2986 = vpow2.f32 %v2410_v17 }
 0x7e8   :  { %v2030_v21 = vpop.f32.mrb[68].mxu0  ;;  %v2073_v28 = vpop.f32.mrb[68].mxu1 }
 0x7e9   :  { %v2079_v29 = vadd.f32 %v2073_v28, %v2038_v27  ;;  %v2819_v30 = vpop.f32.mrb[69].mxu0  ;;  %v2827_v31 = vpop.f32.mrb[69].mxu1  ;;  %v2036_v38 = vadd.f32 %v2030_v21, %v1995_v36 }
 0x7ea   :  { %v2033_v32 = vpop.f32.mrb[70].mxu0  ;;  %v2076_v33 = vpop.f32.mrb[70].mxu1 }
 0x7eb   :  { %v2820_v34 = vpop.f32.mrb[71].mxu0  ;;  %v2828_v35 = vpop.f32.mrb[71].mxu1  ;;  %v2413_v37 = vmul.f32 -1.442695, %v2079_v29 }
 0x7ed   :  { %2988 = vpow2.f32 %v2413_v37 }
 0x7ee   :  { %2990 = vtanh.f32 %v2036_v38 }
 0x7ef   :  { %v2985_v39 = vpop.eup %2984 }
 0x7f0   :  { %v2987_v40 = vpop.eup %2986  ;;  %v1944_v11 = vadd.f32 1.0, %v2985_v39 }
 0x7f1   :  { %v1992_v13 = vadd.f32 1.0, %v2987_v40 }
 0x7f2   :  { %2992 = vrcp.f32 %v1944_v11 }
 0x7f3   :  { %2994 = vrcp.f32 %v1992_v13 }
 0x7f7   :  { %v2989_v18 = vpop.eup %2988 }
 0x7f8   :  { %v2991_v19 = vpop.eup %2990  ;;  %v2083_v43 = vadd.f32 1.0, %v2989_v18 }
 0x7fa   :  { %2996 = vrcp.f32 %v2083_v43 }
 0x7fc   :  { %v2993_v20 = vpop.eup %2992 }
 0x7fd   :  { %v2995_v41 = vpop.eup %2994  ;;  %v2087_v42 = vmul.f32 %v2993_v20, %v2991_v19 }
 0x7fe   :  { %v2086_v44 = vmul.f32 %v2995_v41, %v3712_v59  ;;  %v2236_v59 = vld [vmem:[#allocation5 + $0xe] sm:$0x3] }
 0x800   :  { %v3747_v45 = vadd.f32 %v2087_v42, %v2086_v44 }
 0x802   :  { %2998 = vtanh.f32 %v3747_v45 }
 0x804   :  { %v2997_v46 = vpop.eup %2996 }
 0x80c   :  { %v2999_v47 = vpop.eup %2998 }
 0x80d   :  { %v2090_v48 = vmul.f32 %v2999_v47, %v2997_v46 }
 0x80f   :  { %v2091_v14 = vpack.c.bf16 %v2090_v48, %v2090_v48 }
 0x811   :  { %2834 = vmatmul.mubr.msk.bf16.vlgmr.msra.gmra.mrb[72].mxu0 %vm138_vm2, %v2091_v14  ;;  %2842 = vmatmul.mubr.msk.bf16.vlgmr.msra.gmra.mrb[72].mxu1 %vm138_vm2, %v2091_v14  ;;  %2093 = vst.msk [vmem:[#allocation19 + $0x6] sm:$0x1] %vm904_vm3, %v2091_v14 }
 0x812   :  { %2846 = vmatpush3.bf16.msra.mxu0 %v3671_v22  ;;  %2854 = vmatpush3.bf16.msra.mxu1 %v3674_v23  ;;  %v2094_v22 = vld [vmem:[#allocation2 + $0xe] sm:$0x3] }
 0x813   :  { %2847 = vmatprep.subr.bf16.mxu0 %v3244_v0  ;;  %2855 = vmatprep.subr.bf16.mxu1 %v3244_v0 }
 0x814   :  { %2849 = vmatprep.mubr.msk.bf16.mxu0 %vm3245_vm0, %v3244_v0  ;;  %2857 = vmatprep.mubr.msk.bf16.mxu1 %vm3245_vm0, %v3244_v0 }
 0x816   :  { %2848 = vmatpush3.bf16.msra.mxu0 %v3683_v24  ;;  %2856 = vmatpush3.bf16.msra.mxu1 %v3727_v1 }
 0x819   :  { %2850 = vmatmul.mubr.msk.bf16.vlgmr.msra.gmra.mrb[76].mxu0 %vm138_vm2, %v2091_v14  ;;  %2858 = vmatmul.mubr.msk.bf16.vlgmr.msra.gmra.mrb[76].mxu1 %vm138_vm2, %v2091_v14 }
 0x8e4   :  { %v2132_v23 = vpop.f32.mrb[72].mxu0  ;;  %v2180_v49 = vpop.f32.mrb[72].mxu1 }
 0x8e5   :  { %v2138_v50 = vadd.f32 %v2132_v23, %v2094_v22  ;;  %v2186_v51 = vadd.f32 %v2180_v49, %v2145_v16  ;;  %v2835_v52 = vpop.f32.mrb[73].mxu0  ;;  %v2843_v53 = vpop.f32.mrb[73].mxu1 }
 0x8e6   :  { %v2135_v54 = vpop.f32.mrb[74].mxu0  ;;  %v2183_v55 = vpop.f32.mrb[74].mxu1 }
 0x8e7   :  { %v2415_v56 = vmul.f32 -1.442695, %v2138_v50  ;;  %v2417_v0 = vmul.f32 -1.442695, %v2186_v51  ;;  %v2836_v57 = vpop.f32.mrb[75].mxu0  ;;  %v2844_v24 = vpop.f32.mrb[75].mxu1 }
 0x8e9   :  { %3000 = vpow2.f32 %v2415_v56 }
 0x8ea   :  { %3002 = vpow2.f32 %v2417_v0 }
 0x8ec   :  { %v2228_v58 = vpop.f32.mrb[76].mxu0  ;;  %v2271_v60 = vpop.f32.mrb[76].mxu1 }
 0x8ed   :  { %v2277_v61 = vadd.f32 %v2271_v60, %v2236_v59  ;;  %v2851_v62 = vpop.f32.mrb[77].mxu0  ;;  %v2859_v63 = vpop.f32.mrb[77].mxu1  ;;  %v2234_v7 = vadd.f32 %v2228_v58, %v2193_v5 }
 0x8ee   :  { %v2231_v1 = vpop.f32.mrb[78].mxu0  ;;  %v2274_v2 = vpop.f32.mrb[78].mxu1 }
 0x8ef   :  { %v2852_v3 = vpop.f32.mrb[79].mxu0  ;;  %v2860_v4 = vpop.f32.mrb[79].mxu1  ;;  %v2420_v6 = vmul.f32 -1.442695, %v2277_v61 }
 0x8f1   :  { %3004 = vpow2.f32 %v2420_v6 }
 0x8f2   :  { %3006 = vtanh.f32 %v2234_v7 }
 0x8f3   :  { %v3001_v8 = vpop.eup %3000 }
 0x8f4   :  { %v3003_v9 = vpop.eup %3002  ;;  %v2142_v10 = vadd.f32 1.0, %v3001_v8 }
 0x8f5   :  { %v2190_v12 = vadd.f32 1.0, %v3003_v9 }
 0x8f6   :  { %3008 = vrcp.f32 %v2142_v10 }
 0x8f7   :  { %3010 = vrcp.f32 %v2190_v12 }
 0x8fb   :  { %v3005_v15 = vpop.eup %3004 }
 0x8fc   :  { %v3007_v17 = vpop.eup %3006  ;;  %v2281_v27 = vadd.f32 1.0, %v3005_v15 }
 0x8fe   :  { %3012 = vrcp.f32 %v2281_v27 }
 0x900   :  { %v3009_v25 = vpop.eup %3008 }
 0x901   :  { %v3011_v26 = vpop.eup %3010  ;;  %v2285_v21 = vmul.f32 %v3009_v25, %v3007_v17 }
 0x902   :  { %v2284_v28 = vmul.f32 %v3011_v26, %v3747_v45 }
 0x904   :  { %v2286_v29 = vadd.f32 %v2285_v21, %v2284_v28 }
 0x906   :  { %2293 = vst.msk [vmem:[#allocation7] sm:$0x3] %vm110_vm1, %v2286_v29  ;;  %2298 = vst.msk [vmem:[#allocation22] sm:$0x3] %vm110_vm1, %v2286_v29  ;;  %3014 = vtanh.f32 %v2286_v29 }
 0x908   :  { %v3013_v30 = vpop.eup %3012 }
 0x910   :  { %v3015_v31 = vpop.eup %3014 }
 0x911   :  { %v2288_v32 = vmul.f32 %v3015_v31, %v3013_v30 }
 0x913   :  { %v2289_v33 = vpack.c.bf16 %v2288_v32, %v2288_v32  ;;  %2292 = vst.msk [vmem:[#allocation6] sm:$0x3] %vm110_vm1, %v2288_v32  ;;  %2297 = vst.msk [vmem:[#allocation20] sm:$0x3] %vm110_vm1, %v2288_v32 }
 0x914   :  { %3167 = shalt.err (!%p3164_p10)
}
 0x915   :  { %s3168_s25 = scalar_lea.hbm %s3831_s7, 32 }
 0x916   :  { %p3169_p11 = scmp.ne.s32.totalorder %s3831_s7, %s3168_s25  ;;  %p3172_p12 = scmp.lt.u32.totalorder %s3168_s25, %s3831_s7 }
 0x918   :  { %p3174_p13 = pnand %p3172_p12, %p3169_p11 }
 0x91a   :  { %3177 = shalt.err (!%p3174_p13)
}
 0x91b   :  { %2320 = dma.vmem_to_hbm [thread:$0]  %s2318_s13, 32, %s3831_s7, [#allocation21]   ;;  %2291 = vst.msk [vmem:[#allocation19 + $0x7] sm:$0x1] %vm904_vm3, %v2289_v33 }
 0x91c   :  { %s3178_s28 = scalar_lea.vmem %s3768_s17, 32  ;;  %p3183_p1 = scmp.lt.s32.totalorder %s3768_s17, %s3768_s17 }
 0x91d   :  { %p3179_p0 = scmp.ne.s32.totalorder %s3768_s17, %s3178_s28  ;;  %p3184_p2 = scmp.lt.s32.totalorder %s3178_s28, %s3178_s28 }
 0x91f   :  { %p3185_p3 = por %p3184_p2, %p3183_p1 }
 0x921   :  { %p3186_p4 = pnand %p3185_p3, %p3179_p0 }
 0x923   :  { %3189 = shalt.err (!%p3186_p4)
}
 0x924   :  { %s3190_s11 = scalar_lea.hbm %s3832_s8, 32 }
 0x925   :  { %p3191_p5 = scmp.ne.s32.totalorder %s3832_s8, %s3190_s11  ;;  %p3194_p6 = scmp.lt.u32.totalorder %s3190_s11, %s3832_s8 }
 0x927   :  { %p3196_p7 = pnand %p3194_p6, %p3191_p5 }
 0x929   :  { %3199 = shalt.err (!%p3196_p7)
}
 0x92a   :  { %2330 = dma.vmem_to_hbm [thread:$0]  %s3768_s17, 32, %s3832_s8, [#allocation21]  }
 0x92b   :  { %s3200_s22 = scalar_lea.vmem %s3772_s19, 128  ;;  %p3205_p9 = scmp.lt.s32.totalorder %s3772_s19, %s3772_s19 }
 0x92c   :  { %p3201_p8 = scmp.ne.s32.totalorder %s3772_s19, %s3200_s22  ;;  %p3206_p10 = scmp.lt.s32.totalorder %s3200_s22, %s3200_s22 }
 0x92e   :  { %p3207_p11 = por %p3206_p10, %p3205_p9 }
 0x930   :  { %p3208_p12 = pnand %p3207_p11, %p3201_p8 }
 0x932   :  { %3211 = shalt.err (!%p3208_p12)
}
 0x933   :  { %s3212_s14 = scalar_lea.hbm %s3830_s6, 128 }
 0x934   :  { %p3213_p13 = scmp.ne.s32.totalorder %s3830_s6, %s3212_s14  ;;  %p3216_p0 = scmp.lt.u32.totalorder %s3212_s14, %s3830_s6 }
 0x936   :  { %p3218_p1 = pnand %p3216_p0, %p3213_p13 }
 0x938   :  { %3221 = shalt.err (!%p3218_p1)
}
 0x939   :  { %2310 = dma.vmem_to_hbm [thread:$0]  %s3772_s19, 128, %s3830_s6, [#allocation10], %s3239_s3, %s3239_s3, %s3240_s20  }
 0x93a   :  { %3230 = dma.done.wait [#allocation10], 128  }
 0x93b   :  { %3231 = vsyncadd [#allocation10], 4294967168 }
 0x93c   :  { %3232 = dma.done.wait [#allocation21], 64  }
 0x93d   :  { %3233 = vsyncadd [#allocation21], 4294967232 }
 0x93e   :  { %2340 = vsyncpa [#allocation9], 1 }
 0x93f   :  { %2341 = vsyncpa [#allocation12], 1 }
 0x940   :  { %2342 = vsyncpa [#allocation15], 1 }
 0x941   :  { %2343 = vsyncpa [#allocation18], 1 }
 0x942   :  { %2344 = vsyncpa [#allocation10], 1 }
 0x943   :  { %2345 = vsyncpa [#allocation21], 1 }

</bundles_post_ra>
